<compile_context>
chip_gen: v6e
topology: v6e:2x2x1
jax: 0.10.0
libtpu: 0.0.40
codegen_flags: <defaults>
</compile_context>

<pallas_src>
import functools

import jax
import jax.numpy as jnp
from jax import lax
from jax.experimental import pallas as pl
from jax.experimental.pallas import tpu as pltpu

LANE = 128                      # TPU lane width: channel padding granularity
COMPUTE_DTYPE = jnp.bfloat16    # MXU input dtype (f32 accumulation/epilogue)


def _round_up(x, m):
    return ((x + m - 1) // m) * m


# --------------------------- fused conv+BN kernel ---------------------------

def _conv_bn_kernel(x_ref, w_ref, scale_ref, bias_ref, *rest,
                    KH, KW, stride, Hout, Wout, apply_relu, has_residual):
    """One (image, Cout-tile) per grid step.

    x_ref:     (1, Hp, Wp, Cin_pad)   bf16, spatially padded, channel padded
    w_ref:     (KH*KW, Cin_pad, Ct)   bf16
    scale_ref: (1, Ct) f32  folded-BN scale
    bias_ref:  (1, Ct) f32  folded-BN bias
    rest:      [res_ref (1,Hout,Wout,Ct) bf16]  o_ref (1,Hout,Wout,Ct) bf16,
               acc_ref (Hout*Wout, Ct) f32 VMEM scratch
    """
    if has_residual:
        res_ref, o_ref, acc_ref = rest
    else:
        o_ref, acc_ref = rest

    Cin = x_ref.shape[-1]
    Ct = o_ref.shape[-1]
    HW = Hout * Wout

    acc_ref[...] = jnp.zeros_like(acc_ref)

    xp = None if stride == 1 else x_ref[0]          # only materialize for stride>1
    for ky in range(KH):
        for kx in range(KW):
            if stride == 1:
                # static ref slice: loads only the shifted window; with C in the
                # lane dim the following reshape is layout-preserving.
                slab = x_ref[0, ky:ky + Hout, kx:kx + Wout, :]
            else:
                slab = xp[ky:ky + stride * (Hout - 1) + 1:stride,
                          kx:kx + stride * (Wout - 1) + 1:stride, :]
            slab = slab.reshape(HW, Cin)
            acc_ref[...] += jnp.dot(slab, w_ref[ky * KW + kx],
                                    preferred_element_type=jnp.float32)

    # f32 epilogue: folded BN, optional residual add, optional ReLU.
    out = acc_ref[...] * scale_ref[...] + bias_ref[...]
    if has_residual:
        out = out + res_ref[0].reshape(HW, Ct).astype(jnp.float32)
    if apply_relu:
        out = jnp.maximum(out, 0.0)
    o_ref[...] = out.reshape(1, Hout, Wout, Ct).astype(o_ref.dtype)


def conv_bn(x_nhwc, w_hwio, scale, bias, *, stride=1, padding=0,
            residual=None, relu=True):
    """Fused conv2d(bias=False) + folded-BN [+ residual add] [+ ReLU].

    x_nhwc:   (N, H, W, Cin_pad) bf16, channel dim already padded to 128-mult.
    w_hwio:   (KH, KW, Cin, Cout) f32 (unpadded; padded/cast here).
    scale/bias: (Cout,) folded BatchNorm.
    residual: optional (N, Hout, Wout, Cout_pad) bf16, channel padded.
    Returns (N, Hout, Wout, Cout_pad) bf16 (channel padded, lane dense).
    """
    N, H, W, Cin_pad = x_nhwc.shape
    KH, KW, Cin, Cout = w_hwio.shape
    Cout_pad = _round_up(Cout, LANE)

    # Pad weights/BN params into lane-dense layout (zeros in padded channels
    # guarantee padded output channels are exactly 0).
    w_p = jnp.pad(w_hwio.astype(COMPUTE_DTYPE),
                  ((0, 0), (0, 0), (0, Cin_pad - Cin), (0, Cout_pad - Cout)))
    w_r = w_p.reshape(KH * KW, Cin_pad, Cout_pad)
    scale_r = jnp.pad(scale.astype(jnp.float32).reshape(1, Cout),
                      ((0, 0), (0, Cout_pad - Cout)))
    bias_r = jnp.pad(bias.astype(jnp.float32).reshape(1, Cout),
                     ((0, 0), (0, Cout_pad - Cout)))

    if padding:
        x_nhwc = jnp.pad(
            x_nhwc, ((0, 0), (padding, padding), (padding, padding), (0, 0)))
    Hp, Wp = H + 2 * padding, W + 2 * padding
    Hout = (Hp - KH) // stride + 1
    Wout = (Wp - KW) // stride + 1

    # Cout tile: 256-aligned where possible (v6e/v7x MXU), else 128 (v5e).
    Ct = 256 if Cout_pad % 256 == 0 else 128
    n_ct = Cout_pad // Ct

    kernel = functools.partial(
        _conv_bn_kernel, KH=KH, KW=KW, stride=stride, Hout=Hout, Wout=Wout,
        apply_relu=relu, has_residual=residual is not None)

    in_specs = [
        pl.BlockSpec((1, Hp, Wp, Cin_pad), lambda n, j: (n, 0, 0, 0)),
        pl.BlockSpec((KH * KW, Cin_pad, Ct), lambda n, j: (0, 0, j)),
        pl.BlockSpec((1, Ct), lambda n, j: (0, j)),
        pl.BlockSpec((1, Ct), lambda n, j: (0, j)),
    ]
    args = [x_nhwc, w_r, scale_r, bias_r]
    if residual is not None:
        in_specs.append(
            pl.BlockSpec((1, Hout, Wout, Ct), lambda n, j: (n, 0, 0, j)))
        args.append(residual)

    return pl.pallas_call(
        kernel,
        out_shape=jax.ShapeDtypeStruct((N, Hout, Wout, Cout_pad), COMPUTE_DTYPE),
        grid_spec=pltpu.PrefetchScalarGridSpec(
            num_scalar_prefetch=0,
            grid=(N, n_ct),
            in_specs=in_specs,
            out_specs=pl.BlockSpec((1, Hout, Wout, Ct),
                                   lambda n, j: (n, 0, 0, j)),
            scratch_shapes=[pltpu.VMEM((Hout * Wout, Ct), jnp.float32)],
        ),
        compiler_params=pltpu.CompilerParams(
            dimension_semantics=("parallel", "parallel"),
            vmem_limit_bytes=32 * 1024 * 1024),
    )(*args)


# ---------------- parameter setup (deterministic, synthetic) ----------------

def _fold_bn(gamma, beta, mean, var, eps=1e-5):
    scale = gamma / jnp.sqrt(var + eps)
    bias = beta - mean * scale
    return scale, bias


def init_basic_block(key, in_channels, out_channels, stride=1):
    ks = jax.random.split(key, 8)

    def conv_w(k, kh, kw, cin, cout):
        w = 0.1 * jax.random.normal(k, (cout, cin, kh, kw), jnp.float32)  # OIHW
        return jnp.transpose(w, (2, 3, 1, 0))                             # -> HWIO

    def bn(k, c):
        k1, k2, k3, k4 = jax.random.split(k, 4)
        gamma = 1.0 + 0.1 * jax.random.normal(k1, (c,), jnp.float32)
        beta = 0.1 * jax.random.normal(k2, (c,), jnp.float32)
        mean = 0.1 * jax.random.normal(k3, (c,), jnp.float32)
        var = jnp.abs(jax.random.normal(k4, (c,), jnp.float32)) + 0.5
        return _fold_bn(gamma, beta, mean, var)

    p = {
        "stride": stride,
        "w1": conv_w(ks[0], 3, 3, in_channels, out_channels),
        "w2": conv_w(ks[1], 3, 3, out_channels, out_channels),
        "w3": conv_w(ks[2], 3, 3, out_channels, out_channels),
        "bn1": bn(ks[3], out_channels),
        "bn2": bn(ks[4], out_channels),
        "bn3": bn(ks[5], out_channels),
        "has_shortcut": (stride != 1) or (in_channels != out_channels),
    }
    if p["has_shortcut"]:
        p["wsc"] = conv_w(ks[6], 1, 1, in_channels, out_channels)
        p["bnsc"] = bn(ks[7], out_channels)
    return p


def basic_block_forward(p, x_nchw):
    """Matches BasicBlock.forward (BatchNorm in inference mode)."""
    Cout = p["w1"].shape[-1]
    x = jnp.transpose(x_nchw, (0, 2, 3, 1)).astype(COMPUTE_DTYPE)  # NCHW -> NHWC
    Cin = x.shape[-1]
    Cin_pad = _round_up(Cin, LANE)
    x = jnp.pad(x, ((0, 0), (0, 0), (0, 0), (0, Cin_pad - Cin)))   # lane-dense C

    s = p["stride"]
    out = conv_bn(x, p["w1"], *p["bn1"], stride=s, padding=1, relu=True)
    out = conv_bn(out, p["w2"], *p["bn2"], stride=1, padding=1, relu=True)
    if p["has_shortcut"]:
        sc = conv_bn(x, p["wsc"], *p["bnsc"], stride=s, padding=0, relu=False)
    else:
        sc = x                                        # channel-padded identity
    out = conv_bn(out, p["w3"], *p["bn3"], stride=1, padding=1,
                  residual=sc, relu=True)             # bn3 + shortcut + relu fused

    out = out[..., :Cout].astype(jnp.float32)         # drop channel padding
    return jnp.transpose(out, (0, 3, 1, 2))           # NHWC -> NCHW


# ---------------- pure-JAX reference (bf16-matched, for verification) --------

def _ref_conv(x, w, stride, padding):
    return lax.conv_general_dilated(
        x.astype(jnp.bfloat16), w.astype(jnp.bfloat16),
        (stride, stride), [(padding, padding), (padding, padding)],
        dimension_numbers=("NHWC", "HWIO", "NHWC"),
        preferred_element_type=jnp.float32)


def basic_block_ref(p, x_nchw):
    x = jnp.transpose(x_nchw, (0, 2, 3, 1)).astype(jnp.bfloat16)
    s = p["stride"]
    s1, b1 = p["bn1"]; s2, b2 = p["bn2"]; s3, b3 = p["bn3"]
    o1 = jnp.maximum(_ref_conv(x, p["w1"], s, 1) * s1 + b1, 0.0).astype(jnp.bfloat16)
    o2 = jnp.maximum(_ref_conv(o1, p["w2"], 1, 1) * s2 + b2, 0.0).astype(jnp.bfloat16)
    o3 = _ref_conv(o2, p["w3"], 1, 1) * s3 + b3
    if p["has_shortcut"]:
        ssc, bsc = p["bnsc"]
        sc = (_ref_conv(x, p["wsc"], s, 0) * ssc + bsc).astype(jnp.bfloat16)
    else:
        sc = x
    out = jnp.maximum(o3 + sc.astype(jnp.float32), 0.0).astype(jnp.bfloat16)
    return jnp.transpose(out.astype(jnp.float32), (0, 3, 1, 2))


if __name__ == "__main__":
    key = jax.random.PRNGKey(0)
    k_x, k_p = jax.random.split(key)

    N, Cin, H, W = 2, 4, 16, 16
    Cout = 8
    x = jax.random.normal(k_x, (N, Cin, H, W), jnp.float32)   # NCHW like PyTorch

    params = init_basic_block(k_p, Cin, Cout, stride=1)

    y = basic_block_forward(params, x)
    y = jax.block_until_ready(y)

    y_ref = jax.block_until_ready(basic_block_ref(params, x))
    assert y.shape == (N, Cout, H, W)
    # bf16 matmul inputs on both sides -> tolerance sized to a few bf16 ulps.
    assert jnp.allclose(y, y_ref, atol=3e-2, rtol=3e-2), "mismatch vs reference"

    print("KERNEL_OK")
</pallas_src>

<mosaic_0001>
module attributes {stable_mosaic.version = 11 : i64} {
  func.func @_conv_bn_kernel(%arg0: i32, %arg1: i32, %arg2: memref<1x18x18x128xbf16, #tpu.memory_space<vmem>>, %arg3: memref<9x128x128xbf16, #tpu.memory_space<vmem>>, %arg4: memref<1x128xf32, #tpu.memory_space<vmem>>, %arg5: memref<1x128xf32, #tpu.memory_space<vmem>>, %arg6: memref<1x16x16x128xbf16, #tpu.memory_space<vmem>>, %arg7: memref<256x128xf32, #tpu.memory_space<vmem>>) attributes {dimension_semantics = [#tpu.dimension_semantics<parallel>, #tpu.dimension_semantics<parallel>], iteration_bounds = array<i64: 2, 1>, scalar_prefetch = 0 : i64, scratch_operands = 1 : i64, tpu.core_type = #tpu.core_type<tc>, window_params = [{transform_indices = @transform_0, window_bounds = array<i64: 1, 18, 18, 128>}, {transform_indices = @transform_1, window_bounds = array<i64: 9, 128, 128>}, {transform_indices = @transform_2, window_bounds = array<i64: 1, 128>}, {transform_indices = @transform_3, window_bounds = array<i64: 1, 128>}, {transform_indices = @transform_4, window_bounds = array<i64: 1, 16, 16, 128>}]} {
    %cst = arith.constant 0.000000e+00 : f32
    %0 = vector.broadcast %cst : f32 to vector<256x128xf32>
    %c0 = arith.constant 0 : index
    %c0_0 = arith.constant 0 : index
    %1 = vector.load %arg7[%c0, %c0_0] : memref<256x128xf32, #tpu.memory_space<vmem>>, vector<256x128xf32>
    tpu.vector_store %arg7[%c0, %c0_0], %0 {strides = array<i32>} : memref<256x128xf32, #tpu.memory_space<vmem>>, vector<256x128xf32>,
    %c0_1 = arith.constant 0 : index
    %c0_2 = arith.constant 0 : index
    %c0_3 = arith.constant 0 : index
    %c0_4 = arith.constant 0 : index
    %2 = vector.load %arg2[%c0_1, %c0_2, %c0_3, %c0_4] : memref<1x18x18x128xbf16, #tpu.memory_space<vmem>>, vector<1x16x16x128xbf16>
    %3 = vector.shape_cast %2 : vector<1x16x16x128xbf16> to vector<16x16x128xbf16>
    %4 = vector.shape_cast %3 : vector<16x16x128xbf16> to vector<256x128xbf16>
    %c0_5 = arith.constant 0 : index
    %c0_6 = arith.constant 0 : index
    %5 = vector.load %arg7[%c0_5, %c0_6] : memref<256x128xf32, #tpu.memory_space<vmem>>, vector<256x128xf32>
    %c0_7 = arith.constant 0 : index
    %c0_8 = arith.constant 0 : index
    %c0_9 = arith.constant 0 : index
    %6 = vector.load %arg3[%c0_7, %c0_8, %c0_9] : memref<9x128x128xbf16, #tpu.memory_space<vmem>>, vector<1x128x128xbf16>
    %7 = vector.shape_cast %6 : vector<1x128x128xbf16> to vector<128x128xbf16>
    %cst_10 = arith.constant dense<0.000000e+00> : vector<256x128xf32>
    %8 = tpu.matmul %4, %7, %cst_10 {dimension_numbers = #tpu.dot_dimension_numbers<[1], [0], [0], [1], [0, 0, 1, 1], [], []>} : vector<256x128xbf16>, vector<128x128xbf16>, vector<256x128xf32> -> vector<256x128xf32>
    %9 = arith.addf %5, %8 : vector<256x128xf32>
    %c0_11 = arith.constant 0 : index
    %c0_12 = arith.constant 0 : index
    %10 = vector.load %arg7[%c0_11, %c0_12] : memref<256x128xf32, #tpu.memory_space<vmem>>, vector<256x128xf32>
    tpu.vector_store %arg7[%c0_11, %c0_12], %9 {strides = array<i32>} : memref<256x128xf32, #tpu.memory_space<vmem>>, vector<256x128xf32>,
    %c0_13 = arith.constant 0 : index
    %c0_14 = arith.constant 0 : index
    %c1 = arith.constant 1 : index
    %c0_15 = arith.constant 0 : index
    %11 = vector.load %arg2[%c0_13, %c0_14, %c1, %c0_15] : memref<1x18x18x128xbf16, #tpu.memory_space<vmem>>, vector<1x16x16x128xbf16>
    %12 = vector.shape_cast %11 : vector<1x16x16x128xbf16> to vector<16x16x128xbf16>
    %13 = vector.shape_cast %12 : vector<16x16x128xbf16> to vector<256x128xbf16>
    %c0_16 = arith.constant 0 : index
    %c0_17 = arith.constant 0 : index
    %14 = vector.load %arg7[%c0_16, %c0_17] : memref<256x128xf32, #tpu.memory_space<vmem>>, vector<256x128xf32>
    %c1_18 = arith.constant 1 : index
    %c0_19 = arith.constant 0 : index
    %c0_20 = arith.constant 0 : index
    %15 = vector.load %arg3[%c1_18, %c0_19, %c0_20] : memref<9x128x128xbf16, #tpu.memory_space<vmem>>, vector<1x128x128xbf16>
    %16 = vector.shape_cast %15 : vector<1x128x128xbf16> to vector<128x128xbf16>
    %cst_21 = arith.constant dense<0.000000e+00> : vector<256x128xf32>
    %17 = tpu.matmul %13, %16, %cst_21 {dimension_numbers = #tpu.dot_dimension_numbers<[1], [0], [0], [1], [0, 0, 1, 1], [], []>} : vector<256x128xbf16>, vector<128x128xbf16>, vector<256x128xf32> -> vector<256x128xf32>
    %18 = arith.addf %14, %17 : vector<256x128xf32>
    %c0_22 = arith.constant 0 : index
    %c0_23 = arith.constant 0 : index
    %19 = vector.load %arg7[%c0_22, %c0_23] : memref<256x128xf32, #tpu.memory_space<vmem>>, vector<256x128xf32>
    tpu.vector_store %arg7[%c0_22, %c0_23], %18 {strides = array<i32>} : memref<256x128xf32, #tpu.memory_space<vmem>>, vector<256x128xf32>,
    %c0_24 = arith.constant 0 : index
    %c0_25 = arith.constant 0 : index
    %c2 = arith.constant 2 : index
    %c0_26 = arith.constant 0 : index
    %20 = vector.load %arg2[%c0_24, %c0_25, %c2, %c0_26] : memref<1x18x18x128xbf16, #tpu.memory_space<vmem>>, vector<1x16x16x128xbf16>
    %21 = vector.shape_cast %20 : vector<1x16x16x128xbf16> to vector<16x16x128xbf16>
    %22 = vector.shape_cast %21 : vector<16x16x128xbf16> to vector<256x128xbf16>
    %c0_27 = arith.constant 0 : index
    %c0_28 = arith.constant 0 : index
    %23 = vector.load %arg7[%c0_27, %c0_28] : memref<256x128xf32, #tpu.memory_space<vmem>>, vector<256x128xf32>
    %c2_29 = arith.constant 2 : index
    %c0_30 = arith.constant 0 : index
    %c0_31 = arith.constant 0 : index
    %24 = vector.load %arg3[%c2_29, %c0_30, %c0_31] : memref<9x128x128xbf16, #tpu.memory_space<vmem>>, vector<1x128x128xbf16>
    %25 = vector.shape_cast %24 : vector<1x128x128xbf16> to vector<128x128xbf16>
    %cst_32 = arith.constant dense<0.000000e+00> : vector<256x128xf32>
    %26 = tpu.matmul %22, %25, %cst_32 {dimension_numbers = #tpu.dot_dimension_numbers<[1], [0], [0], [1], [0, 0, 1, 1], [], []>} : vector<256x128xbf16>, vector<128x128xbf16>, vector<256x128xf32> -> vector<256x128xf32>
    %27 = arith.addf %23, %26 : vector<256x128xf32>
    %c0_33 = arith.constant 0 : index
    %c0_34 = arith.constant 0 : index
    %28 = vector.load %arg7[%c0_33, %c0_34] : memref<256x128xf32, #tpu.memory_space<vmem>>, vector<256x128xf32>
    tpu.vector_store %arg7[%c0_33, %c0_34], %27 {strides = array<i32>} : memref<256x128xf32, #tpu.memory_space<vmem>>, vector<256x128xf32>,
    %c0_35 = arith.constant 0 : index
    %c1_36 = arith.constant 1 : index
    %c0_37 = arith.constant 0 : index
    %c0_38 = arith.constant 0 : index
    %29 = vector.load %arg2[%c0_35, %c1_36, %c0_37, %c0_38] : memref<1x18x18x128xbf16, #tpu.memory_space<vmem>>, vector<1x16x16x128xbf16>
    %30 = vector.shape_cast %29 : vector<1x16x16x128xbf16> to vector<16x16x128xbf16>
    %31 = vector.shape_cast %30 : vector<16x16x128xbf16> to vector<256x128xbf16>
    %c0_39 = arith.constant 0 : index
    %c0_40 = arith.constant 0 : index
    %32 = vector.load %arg7[%c0_39, %c0_40] : memref<256x128xf32, #tpu.memory_space<vmem>>, vector<256x128xf32>
    %c3 = arith.constant 3 : index
    %c0_41 = arith.constant 0 : index
    %c0_42 = arith.constant 0 : index
    %33 = vector.load %arg3[%c3, %c0_41, %c0_42] : memref<9x128x128xbf16, #tpu.memory_space<vmem>>, vector<1x128x128xbf16>
    %34 = vector.shape_cast %33 : vector<1x128x128xbf16> to vector<128x128xbf16>
    %cst_43 = arith.constant dense<0.000000e+00> : vector<256x128xf32>
    %35 = tpu.matmul %31, %34, %cst_43 {dimension_numbers = #tpu.dot_dimension_numbers<[1], [0], [0], [1], [0, 0, 1, 1], [], []>} : vector<256x128xbf16>, vector<128x128xbf16>, vector<256x128xf32> -> vector<256x128xf32>
    %36 = arith.addf %32, %35 : vector<256x128xf32>
    %c0_44 = arith.constant 0 : index
    %c0_45 = arith.constant 0 : index
    %37 = vector.load %arg7[%c0_44, %c0_45] : memref<256x128xf32, #tpu.memory_space<vmem>>, vector<256x128xf32>
    tpu.vector_store %arg7[%c0_44, %c0_45], %36 {strides = array<i32>} : memref<256x128xf32, #tpu.memory_space<vmem>>, vector<256x128xf32>,
    %c0_46 = arith.constant 0 : index
    %c1_47 = arith.constant 1 : index
    %c1_48 = arith.constant 1 : index
    %c0_49 = arith.constant 0 : index
    %38 = vector.load %arg2[%c0_46, %c1_47, %c1_48, %c0_49] : memref<1x18x18x128xbf16, #tpu.memory_space<vmem>>, vector<1x16x16x128xbf16>
    %39 = vector.shape_cast %38 : vector<1x16x16x128xbf16> to vector<16x16x128xbf16>
    %40 = vector.shape_cast %39 : vector<16x16x128xbf16> to vector<256x128xbf16>
    %c0_50 = arith.constant 0 : index
    %c0_51 = arith.constant 0 : index
    %41 = vector.load %arg7[%c0_50, %c0_51] : memref<256x128xf32, #tpu.memory_space<vmem>>, vector<256x128xf32>
    %c4 = arith.constant 4 : index
    %c0_52 = arith.constant 0 : index
    %c0_53 = arith.constant 0 : index
    %42 = vector.load %arg3[%c4, %c0_52, %c0_53] : memref<9x128x128xbf16, #tpu.memory_space<vmem>>, vector<1x128x128xbf16>
    %43 = vector.shape_cast %42 : vector<1x128x128xbf16> to vector<128x128xbf16>
    %cst_54 = arith.constant dense<0.000000e+00> : vector<256x128xf32>
    %44 = tpu.matmul %40, %43, %cst_54 {dimension_numbers = #tpu.dot_dimension_numbers<[1], [0], [0], [1], [0, 0, 1, 1], [], []>} : vector<256x128xbf16>, vector<128x128xbf16>, vector<256x128xf32> -> vector<256x128xf32>
    %45 = arith.addf %41, %44 : vector<256x128xf32>
    %c0_55 = arith.constant 0 : index
    %c0_56 = arith.constant 0 : index
    %46 = vector.load %arg7[%c0_55, %c0_56] : memref<256x128xf32, #tpu.memory_space<vmem>>, vector<256x128xf32>
    tpu.vector_store %arg7[%c0_55, %c0_56], %45 {strides = array<i32>} : memref<256x128xf32, #tpu.memory_space<vmem>>, vector<256x128xf32>,
    %c0_57 = arith.constant 0 : index
    %c1_58 = arith.constant 1 : index
    %c2_59 = arith.constant 2 : index
    %c0_60 = arith.constant 0 : index
    %47 = vector.load %arg2[%c0_57, %c1_58, %c2_59, %c0_60] : memref<1x18x18x128xbf16, #tpu.memory_space<vmem>>, vector<1x16x16x128xbf16>
    %48 = vector.shape_cast %47 : vector<1x16x16x128xbf16> to vector<16x16x128xbf16>
    %49 = vector.shape_cast %48 : vector<16x16x128xbf16> to vector<256x128xbf16>
    %c0_61 = arith.constant 0 : index
    %c0_62 = arith.constant 0 : index
    %50 = vector.load %arg7[%c0_61, %c0_62] : memref<256x128xf32, #tpu.memory_space<vmem>>, vector<256x128xf32>
    %c5 = arith.constant 5 : index
    %c0_63 = arith.constant 0 : index
    %c0_64 = arith.constant 0 : index
    %51 = vector.load %arg3[%c5, %c0_63, %c0_64] : memref<9x128x128xbf16, #tpu.memory_space<vmem>>, vector<1x128x128xbf16>
    %52 = vector.shape_cast %51 : vector<1x128x128xbf16> to vector<128x128xbf16>
    %cst_65 = arith.constant dense<0.000000e+00> : vector<256x128xf32>
    %53 = tpu.matmul %49, %52, %cst_65 {dimension_numbers = #tpu.dot_dimension_numbers<[1], [0], [0], [1], [0, 0, 1, 1], [], []>} : vector<256x128xbf16>, vector<128x128xbf16>, vector<256x128xf32> -> vector<256x128xf32>
    %54 = arith.addf %50, %53 : vector<256x128xf32>
    %c0_66 = arith.constant 0 : index
    %c0_67 = arith.constant 0 : index
    %55 = vector.load %arg7[%c0_66, %c0_67] : memref<256x128xf32, #tpu.memory_space<vmem>>, vector<256x128xf32>
    tpu.vector_store %arg7[%c0_66, %c0_67], %54 {strides = array<i32>} : memref<256x128xf32, #tpu.memory_space<vmem>>, vector<256x128xf32>,
    %c0_68 = arith.constant 0 : index
    %c2_69 = arith.constant 2 : index
    %c0_70 = arith.constant 0 : index
    %c0_71 = arith.constant 0 : index
    %56 = vector.load %arg2[%c0_68, %c2_69, %c0_70, %c0_71] : memref<1x18x18x128xbf16, #tpu.memory_space<vmem>>, vector<1x16x16x128xbf16>
    %57 = vector.shape_cast %56 : vector<1x16x16x128xbf16> to vector<16x16x128xbf16>
    %58 = vector.shape_cast %57 : vector<16x16x128xbf16> to vector<256x128xbf16>
    %c0_72 = arith.constant 0 : index
    %c0_73 = arith.constant 0 : index
    %59 = vector.load %arg7[%c0_72, %c0_73] : memref<256x128xf32, #tpu.memory_space<vmem>>, vector<256x128xf32>
    %c6 = arith.constant 6 : index
    %c0_74 = arith.constant 0 : index
    %c0_75 = arith.constant 0 : index
    %60 = vector.load %arg3[%c6, %c0_74, %c0_75] : memref<9x128x128xbf16, #tpu.memory_space<vmem>>, vector<1x128x128xbf16>
    %61 = vector.shape_cast %60 : vector<1x128x128xbf16> to vector<128x128xbf16>
    %cst_76 = arith.constant dense<0.000000e+00> : vector<256x128xf32>
    %62 = tpu.matmul %58, %61, %cst_76 {dimension_numbers = #tpu.dot_dimension_numbers<[1], [0], [0], [1], [0, 0, 1, 1], [], []>} : vector<256x128xbf16>, vector<128x128xbf16>, vector<256x128xf32> -> vector<256x128xf32>
    %63 = arith.addf %59, %62 : vector<256x128xf32>
    %c0_77 = arith.constant 0 : index
    %c0_78 = arith.constant 0 : index
    %64 = vector.load %arg7[%c0_77, %c0_78] : memref<256x128xf32, #tpu.memory_space<vmem>>, vector<256x128xf32>
    tpu.vector_store %arg7[%c0_77, %c0_78], %63 {strides = array<i32>} : memref<256x128xf32, #tpu.memory_space<vmem>>, vector<256x128xf32>,
    %c0_79 = arith.constant 0 : index
    %c2_80 = arith.constant 2 : index
    %c1_81 = arith.constant 1 : index
    %c0_82 = arith.constant 0 : index
    %65 = vector.load %arg2[%c0_79, %c2_80, %c1_81, %c0_82] : memref<1x18x18x128xbf16, #tpu.memory_space<vmem>>, vector<1x16x16x128xbf16>
    %66 = vector.shape_cast %65 : vector<1x16x16x128xbf16> to vector<16x16x128xbf16>
    %67 = vector.shape_cast %66 : vector<16x16x128xbf16> to vector<256x128xbf16>
    %c0_83 = arith.constant 0 : index
    %c0_84 = arith.constant 0 : index
    %68 = vector.load %arg7[%c0_83, %c0_84] : memref<256x128xf32, #tpu.memory_space<vmem>>, vector<256x128xf32>
    %c7 = arith.constant 7 : index
    %c0_85 = arith.constant 0 : index
    %c0_86 = arith.constant 0 : index
    %69 = vector.load %arg3[%c7, %c0_85, %c0_86] : memref<9x128x128xbf16, #tpu.memory_space<vmem>>, vector<1x128x128xbf16>
    %70 = vector.shape_cast %69 : vector<1x128x128xbf16> to vector<128x128xbf16>
    %cst_87 = arith.constant dense<0.000000e+00> : vector<256x128xf32>
    %71 = tpu.matmul %67, %70, %cst_87 {dimension_numbers = #tpu.dot_dimension_numbers<[1], [0], [0], [1], [0, 0, 1, 1], [], []>} : vector<256x128xbf16>, vector<128x128xbf16>, vector<256x128xf32> -> vector<256x128xf32>
    %72 = arith.addf %68, %71 : vector<256x128xf32>
    %c0_88 = arith.constant 0 : index
    %c0_89 = arith.constant 0 : index
    %73 = vector.load %arg7[%c0_88, %c0_89] : memref<256x128xf32, #tpu.memory_space<vmem>>, vector<256x128xf32>
    tpu.vector_store %arg7[%c0_88, %c0_89], %72 {strides = array<i32>} : memref<256x128xf32, #tpu.memory_space<vmem>>, vector<256x128xf32>,
    %c0_90 = arith.constant 0 : index
    %c2_91 = arith.constant 2 : index
    %c2_92 = arith.constant 2 : index
    %c0_93 = arith.constant 0 : index
    %74 = vector.load %arg2[%c0_90, %c2_91, %c2_92, %c0_93] : memref<1x18x18x128xbf16, #tpu.memory_space<vmem>>, vector<1x16x16x128xbf16>
    %75 = vector.shape_cast %74 : vector<1x16x16x128xbf16> to vector<16x16x128xbf16>
    %76 = vector.shape_cast %75 : vector<16x16x128xbf16> to vector<256x128xbf16>
    %c0_94 = arith.constant 0 : index
    %c0_95 = arith.constant 0 : index
    %77 = vector.load %arg7[%c0_94, %c0_95] : memref<256x128xf32, #tpu.memory_space<vmem>>, vector<256x128xf32>
    %c8 = arith.constant 8 : index
    %c0_96 = arith.constant 0 : index
    %c0_97 = arith.constant 0 : index
    %78 = vector.load %arg3[%c8, %c0_96, %c0_97] : memref<9x128x128xbf16, #tpu.memory_space<vmem>>, vector<1x128x128xbf16>
    %79 = vector.shape_cast %78 : vector<1x128x128xbf16> to vector<128x128xbf16>
    %cst_98 = arith.constant dense<0.000000e+00> : vector<256x128xf32>
    %80 = tpu.matmul %76, %79, %cst_98 {dimension_numbers = #tpu.dot_dimension_numbers<[1], [0], [0], [1], [0, 0, 1, 1], [], []>} : vector<256x128xbf16>, vector<128x128xbf16>, vector<256x128xf32> -> vector<256x128xf32>
    %81 = arith.addf %77, %80 : vector<256x128xf32>
    %c0_99 = arith.constant 0 : index
    %c0_100 = arith.constant 0 : index
    %82 = vector.load %arg7[%c0_99, %c0_100] : memref<256x128xf32, #tpu.memory_space<vmem>>, vector<256x128xf32>
    tpu.vector_store %arg7[%c0_99, %c0_100], %81 {strides = array<i32>} : memref<256x128xf32, #tpu.memory_space<vmem>>, vector<256x128xf32>,
    %c0_101 = arith.constant 0 : index
    %c0_102 = arith.constant 0 : index
    %83 = vector.load %arg7[%c0_101, %c0_102] : memref<256x128xf32, #tpu.memory_space<vmem>>, vector<256x128xf32>
    %c0_103 = arith.constant 0 : index
    %c0_104 = arith.constant 0 : index
    %84 = vector.load %arg4[%c0_103, %c0_104] : memref<1x128xf32, #tpu.memory_space<vmem>>, vector<1x128xf32>
    %85 = vector.broadcast %84 : vector<1x128xf32> to vector<256x128xf32>
    %86 = arith.mulf %83, %85 : vector<256x128xf32>
    %c0_105 = arith.constant 0 : index
    %c0_106 = arith.constant 0 : index
    %87 = vector.load %arg5[%c0_105, %c0_106] : memref<1x128xf32, #tpu.memory_space<vmem>>, vector<1x128xf32>
    %88 = vector.broadcast %87 : vector<1x128xf32> to vector<256x128xf32>
    %89 = arith.addf %86, %88 : vector<256x128xf32>
    %cst_107 = arith.constant 0.000000e+00 : f32
    %90 = vector.broadcast %cst_107 : f32 to vector<256x128xf32>
    %91 = arith.maximumf %89, %90 : vector<256x128xf32>
    %92 = vector.shape_cast %91 : vector<256x128xf32> to vector<1x16x16x128xf32>
    %93 = arith.truncf %92 : vector<1x16x16x128xf32> to vector<1x16x16x128xbf16>
    %c0_108 = arith.constant 0 : index
    %c0_109 = arith.constant 0 : index
    %c0_110 = arith.constant 0 : index
    %c0_111 = arith.constant 0 : index
    %94 = vector.load %arg6[%c0_108, %c0_109, %c0_110, %c0_111] : memref<1x16x16x128xbf16, #tpu.memory_space<vmem>>, vector<1x16x16x128xbf16>
    tpu.vector_store %arg6[%c0_108, %c0_109, %c0_110, %c0_111], %93 {strides = array<i32>} : memref<1x16x16x128xbf16, #tpu.memory_space<vmem>>, vector<1x16x16x128xbf16>,
    return
  }
  func.func @transform_0(%arg0: i32, %arg1: i32) -> (i32, i32, i32, i32) {
    %c0_i32 = arith.constant 0 : i32
    %c0_i32_0 = arith.constant 0 : i32
    %c0_i32_1 = arith.constant 0 : i32
    %c0_i32_2 = arith.constant 0 : i32
    return %arg0, %c0_i32, %c0_i32_0, %c0_i32_1 : i32, i32, i32, i32
  }
  func.func @transform_1(%arg0: i32, %arg1: i32) -> (i32, i32, i32) {
    %c0_i32 = arith.constant 0 : i32
    %c0_i32_0 = arith.constant 0 : i32
    %c0_i32_1 = arith.constant 0 : i32
    return %c0_i32, %c0_i32_0, %arg1 : i32, i32, i32
  }
  func.func @transform_2(%arg0: i32, %arg1: i32) -> (i32, i32) {
    %c0_i32 = arith.constant 0 : i32
    %c0_i32_0 = arith.constant 0 : i32
    return %c0_i32, %arg1 : i32, i32
  }
  func.func @transform_3(%arg0: i32, %arg1: i32) -> (i32, i32) {
    %c0_i32 = arith.constant 0 : i32
    %c0_i32_0 = arith.constant 0 : i32
    return %c0_i32, %arg1 : i32, i32
  }
  func.func @transform_4(%arg0: i32, %arg1: i32) -> (i32, i32, i32, i32) {
    %c0_i32 = arith.constant 0 : i32
    %c0_i32_0 = arith.constant 0 : i32
    %c0_i32_1 = arith.constant 0 : i32
    return %arg0, %c0_i32, %c0_i32_0, %arg1 : i32, i32, i32, i32
  }
}

</mosaic_0001>

<bundles_post_ra>
// kernel: tpu_custom_call.1
= control target key start
LH: loop header
LB: loop body
LE: loop exit
PB: predicated region body
PF: predicated region fallthrough
CT: control target
= control target key end

     0   :  { %9 = vsyncpa [#allocation4], 0  ;;  %s10019_s0 = inlined_call_operand.vmem [shape: bf16[2,18,18,128], index: 0, kind: input, shape index: {}]   ;;  %s10020_s1 = inlined_call_operand.vmem [shape: bf16[9,128,128], index: 1, kind: input, shape index: {}]   ;;  %s10021_s2 = inlined_call_operand.vmem [shape: f32[1,128], index: 2, kind: input, shape index: {}]   ;;  %s10022_s3 = inlined_call_operand.vmem [shape: f32[1,128], index: 3, kind: input, shape index: {}]   ;;  %s10023_s4 = inlined_call_operand.hbm [shape: bf16[2,16,16,128], index: 4, kind: output, shape index: {}]  }
   0x1   :  { %11 = vsyncpa [#allocation4 + $0x1], 0  ;;  %s8082_s15 = smov 0   ;;  %s8084_s16 = smov 0  }
   0x2   :  { %s8086_s17 = smov 0   ;;  %s8088_s18 = smov 0  }
   0x3   :  { %s8090_s19 = smov 0   ;;  %s8092_s20 = smov 0  }
   0x4 LB: > { %s6309_s21 = sadd.s32 4294967295, %s8052_s20   ;;  %s6310_s22 = sadd.s32 4294967294, %s8052_s20   ;;  %s8052_s20 = sphi %s8092_s20, %s17_s20   ;;  %s8048_s19 = sphi %s8090_s19, %s10109_s19   ;;  %s8044_s18 = sphi %s8088_s18, %s10108_s18   ;;  %s8040_s17 = sphi %s8086_s17, %s10107_s17   ;;  %s8036_s16 = sphi %s8084_s16, %s10106_s16   ;;  %s8032_s15 = sphi %s8082_s15, %s10105_s15  }
   0x5   : > { %s29_s23 = sadd.s32 1, %s8048_s19  ;;  %s142_s24 = sadd.s32 1, %s8040_s17 }
   0x6   : > { %p31_p0 = scmp.ge.s32.totalorder %s29_s23, 2  ;;  %p152_p1 = scmp.ne.s32.totalorder %s8040_s17, %s8036_s16 }
   0x7   : > { %p153_p2 = scmp.eq.s32.totalorder %s6309_s21, 1  ;;  %p158_p3 = scmp.ne.s32.totalorder %s8036_s16, %s8032_s15 }
   0x8   : > { %s10111_s23 = smov (%p31_p0, %s29_s23), 0  ;;  %p159_p5 = scmp.eq.s32.totalorder %s6310_s22, 1 }
   0x9   : > { %p8122_p4 = por %p153_p2, %p152_p1  ;;  %s137_s26 = ssub.s32 %s8048_s19, %s10111_s23 }
   0xa   : > { %p6316_p6 = scmp.ge.s32.totalorder %s8052_s20, 1  ;;  %p140_p7 = scmp.eq.s32.totalorder %s137_s26, 0 }
   0xb   : > { %p8129_p8 = por %p159_p5, %p158_p3  ;;  %p204_p9 = scmp.lt.s32.totalorder %s8052_s20, 3 }
   0xc   : > { %s8135_s28 = scalar_select %p140_p7, %s8040_s17, %s142_s24  }
   0xd   : > { %p205_p10 = pnand %p6316_p6, %p204_p9 }
   0xf   : > { %208 = sbr.rel (%p205_p10) target bundleno = 618 (0x26a), region = 36 }
  0x14   : > { %v7856_v0 = vld [vmem:[%s10020_s1 + $0x38] sm:$0xff]   ;;  %p240_p11 = scmp.lt.s32.totalorder %s8044_s18, 1  ;;  %v7857_v1 = vld [vmem:[%s10020_s1 + $0x30] sm:$0xff]   ;;  %v7858_v2 = vld [vmem:[%s10020_s1 + $0x28] sm:$0xff]   ;;  %vm1654_vm0 = vcmask 1042432   ;;  %vm1655_vm1 = vcmask 1046532  }
  0x15   : > { %7350 = vmatprep.subr.bf16.mxu0 %v7856_v0  ;;  %7782 = vmatprep.subr.bf16.mxu1 %v7856_v0  ;;  %v7859_v3 = vld [vmem:[%s10020_s1 + $0x20] sm:$0xff]   ;;  %v7860_v6 = vld [vmem:[%s10020_s1 + $0x18] sm:$0xff]   ;;  %v7861_v7 = vld [vmem:[%s10020_s1 + $0x10] sm:$0xff]   ;;  %vm785_vm2 = vsmask.f32 3328  ;;  %s237_s30 = sand.u32 1, %s8036_s16  }
  0x16   : > { %s241_s7 = scalar_select %p240_p11, %s8044_s18, 1  ;;  %7351 = vmatpush3.bf16.msra.mxu0 %v7856_v0  ;;  %7790 = vmatpush3.bf16.msra.mxu1 %v7856_v0  ;;  %v7862_v8 = vld [vmem:[%s10020_s1 + $0x8] sm:$0xff]   ;;  %v7863_v9 = vld [vmem:[%s10020_s1] sm:$0xff]   ;;  %v7868_v10 = vld [vmem:[%s10020_s1 + $0x78] sm:$0xff]   ;;  %vm786_vm3 = vsmask.f32 7440 }
  0x17   : > { %7352 = vmatprep.subr.bf16.mxu0 %v7857_v1  ;;  %7783 = vmatprep.subr.bf16.mxu1 %v7857_v1  ;;  %v7869_v12 = vld [vmem:[%s10020_s1 + $0xb8] sm:$0xff]   ;;  %v7870_v14 = vld [vmem:[%s10020_s1 + $0x70] sm:$0xff]   ;;  %v7876_v18 = vld [vmem:[%s10020_s1 + $0x68] sm:$0xff]   ;;  %s6317_s5 = sshll.u32 %s237_s30, 7  ;;  %s9974_s12 = scalar_lea.sflag [#allocation4], %s237_s30 }
  0x18   : > { %s7798_s10 = smul.u32 216, %s241_s7  ;;  %v7871_v15 = vld [vmem:[%s10020_s1 + $0xb0] sm:$0xff]   ;;  %v7877_v20 = vld [vmem:[%s10020_s1 + $0xa8] sm:$0xff]   ;;  %v7878_v22 = vld [vmem:[%s10020_s1 + $0x60] sm:$0xff]   ;;  %s9865_s6 = scalar_lea.vmem [#allocation3], %s6317_s5 }
  0x19   : > { %v7879_v23 = vld [vmem:[%s10020_s1 + $0xa0] sm:$0xff]   ;;  %v8208_v31 = vld [vmem:[%s10020_s1 + $0x58] sm:$0xff]   ;;  %vm8222_vm4 = vmor %vm1654_vm0, %vm1655_vm1  ;;  %s7038_s7 = sshll.u32 %s8044_s18, 11  ;;  %s6198_s8 = sshll.u32 %s9865_s6, 4  ;;  %s9968_s8 = int_to_ptr.vmem [resolvable:$true] %s6198_s8 }
  0x1a   : > { %s8151_s13 = scalar_lea.vmem %s10019_s0, %s7798_s10  ;;  %7353 = vmatpush3.bf16.msra.mxu0 %v7857_v1  ;;  %7791 = vmatpush3.bf16.msra.mxu1 %v7857_v1  ;;  %v8213_v32 = vld [vmem:[%s10020_s1 + $0x98] sm:$0xff]   ;;  %v8232_v54 = vld [vmem:[%s10020_s1 + $0x50] sm:$0xff]   ;;  %vm8241_vm5 = vmor %vm785_vm2, %vm786_vm3  ;;  %s9966_s11 = scalar_lea.hbm %s10023_s4, %s7038_s7 }
  0x1b   : > { %7354 = vmatprep.subr.bf16.mxu0 %v7858_v2  ;;  %7784 = vmatprep.subr.bf16.mxu1 %v7858_v2  ;;  %v7864_v4 = vld [vmem:[%s8151_s13] sm:$0xff]   ;;  %v7866_v11 = vld [vmem:[%s8151_s13 + $0xc] sm:$0xff]   ;;  %v7872_v16 = vld [vmem:[%s8151_s13 + $0x18] sm:$0xff]   ;;  %s7976_s18 = scalar_lea.vmem %s9968_s8, 2048  ;;  %s8054_s14 = smov [#allocation3]  }
  0x1c   : > { %v7865_v5 = vld [vmem:[%s8151_s13 + $0x60] sm:$0xff]   ;;  %7366 = vmatprep.mubr.bf16.mxu0 %v7864_v4  ;;  %v7867_v13 = vld [vmem:[%s8151_s13 + $0x6c] sm:$0xff]   ;;  %v7873_v17 = vld [vmem:[%s8151_s13 + $0x78] sm:$0xff]   ;;  %p7977_p12 = scmp.ne.s32.totalorder %s9968_s8, %s7976_s18  ;;  %s7980_s21 = sshll.u32 %s8054_s14, 4  ;;  %s7981_s21 = int_to_ptr.vmem [resolvable:$false] %s7980_s21 }
  0x1d   : > { %7382 = vmatprep.mubr.bf16.mxu1 %v7865_v5  ;;  %v7874_v19 = vld [vmem:[%s8151_s13 + $0x24] sm:$0xff]   ;;  %v7880_v24 = vld [vmem:[%s8151_s13 + $0x30] sm:$0xff]   ;;  %v737_v26 = vld [vmem:[%s8151_s13] sm:$0xf]  ;;  %s7982_s22 = scalar_lea.vmem %s7981_s21, 4096  ;;  %p7983_p1 = scmp.lt.s32.totalorder %s9968_s8, %s7981_s21 }
  0x1e   : > { %7355 = vmatpush3.bf16.msra.mxu0 %v7858_v2  ;;  %7792 = vmatpush3.bf16.msra.mxu1 %v7858_v2  ;;  %v7875_v21 = vld [vmem:[%s8151_s13 + $0x84] sm:$0xff]   ;;  %v7881_v25 = vld [vmem:[%s8151_s13 + $0x90] sm:$0xff]   ;;  %v789_v29 = vshrl.u32 %v737_v26, 16  ;;  %v792_v30 = vshll.u32 %v737_v26, 16  ;;  %v1558_v36 = vld [vmem:[%s8151_s13] sm:$0xe]  ;;  %p7978_p13 = pnand %p7977_p12, %p8122_p4  ;;  %p7984_p2 = scmp.lt.s32.totalorder %s7982_s22, %s7976_s18 }
  0x1f   : > { %7356 = vmatprep.subr.bf16.mxu0 %v7859_v3  ;;  %7785 = vmatprep.subr.bf16.mxu1 %v7859_v3  ;;  %v738_v27 = vld [vmem:[%s8151_s13 + $0x4] sm:$0xf]  ;;  %v739_v28 = vld [vmem:[%s8151_s13 + $0x8] sm:$0x1]  ;;  %v7882_v41 = vld [vmem:[%s8151_s13 + $0x3c] sm:$0xff]   ;;  %v6383_v47 = vrot.slane %v1558_v36, 9 }
  0x20   : > { %v798_v33 = vshll.u32 %v738_v27, 16  ;;  %v802_v34 = vshrl.u32 %v738_v27, 16  ;;  %v808_v35 = vshll.u32 %v739_v28, 16  ;;  %v791_v37 = vrot.slane %v789_v29, 4  ;;  %v1559_v39 = vld [vmem:[%s8151_s13 + $0x4] sm:$0xf]  ;;  %p7979_p0 = pneg %p7978_p13  ;;  %p7985_p3 = por %p7984_p2, %p7983_p1 }
  0x21   : > { %v794_v38 = vrot.slane %v792_v30, 5  ;;  %v1560_v40 = vld [vmem:[%s8151_s13 + $0x8] sm:$0x1]  ;;  %v7883_v42 = vld [vmem:[%s8151_s13 + $0x9c] sm:$0xff]   ;;  %v740_v48 = vld [vmem:[%s8151_s13 + $0xc] sm:$0xf] }
  0x22   : > { %7357 = vmatpush3.bf16.msra.mxu0 %v7859_v3  ;;  %7793 = vmatpush3.bf16.msra.mxu1 %v7859_v3  ;;  %v800_v43 = vrot.slane %v798_v33, 5  ;;  %v804_v44 = vrot.slane %v802_v34, 4  ;;  %v810_v45 = vrot.slane %v808_v35, 5  ;;  %v1659_v50 = vrot.slane %v1559_v39, 5  ;;  %v741_v52 = vld [vmem:[%s8151_s13 + $0x10] sm:$0xf]  ;;  %p7986_p5 = pnand %p7985_p3, %p7979_p0 }
  0x23   : > { %7358 = vmatprep.subr.bf16.mxu0 %v7860_v6  ;;  %7786 = vmatprep.subr.bf16.mxu1 %v7860_v6  ;;  %v795_v49 = vor.u32 %v794_v38, %v791_v37  ;;  %v1662_v51 = vrot.slane %v1560_v40, 5  ;;  %v742_v53 = vld [vmem:[%s8151_s13 + $0x14] sm:$0x1]  ;;  %v813_v58 = vshrl.u32 %v740_v48, 16  ;;  %v816_v59 = vshll.u32 %v740_v48, 16  ;;  %v7888_v62 = vld [vmem:[%s8151_s13 + $0x48] sm:$0xff]  }
  0x24   : > { %v8237_v55 = vld [vmem:[%s10020_s1 + $0x90] sm:$0xff]   ;;  %v805_v57 = vor.u32 %v804_v44, %v800_v43  ;;  %v822_v60 = vshll.u32 %v741_v52, 16  ;;  %v1561_v61 = vld [vmem:[%s8151_s13 + $0xc] sm:$0xe]  ;;  %v8250_v1 = vsel %vm8222_vm4, %v6383_v47, %v1659_v50  ;;  %v1661_v2 = vrot.slane %v1659_v50, 4  ;;  %v7894_v38 = vld [vmem:[%s10020_s1 + $0x40] sm:$0xff]  }
  0x25   : > { %v7889_v63 = vld [vmem:[%s8151_s13 + $0xa8] sm:$0xff]   ;;  %v796_v0 = vrot.slane %v795_v49, 4  ;;  %v826_v3 = vshrl.u32 %v741_v52, 16  ;;  %v1562_v4 = vld [vmem:[%s8151_s13 + $0x10] sm:$0xf]  ;;  %v7890_v26 = vld [vmem:[%s8151_s13 + $0x54] sm:$0xff]  }
  0x26   : > { %7359 = vmatpush3.bf16.msra.mxu0 %v7860_v6  ;;  %7794 = vmatpush3.bf16.msra.mxu1 %v7860_v6  ;;  %v806_v5 = vrot.slane %v805_v57, 4  ;;  %v815_v6 = vrot.slane %v813_v58, 4  ;;  %v745_v29 = vld [vmem:[%s8151_s13 + $0x20] sm:$0x1]  ;;  %v1564_v37 = vld [vmem:[%s8151_s13 + $0x18] sm:$0xe] }
  0x27   : > { %7360 = vmatprep.subr.bf16.mxu0 %v7861_v7  ;;  %7787 = vmatprep.subr.bf16.mxu1 %v7861_v7  ;;  %v856_v48 = vshll.u32 %v745_v29, 16  ;;  %v1566_v49 = vld [vmem:[%s8151_s13 + $0x20] sm:$0x1]  ;;  %v746_v50 = vld [vmem:[%s8151_s13 + $0x24] sm:$0xf] }
  0x28   : > { %v747_v57 = vld [vmem:[%s8151_s13 + $0x28] sm:$0xf]  ;;  %v748_v58 = vld [vmem:[%s8151_s13 + $0x2c] sm:$0x1]  ;;  %v749_v29 = vld [vmem:[%s8151_s13 + $0x30] sm:$0xf] }
  0x2a   : > { %7361 = vmatpush3.bf16.msra.mxu0 %v7861_v7  ;;  %7795 = vmatpush3.bf16.msra.mxu1 %v7861_v7  ;;  %v818_v7 = vrot.slane %v816_v59, 5  ;;  %v858_v59 = vrot.slane %v856_v48, 5 }
  0x2b   : > { %7362 = vmatprep.subr.bf16.mxu0 %v7862_v8  ;;  %7788 = vmatprep.subr.bf16.mxu1 %v7862_v8 }
  0x2e   : > { %7363 = vmatpush3.bf16.msra.mxu0 %v7862_v8  ;;  %7796 = vmatpush3.bf16.msra.mxu1 %v7862_v8  ;;  %v824_v8 = vrot.slane %v822_v60, 5  ;;  %v6385_v60 = vrot.slane %v1564_v37, 9 }
  0x2f   : > { %7364 = vmatprep.subr.bf16.mxu0 %v7863_v9  ;;  %7789 = vmatprep.subr.bf16.mxu1 %v7863_v9 }
  0x32   : > { %7365 = vmatpush3.bf16.msra.mxu0 %v7863_v9  ;;  %7797 = vmatpush3.bf16.msra.mxu1 %v7863_v9  ;;  %v1563_v9 = vld [vmem:[%s8151_s13 + $0x14] sm:$0x1] }
  0x33   : > { %7398 = vmatprep.subr.bf16.mxu1 %v7868_v10  ;;  %7446 = vmatprep.subr.bf16.mxu0 %v7869_v12  ;;  %v1669_v28 = vrot.slane %v1563_v9, 5  ;;  %v870_v9 = vshll.u32 %v747_v57, 16 }
  0x35   : > { %7367 = vmatmul.mubr.bf16.vlgmr.msra.gmra.mxu0 %v7866_v11  ;;  %7383 = vmatmul.mubr.bf16.vlgmr.msra.gmra.mxu1 %v7867_v13  ;;  %v8260_v11 = vsel %vm8222_vm4, %v1661_v2, %v1662_v51  ;;  %v832_v13 = vshll.u32 %v742_v53, 16  ;;  %v7895_v51 = vld [vmem:[%s10020_s1 + $0x80] sm:$0xff]  }
  0x36   : > { %7399 = vmatpush3.bf16.msra.mxu1 %v7868_v10  ;;  %7447 = vmatpush3.bf16.msra.mxu0 %v7869_v12  ;;  %v801_v10 = vsel %vm8241_vm5, %v796_v0, %v800_v43  ;;  %v828_v12 = vrot.slane %v826_v3, 4  ;;  %v1565_v43 = vld [vmem:[%s8151_s13 + $0x1c] sm:$0xf]  ;;  %v861_v3 = vshrl.u32 %v746_v50, 16 }
  0x37   : > { %7400 = vmatprep.subr.bf16.mxu1 %v7870_v14  ;;  %7448 = vmatprep.subr.bf16.mxu0 %v7871_v15 }
  0x38   : > { %7370 = vmatprep.mubr.bf16.mxu0 %v7872_v16  ;;  %7386 = vmatprep.mubr.bf16.mxu1 %v7873_v17  ;;  %v811_v16 = vsel %vm8241_vm5, %v806_v5, %v810_v45  ;;  %v6415_v17 = vcombine.low %v8250_v1, %v8260_v11  ;;  %v1568_v5 = vld [vmem:[%s8151_s13 + $0x28] sm:$0xf] }
  0x3a   : > { %7401 = vmatpush3.bf16.msra.mxu1 %v7870_v14  ;;  %7449 = vmatpush3.bf16.msra.mxu0 %v7871_v15  ;;  %v8265_v14 = vld [vmem:[%s10020_s1 + $0x48] sm:$0xff]  }
  0x3b   : > { %7402 = vmatprep.subr.bf16.mxu1 %v7876_v18  ;;  %7450 = vmatprep.subr.bf16.mxu0 %v7877_v20  ;;  %v8270_v15 = vld [vmem:[%s10020_s1 + $0x88] sm:$0xff]  }
  0x3d   : > { %7371 = vmatmul.mubr.bf16.gmra.mxu0 %v7874_v19  ;;  %7387 = vmatmul.mubr.bf16.gmra.mxu1 %v7875_v21  ;;  %v6384_v19 = vrot.slane %v1561_v61, 9  ;;  %v829_v21 = vor.u32 %v828_v12, %v824_v8  ;;  %v1673_v61 = vrot.slane %v1565_v43, 5  ;;  %v1569_v12 = vld [vmem:[%s8151_s13 + $0x2c] sm:$0x1] }
  0x3e   : > { %7403 = vmatpush3.bf16.msra.mxu1 %v7876_v18  ;;  %7451 = vmatpush3.bf16.msra.mxu0 %v7877_v20  ;;  %v819_v18 = vor.u32 %v818_v7, %v815_v6  ;;  %v8278_v20 = vcombine.low %v801_v10, %v811_v16  ;;  %v7896_v6 = vld [vmem:[%s10020_s1 + $0xf8] sm:$0xff]   ;;  %v874_v10 = vshrl.u32 %v747_v57, 16  ;;  %v863_v16 = vrot.slane %v861_v3, 4 }
  0x3f   : > { %7404 = vmatprep.subr.bf16.mxu1 %v7878_v22  ;;  %7452 = vmatprep.subr.bf16.mxu0 %v7879_v23  ;;  %v830_v33 = vrot.slane %v829_v21, 4  ;;  %v1674_v7 = vsel %vm8222_vm4, %v6385_v60, %v1673_v61  ;;  %v872_v21 = vrot.slane %v870_v9, 5  ;;  %v753_v60 = vld [vmem:[%s8151_s13 + $0x40] sm:$0xf] }
  0x40   : > { %7374 = vmatprep.mubr.bf16.mxu0 %v7880_v24  ;;  %7390 = vmatprep.mubr.bf16.mxu1 %v7881_v25  ;;  %v743_v24 = vld [vmem:[%s8151_s13 + $0x18] sm:$0xf]  ;;  %v744_v25 = vld [vmem:[%s8151_s13 + $0x1c] sm:$0xf]  ;;  %v820_v27 = vrot.slane %v819_v18, 4 }
  0x41   : > { %v837_v30 = vshrl.u32 %v743_v24, 16  ;;  %v846_v36 = vshll.u32 %v744_v25, 16  ;;  %v1574_v9 = vld [vmem:[%s8151_s13 + $0x40] sm:$0xf] }
  0x42   : > { %7405 = vmatpush3.bf16.msra.mxu1 %v7878_v22  ;;  %7453 = vmatpush3.bf16.msra.mxu0 %v7879_v23  ;;  %v834_v22 = vrot.slane %v832_v13, 5  ;;  %v1666_v23 = vrot.slane %v1562_v4, 5  ;;  %v825_v39 = vsel %vm8241_vm5, %v820_v27, %v824_v8  ;;  %v864_v4 = vshll.u32 %v746_v50, 16  ;;  %v7897_v13 = vld [vmem:[%s10020_s1 + $0x138] sm:$0xff]   ;;  %v7900_v50 = vld [vmem:[%s10020_s1 + $0xe8] sm:$0xff]  }
  0x43   : > { %7406 = vmatprep.subr.bf16.mxu1 %v8208_v31  ;;  %7454 = vmatprep.subr.bf16.mxu0 %v8213_v32  ;;  %v839_v40 = vrot.slane %v837_v30, 4  ;;  %v848_v47 = vrot.slane %v846_v36, 5  ;;  %v1675_v8 = vrot.slane %v1673_v61, 4  ;;  %v750_v30 = vld [vmem:[%s8151_s13 + $0x34] sm:$0xf]  ;;  %v888_v36 = vshll.u32 %v749_v29, 16 }
  0x44   : > { %v8289_v34 = vsel %vm8222_vm4, %v6384_v19, %v1666_v23  ;;  %v1668_v35 = vrot.slane %v1666_v23, 4  ;;  %v835_v44 = vsel %vm8241_vm5, %v830_v33, %v834_v22  ;;  %v866_v18 = vrot.slane %v864_v4, 5  ;;  %v751_v33 = vld [vmem:[%s8151_s13 + $0x38] sm:$0x1]  ;;  %v754_v61 = vld [vmem:[%s8151_s13 + $0x44] sm:$0x1] }
  0x45   : > { %7375 = vmatmul.mubr.bf16.gmra.mxu0 %v7882_v41  ;;  %7391 = vmatmul.mubr.bf16.gmra.mxu1 %v7883_v42  ;;  %v850_v42 = vshrl.u32 %v744_v25, 16  ;;  %v8313_v52 = vcombine.low %v825_v39, %v835_v44  ;;  %v876_v22 = vrot.slane %v874_v10, 4  ;;  %v880_v23 = vshll.u32 %v748_v58, 16  ;;  %v1573_v4 = vld [vmem:[%s8151_s13 + $0x3c] sm:$0xe] }
  0x46   : > { %7407 = vmatpush3.bf16.msra.mxu1 %v8208_v31  ;;  %7455 = vmatpush3.bf16.msra.mxu0 %v8213_v32  ;;  %v840_v31 = vshll.u32 %v743_v24, 16  ;;  %v7891_v32 = vld [vmem:[%s8151_s13 + $0xb4] sm:$0xff]   ;;  %v8304_v45 = vsel %vm8222_vm4, %v1668_v35, %v1669_v28  ;;  %v885_v35 = vshrl.u32 %v749_v29, 16  ;;  %v898_v48 = vshrl.u32 %v750_v30, 16 }
  0x47   : > { %7408 = vmatprep.subr.bf16.mxu1 %v8232_v54  ;;  %7456 = vmatprep.subr.bf16.mxu0 %v8237_v55  ;;  %v6416_v53 = vcombine.low %v8289_v34, %v8304_v45  ;;  %v877_v1 = vor.u32 %v876_v22, %v872_v21  ;;  %v882_v11 = vrot.slane %v880_v23, 5  ;;  %v7898_v28 = vld [vmem:[%s10020_s1 + $0xf0] sm:$0xff]   ;;  %v7902_v22 = vld [vmem:[%s10020_s1 + $0xe0] sm:$0xff]   ;;  %v8400_v29 = vld [vmem:[%s10020_s1 + $0x118] sm:$0xff]  }
  0x48   : > { %7378 = vmatprep.mubr.bf16.mxu0 %v7888_v62  ;;  %7394 = vmatprep.mubr.bf16.mxu1 %v7889_v63  ;;  %v842_v41 = vrot.slane %v840_v31, 5  ;;  %v1676_v62 = vrot.slane %v1566_v49, 5  ;;  %v1567_v63 = vld [vmem:[%s8151_s13 + $0x24] sm:$0xe]  ;;  %v887_v44 = vrot.slane %v885_v35, 4 }
  0x49   : > { %v6386_v27 = vrot.slane %v1567_v63, 9  ;;  %v878_v37 = vrot.slane %v877_v1, 4  ;;  %v1571_v49 = vld [vmem:[%s8151_s13 + $0x34] sm:$0xf]  ;;  %v755_v35 = vld [vmem:[%s8151_s13 + $0x48] sm:$0xf] }
  0x4a   : > { %7409 = vmatpush3.bf16.msra.mxu1 %v8232_v54  ;;  %7457 = vmatpush3.bf16.msra.mxu0 %v8237_v55  ;;  %v843_v54 = vor.u32 %v842_v41, %v839_v40  ;;  %v852_v55 = vrot.slane %v850_v42, 4  ;;  %v1677_v19 = vsel %vm8222_vm4, %v1675_v8, %v1676_v62  ;;  %v7899_v40 = vld [vmem:[%s10020_s1 + $0x130] sm:$0xff]   ;;  %v894_v41 = vshll.u32 %v750_v30, 16  ;;  %v7901_v62 = vld [vmem:[%s10020_s1 + $0x128] sm:$0xff]  }
  0x4b   : > { %7410 = vmatprep.subr.bf16.mxu1 %v8265_v14  ;;  %7458 = vmatprep.subr.bf16.mxu0 %v8270_v15  ;;  %v6417_v25 = vcombine.low %v1674_v7, %v1677_v19  ;;  %v1570_v42 = vld [vmem:[%s8151_s13 + $0x30] sm:$0xe] }
  0x4c   : > { %v844_v0 = vrot.slane %v843_v54, 4  ;;  %v853_v2 = vor.u32 %v852_v55, %v848_v47  ;;  %v896_v45 = vrot.slane %v894_v41, 5  ;;  %v752_v54 = vld [vmem:[%s8151_s13 + $0x3c] sm:$0xf]  ;;  %v936_v41 = vshll.u32 %v755_v35, 16 }
  0x4d   : > { %7379 = vmatmul.mubr.bf16.gmra.mxu0 %v7890_v26  ;;  %7395 = vmatmul.mubr.bf16.gmra.mxu1 %v7891_v32  ;;  %v867_v26 = vor.u32 %v866_v18, %v863_v16  ;;  %v1683_v32 = vrot.slane %v1569_v12, 5  ;;  %v909_v7 = vshrl.u32 %v752_v54, 16  ;;  %v912_v8 = vshll.u32 %v752_v54, 16 }
  0x4e   : > { %7411 = vmatpush3.bf16.msra.mxu1 %v8265_v14  ;;  %7459 = vmatpush3.bf16.msra.mxu0 %v8270_v15  ;;  %v849_v14 = vsel %vm8241_vm5, %v844_v0, %v848_v47  ;;  %v854_v15 = vrot.slane %v853_v2, 4  ;;  %v890_v47 = vrot.slane %v888_v36, 5  ;;  %v6387_v0 = vrot.slane %v1570_v42, 9  ;;  %v756_v36 = vld [vmem:[%s8151_s13 + $0x4c] sm:$0xf] }
  0x4f   : > { %7412 = vmatprep.subr.bf16.mxu1 %v7894_v38  ;;  %7460 = vmatprep.subr.bf16.mxu0 %v7895_v51  ;;  %v868_v31 = vrot.slane %v867_v26, 4  ;;  %v1687_v2 = vrot.slane %v1571_v49, 5  ;;  %v911_v19 = vrot.slane %v909_v7, 4  ;;  %v928_v26 = vshll.u32 %v754_v61, 16 }
  0x50   : > { %7414 = vmatprep.mubr.bf16.mxu1 %v8278_v20  ;;  %7462 = vmatprep.mubr.bf16.mxu0 %v6415_v17  ;;  %v859_v24 = vsel %vm8241_vm5, %v854_v15, %v858_v59  ;;  %v1680_v17 = vrot.slane %v1568_v5, 5  ;;  %v891_v58 = vor.u32 %v890_v47, %v887_v44  ;;  %v900_v59 = vrot.slane %v898_v48, 4  ;;  %v1575_v15 = vld [vmem:[%s8151_s13 + $0x44] sm:$0x1]  ;;  %v1576_v48 = vld [vmem:[%s8151_s13 + $0x48] sm:$0xe] }
  0x51   : > { %v6361_v20 = vcombine.low %v849_v14, %v859_v24  ;;  %v873_v43 = vsel %vm8241_vm5, %v868_v31, %v872_v21  ;;  %v1688_v10 = vsel %vm8222_vm4, %v6387_v0, %v1687_v2  ;;  %v1689_v12 = vrot.slane %v1687_v2, 4  ;;  %v759_v0 = vld [vmem:[%s8151_s13 + $0x58] sm:$0xf]  ;;  %v760_v2 = vld [vmem:[%s8151_s13 + $0x5c] sm:$0x1] }
  0x52   : > { %7413 = vmatpush3.bf16.msra.mxu1 %v7894_v38  ;;  %7461 = vmatpush3.bf16.msra.mxu0 %v7895_v51  ;;  %v1681_v38 = vsel %vm8222_vm4, %v6386_v27, %v1680_v17  ;;  %v1682_v39 = vrot.slane %v1680_v17, 4  ;;  %v883_v51 = vsel %vm8241_vm5, %v878_v37, %v882_v11  ;;  %v892_v5 = vrot.slane %v891_v58, 4  ;;  %v7903_v27 = vld [vmem:[%s10020_s1 + $0x120] sm:$0xff]   ;;  %v1578_v58 = vld [vmem:[%s8151_s13 + $0x50] sm:$0x1] }
  0x53   : > { %7494 = vmatprep.subr.bf16.mxu1 %v7896_v6  ;;  %7542 = vmatprep.subr.bf16.mxu0 %v7897_v13  ;;  %v6362_v55 = vcombine.low %v873_v43, %v883_v51  ;;  %v922_v14 = vshrl.u32 %v753_v60, 16  ;;  %v914_v21 = vrot.slane %v912_v8, 5  ;;  %v6388_v17 = vrot.slane %v1573_v4, 9  ;;  %v1579_v8 = vld [vmem:[%s8151_s13 + $0x54] sm:$0xe] }
  0x54   : > { %v1684_v34 = vsel %vm8222_vm4, %v1682_v39, %v1683_v32  ;;  %v897_v16 = vsel %vm8241_vm5, %v892_v5, %v896_v45  ;;  %v930_v32 = vrot.slane %v928_v26, 5  ;;  %v757_v39 = vld [vmem:[%s8151_s13 + $0x50] sm:$0x1]  ;;  %v942_v47 = vshll.u32 %v756_v36, 16  ;;  %v7908_v26 = vld [vmem:[%s10020_s1 + $0xc8] sm:$0xff]  }
  0x55   : > { %7415 = vmatmul.mubr.bf16.vlgmr.msra.gmra.mxu1 %v8313_v52  ;;  %7463 = vmatmul.mubr.bf16.vlgmr.msra.gmra.mxu0 %v6416_v53  ;;  %v904_v52 = vshll.u32 %v751_v33, 16  ;;  %v1572_v53 = vld [vmem:[%s8151_s13 + $0x38] sm:$0x1]  ;;  %v6418_v57 = vcombine.low %v1681_v38, %v1684_v34  ;;  %v915_v11 = vor.u32 %v914_v21, %v911_v19  ;;  %v1694_v33 = vrot.slane %v1574_v9, 5  ;;  %v1581_v21 = vld [vmem:[%s8151_s13 + $0x5c] sm:$0x1] }
  0x56   : > { %7495 = vmatpush3.bf16.msra.mxu1 %v7896_v6  ;;  %7543 = vmatpush3.bf16.msra.mxu0 %v7897_v13  ;;  %v1690_v3 = vrot.slane %v1572_v53, 5  ;;  %v901_v6 = vor.u32 %v900_v59, %v896_v45  ;;  %v918_v13 = vshll.u32 %v753_v60, 16  ;;  %v1697_v38 = vrot.slane %v1575_v15, 5  ;;  %v1577_v45 = vld [vmem:[%s8151_s13 + $0x4c] sm:$0xf] }
  0x57   : > { %7418 = vmatprep.mubr.bf16.mxu1 %v6361_v20  ;;  %7466 = vmatprep.mubr.bf16.mxu0 %v6417_v25  ;;  %v906_v63 = vrot.slane %v904_v52, 5  ;;  %v924_v25 = vrot.slane %v922_v14, 4  ;;  %v916_v37 = vrot.slane %v915_v11, 4  ;;  %v1695_v43 = vsel %vm8222_vm4, %v6388_v17, %v1694_v33  ;;  %v7906_v52 = vld [vmem:[%s10020_s1 + $0xd0] sm:$0xff]   ;;  %v1580_v14 = vld [vmem:[%s8151_s13 + $0x58] sm:$0xf] }
  0x58   : > { %7496 = vmatprep.subr.bf16.mxu1 %v7898_v28  ;;  %7544 = vmatprep.subr.bf16.mxu0 %v7899_v40  ;;  %v902_v18 = vrot.slane %v901_v6, 4  ;;  %v1691_v23 = vsel %vm8222_vm4, %v1689_v12, %v1690_v3  ;;  %v920_v24 = vrot.slane %v918_v13, 5  ;;  %v1696_v44 = vrot.slane %v1694_v33, 4  ;;  %v758_v59 = vld [vmem:[%s8151_s13 + $0x54] sm:$0xf]  ;;  %v7909_v17 = vld [vmem:[%s10020_s1 + $0x108] sm:$0xff]  }
  0x59   : > { %v6419_v1 = vcombine.low %v1688_v10, %v1691_v23  ;;  %v938_v51 = vrot.slane %v936_v41, 5  ;;  %v946_v34 = vshrl.u32 %v756_v36, 16  ;;  %v7907_v3 = vld [vmem:[%s10020_s1 + $0x110] sm:$0xff]   ;;  %v6389_v5 = vrot.slane %v1576_v48, 9  ;;  %v8454_v33 = vld [vmem:[%s10020_s1 + $0x100] sm:$0xff]  }
  0x5a   : > { %7497 = vmatpush3.bf16.msra.mxu1 %v7898_v28  ;;  %7545 = vmatpush3.bf16.msra.mxu0 %v7899_v40  ;;  %v907_v20 = vsel %vm8241_vm5, %v902_v18, %v906_v63  ;;  %v8395_v28 = vld [vmem:[%s10020_s1 + $0xd8] sm:$0xff]   ;;  %v925_v31 = vor.u32 %v924_v25, %v920_v24  ;;  %v933_v40 = vshrl.u32 %v755_v35, 16  ;;  %v921_v49 = vsel %vm8241_vm5, %v916_v37, %v920_v24 }
  0x5b   : > { %7498 = vmatprep.subr.bf16.mxu1 %v7900_v50  ;;  %7546 = vmatprep.subr.bf16.mxu0 %v7901_v62  ;;  %v6363_v30 = vcombine.low %v897_v16, %v907_v20  ;;  %v1698_v54 = vsel %vm8222_vm4, %v1696_v44, %v1697_v38  ;;  %v948_v63 = vrot.slane %v946_v34, 4  ;;  %v1701_v6 = vrot.slane %v1577_v45, 5  ;;  %v1582_v34 = vld [vmem:[%s8151_s13 + $0x60] sm:$0xe] }
  0x5c   : > { %v926_v42 = vrot.slane %v925_v31, 4  ;;  %v6420_v61 = vcombine.low %v1695_v43, %v1698_v54  ;;  %v1704_v7 = vrot.slane %v1578_v58, 5  ;;  %v957_v12 = vshrl.u32 %v758_v59, 16  ;;  %v763_v43 = vld [vmem:[%s8151_s13 + $0x68] sm:$0x1] }
  0x5d   : > { %7419 = vmatmul.mubr.bf16.gmra.mxu1 %v6362_v55  ;;  %7467 = vmatmul.mubr.bf16.gmra.mxu0 %v6418_v57  ;;  %v944_v55 = vrot.slane %v942_v47, 5  ;;  %v952_v57 = vshll.u32 %v757_v39, 16  ;;  %v960_v13 = vshll.u32 %v758_v59, 16  ;;  %v1702_v15 = vsel %vm8222_vm4, %v6389_v5, %v1701_v6  ;;  %v761_v39 = vld [vmem:[%s8151_s13 + $0x60] sm:$0xf] }
  0x5e   : > { %7499 = vmatpush3.bf16.msra.mxu1 %v7900_v50  ;;  %7547 = vmatpush3.bf16.msra.mxu0 %v7901_v62  ;;  %v935_v50 = vrot.slane %v933_v40, 4  ;;  %v931_v53 = vsel %vm8241_vm5, %v926_v42, %v930_v32  ;;  %v1703_v16 = vrot.slane %v1701_v6, 4  ;;  %v966_v18 = vshll.u32 %v759_v0, 16  ;;  %v8449_v32 = vld [vmem:[%s10020_s1 + $0xc0] sm:$0xff]   ;;  %v765_v5 = vld [vmem:[%s8151_s13 + $0x70] sm:$0xf] }
  0x5f   : > { %7470 = vmatprep.mubr.bf16.mxu0 %v6419_v1  ;;  %7500 = vmatprep.subr.bf16.mxu1 %v7902_v22  ;;  %v6364_v60 = vcombine.low %v921_v49, %v931_v53  ;;  %v954_v4 = vrot.slane %v952_v57, 5  ;;  %v949_v10 = vor.u32 %v948_v63, %v944_v55  ;;  %v970_v19 = vshrl.u32 %v759_v0, 16  ;;  %v762_v40 = vld [vmem:[%s8151_s13 + $0x64] sm:$0xf]  ;;  %v8468_v57 = vld [vmem:[%s10020_s1 + $0x178] sm:$0xff]  }
  0x60   : > { %7422 = vmatprep.mubr.bf16.mxu1 %v6363_v30  ;;  %7548 = vmatprep.subr.bf16.mxu0 %v7903_v27  ;;  %v939_v62 = vor.u32 %v938_v51, %v935_v50  ;;  %v959_v24 = vrot.slane %v957_v12, 4  ;;  %v962_v25 = vrot.slane %v960_v13, 5  ;;  %v968_v20 = vrot.slane %v966_v18, 5  ;;  %v764_v63 = vld [vmem:[%s8151_s13 + $0x6c] sm:$0xf] }
  0x61   : > { %v950_v23 = vrot.slane %v949_v10, 4  ;;  %v972_v1 = vrot.slane %v970_v19, 4  ;;  %v976_v11 = vshll.u32 %v760_v2, 16  ;;  %v6390_v31 = vrot.slane %v1579_v8, 9  ;;  %v766_v6 = vld [vmem:[%s8151_s13 + $0x74] sm:$0x1] }
  0x62   : > { %7501 = vmatpush3.bf16.msra.mxu1 %v7902_v22  ;;  %7549 = vmatpush3.bf16.msra.mxu0 %v7903_v27  ;;  %v940_v9 = vrot.slane %v939_v62, 4  ;;  %v1705_v27 = vsel %vm8222_vm4, %v1703_v16, %v1704_v7  ;;  %v963_v30 = vor.u32 %v962_v25, %v959_v24  ;;  %v1708_v38 = vrot.slane %v1580_v14, 5  ;;  %v1584_v62 = vld [vmem:[%s8151_s13 + $0x68] sm:$0x1]  ;;  %v8483_v7 = vld [vmem:[%s10020_s1 + $0x1b8] sm:$0xff]  }
  0x63   : > { %7502 = vmatprep.subr.bf16.mxu1 %v8395_v28  ;;  %7550 = vmatprep.subr.bf16.mxu0 %v8400_v29  ;;  %v973_v36 = vor.u32 %v972_v1, %v968_v20  ;;  %v978_v37 = vrot.slane %v976_v11, 5  ;;  %v1711_v42 = vrot.slane %v1581_v21, 5  ;;  %v981_v44 = vshrl.u32 %v761_v39, 16  ;;  %v1585_v13 = vld [vmem:[%s8151_s13 + $0x6c] sm:$0xe] }
  0x64   : > { %v945_v22 = vsel %vm8241_vm5, %v940_v9, %v944_v55  ;;  %v964_v41 = vrot.slane %v963_v30, 4  ;;  %v984_v47 = vshll.u32 %v761_v39, 16  ;;  %v1709_v49 = vsel %vm8222_vm4, %v6390_v31, %v1708_v38  ;;  %v1583_v55 = vld [vmem:[%s8151_s13 + $0x64] sm:$0xf]  ;;  %v1586_v19 = vld [vmem:[%s8151_s13 + $0x70] sm:$0xf] }
  0x65   : > { %7423 = vmatmul.mubr.bf16.gmra.mxu1 %v6364_v60  ;;  %7471 = vmatmul.mubr.bf16.gmra.mxu0 %v6420_v61  ;;  %v974_v48 = vrot.slane %v973_v36, 4  ;;  %v1710_v50 = vrot.slane %v1708_v38, 4  ;;  %v990_v51 = vshll.u32 %v762_v40, 16  ;;  %v994_v54 = vshrl.u32 %v762_v40, 16  ;;  %v1587_v25 = vld [vmem:[%s8151_s13 + $0x74] sm:$0x1] }
  0x66   : > { %7503 = vmatpush3.bf16.msra.mxu1 %v8395_v28  ;;  %7551 = vmatpush3.bf16.msra.mxu0 %v8400_v29  ;;  %v955_v28 = vsel %vm8241_vm5, %v950_v23, %v954_v4  ;;  %v6421_v29 = vcombine.low %v1702_v15, %v1705_v27  ;;  %v969_v45 = vsel %vm8241_vm5, %v964_v41, %v968_v20  ;;  %v986_v53 = vrot.slane %v984_v47, 5  ;;  %v767_v39 = vld [vmem:[%s8151_s13 + $0x78] sm:$0xf]  ;;  %v768_v40 = vld [vmem:[%s8151_s13 + $0x7c] sm:$0xf] }
  0x67   : > { %7504 = vmatprep.subr.bf16.mxu1 %v7906_v52  ;;  %7552 = vmatprep.subr.bf16.mxu0 %v7907_v3  ;;  %v6365_v35 = vcombine.low %v945_v22, %v955_v28  ;;  %v979_v58 = vsel %vm8241_vm5, %v974_v48, %v978_v37  ;;  %v1712_v59 = vsel %vm8222_vm4, %v1710_v50, %v1711_v42  ;;  %v992_v60 = vrot.slane %v990_v51, 5 }
  0x68   : > { %7474 = vmatprep.mubr.bf16.mxu0 %v6421_v29  ;;  %v1000_v61 = vshll.u32 %v763_v43, 16  ;;  %v6366_v0 = vcombine.low %v969_v45, %v979_v58  ;;  %v6422_v2 = vcombine.low %v1709_v49, %v1712_v59  ;;  %v996_v4 = vrot.slane %v994_v54, 4  ;;  %v769_v43 = vld [vmem:[%s8151_s13 + $0x80] sm:$0x1] }
  0x69   : > { %7426 = vmatprep.mubr.bf16.mxu1 %v6365_v35  ;;  %v6391_v9 = vrot.slane %v1582_v34, 9  ;;  %v1715_v10 = vrot.slane %v1583_v55, 5  ;;  %v1718_v12 = vrot.slane %v1584_v62, 5  ;;  %v1005_v16 = vshrl.u32 %v764_v63, 16  ;;  %v1588_v34 = vld [vmem:[%s8151_s13 + $0x78] sm:$0xe] }
  0x6a   : > { %7505 = vmatpush3.bf16.msra.mxu1 %v7906_v52  ;;  %7553 = vmatpush3.bf16.msra.mxu0 %v7907_v3  ;;  %v983_v52 = vrot.slane %v981_v44, 4  ;;  %v1002_v8 = vrot.slane %v1000_v61, 5  ;;  %v997_v15 = vor.u32 %v996_v4, %v992_v60  ;;  %v1008_v18 = vshll.u32 %v764_v63, 16  ;;  %v1589_v55 = vld [vmem:[%s8151_s13 + $0x7c] sm:$0xf] }
  0x6b   : > { %7506 = vmatprep.subr.bf16.mxu1 %v7908_v26  ;;  %7554 = vmatprep.subr.bf16.mxu0 %v7909_v17  ;;  %v1716_v21 = vsel %vm8222_vm4, %v6391_v9, %v1715_v10  ;;  %v1717_v22 = vrot.slane %v1715_v10, 4  ;;  %v1014_v23 = vshll.u32 %v765_v5, 16  ;;  %v1018_v24 = vshrl.u32 %v765_v5, 16  ;;  %v1590_v62 = vld [vmem:[%s8151_s13 + $0x80] sm:$0x1] }
  0x6c   : > { %v987_v3 = vor.u32 %v986_v53, %v983_v52  ;;  %v998_v27 = vrot.slane %v997_v15, 4  ;;  %v1007_v20 = vrot.slane %v1005_v16, 4  ;;  %v1010_v1 = vrot.slane %v1008_v18, 5  ;;  %v770_v63 = vld [vmem:[%s8151_s13 + $0x84] sm:$0xf] }
  0x6d   : > { %7427 = vmatmul.mubr.bf16.gmra.mxu1 %v6366_v0  ;;  %7475 = vmatmul.mubr.bf16.gmra.mxu0 %v6422_v2  ;;  %v1719_v11 = vsel %vm8222_vm4, %v1717_v22, %v1718_v12  ;;  %v1020_v28 = vrot.slane %v1018_v24, 4  ;;  %v1024_v29 = vshll.u32 %v766_v6, 16  ;;  %v1722_v38 = vrot.slane %v1586_v19, 5  ;;  %v771_v5 = vld [vmem:[%s8151_s13 + $0x88] sm:$0xf] }
  0x6e   : > { %7507 = vmatpush3.bf16.msra.mxu1 %v7908_v26  ;;  %7555 = vmatpush3.bf16.msra.mxu0 %v7909_v17  ;;  %v988_v14 = vrot.slane %v987_v3, 4  ;;  %v1016_v17 = vrot.slane %v1014_v23, 5  ;;  %v1003_v30 = vsel %vm8241_vm5, %v998_v27, %v1002_v8  ;;  %v6423_v31 = vcombine.low %v1716_v21, %v1719_v11  ;;  %v772_v6 = vld [vmem:[%s8151_s13 + $0x8c] sm:$0x1]  ;;  %v1592_v19 = vld [vmem:[%s8151_s13 + $0x88] sm:$0xf] }
  0x6f   : > { %7508 = vmatprep.subr.bf16.mxu1 %v8449_v32  ;;  %7556 = vmatprep.subr.bf16.mxu0 %v8454_v33  ;;  %v1026_v37 = vrot.slane %v1024_v29, 5  ;;  %v1725_v42 = vrot.slane %v1587_v25, 5  ;;  %v1029_v44 = vshrl.u32 %v767_v39, 16  ;;  %v1032_v47 = vshll.u32 %v767_v39, 16  ;;  %v1593_v25 = vld [vmem:[%s8151_s13 + $0x8c] sm:$0x1] }
  0x70   : > { %v993_v26 = vsel %vm8241_vm5, %v988_v14, %v992_v60  ;;  %v1021_v36 = vor.u32 %v1020_v28, %v1016_v17  ;;  %7478 = vmatprep.mubr.bf16.mxu0 %v6423_v31  ;;  %v1724_v50 = vrot.slane %v1722_v38, 4  ;;  %v1038_v51 = vshll.u32 %v768_v40, 16  ;;  %v773_v39 = vld [vmem:[%s8151_s13 + $0x90] sm:$0xf] }
  0x71   : > { %v6367_v35 = vcombine.low %v993_v26, %v1003_v30  ;;  %v1031_v52 = vrot.slane %v1029_v44, 4  ;;  %v1034_v53 = vrot.slane %v1032_v47, 5  ;;  %v1042_v54 = vshrl.u32 %v768_v40, 16  ;;  %v774_v40 = vld [vmem:[%s8151_s13 + $0x94] sm:$0xf] }
  0x72   : > { %7509 = vmatpush3.bf16.msra.mxu1 %v8449_v32  ;;  %7557 = vmatpush3.bf16.msra.mxu0 %v8454_v33  ;;  %v1011_v32 = vor.u32 %v1010_v1, %v1007_v20  ;;  %v6392_v33 = vrot.slane %v1585_v13, 9  ;;  %v1022_v48 = vrot.slane %v1021_v36, 4  ;;  %v1726_v59 = vsel %vm8222_vm4, %v1724_v50, %v1725_v42  ;;  %v1591_v13 = vld [vmem:[%s8151_s13 + $0x84] sm:$0xe] }
  0x73   : > { %7590 = vmatprep.subr.bf16.mxu1 %v8468_v57  ;;  %7638 = vmatprep.subr.bf16.mxu0 %v8483_v7  ;;  %v1040_v60 = vrot.slane %v1038_v51, 5  ;;  %v1048_v61 = vshll.u32 %v769_v43, 16  ;;  %v1035_v3 = vor.u32 %v1034_v53, %v1031_v52  ;;  %v1044_v4 = vrot.slane %v1042_v54, 4  ;;  %v775_v43 = vld [vmem:[%s8151_s13 + $0x98] sm:$0x1] }
  0x74   : > { %v1012_v41 = vrot.slane %v1011_v32, 4  ;;  %7430 = vmatprep.mubr.bf16.mxu1 %v6367_v35  ;;  %v1723_v49 = vsel %vm8222_vm4, %v6392_v33, %v1722_v38  ;;  %v1027_v58 = vsel %vm8241_vm5, %v1022_v48, %v1026_v37  ;;  %v6393_v9 = vrot.slane %v1588_v34, 9  ;;  %v1594_v34 = vld [vmem:[%s8151_s13 + $0x90] sm:$0xe] }
  0x75   : > { %v6424_v2 = vcombine.low %v1723_v49, %v1726_v59  ;;  %v1050_v8 = vrot.slane %v1048_v61, 5  ;;  %v1729_v10 = vrot.slane %v1589_v55, 5  ;;  %v1732_v12 = vrot.slane %v1590_v62, 5  ;;  %v1595_v55 = vld [vmem:[%s8151_s13 + $0x94] sm:$0xf] }
  0x76   : > { %v1017_v45 = vsel %vm8241_vm5, %v1012_v41, %v1016_v17  ;;  %v1036_v14 = vrot.slane %v1035_v3, 4  ;;  %v1045_v15 = vor.u32 %v1044_v4, %v1040_v60  ;;  %v1053_v16 = vshrl.u32 %v770_v63, 16  ;;  %v1596_v62 = vld [vmem:[%s8151_s13 + $0x98] sm:$0x1] }
  0x77   : > { %v6368_v0 = vcombine.low %v1017_v45, %v1027_v58  ;;  %7479 = vmatmul.mubr.bf16.gmra.mxu0 %v6424_v2  ;;  %v1056_v18 = vshll.u32 %v770_v63, 16  ;;  %v1730_v21 = vsel %vm8222_vm4, %v6393_v9, %v1729_v10  ;;  %v1731_v22 = vrot.slane %v1729_v10, 4  ;;  %v776_v63 = vld [vmem:[%s8151_s13 + $0x9c] sm:$0xf] }
  0x78   : > { %v1062_v23 = vshll.u32 %v771_v5, 16  ;;  %v1066_v24 = vshrl.u32 %v771_v5, 16  ;;  %v1041_v26 = vsel %vm8241_vm5, %v1036_v14, %v1040_v60  ;;  %v1046_v27 = vrot.slane %v1045_v15, 4  ;;  %v777_v5 = vld [vmem:[%s8151_s13 + $0xa0] sm:$0xf] }
  0x79   : > { %7431 = vmatmul.mubr.bf16.gmra.mxu1 %v6368_v0  ;;  %v1055_v20 = vrot.slane %v1053_v16, 4  ;;  %v1058_v1 = vrot.slane %v1056_v18, 5  ;;  %v1733_v11 = vsel %vm8222_vm4, %v1731_v22, %v1732_v12  ;;  %v1072_v29 = vshll.u32 %v772_v6, 16  ;;  %v778_v6 = vld [vmem:[%s8151_s13 + $0xa4] sm:$0x1] }
  0x7a   : > { %v1064_v17 = vrot.slane %v1062_v23, 5  ;;  %v1068_v28 = vrot.slane %v1066_v24, 4  ;;  %v1051_v30 = vsel %vm8241_vm5, %v1046_v27, %v1050_v8  ;;  %v6425_v31 = vcombine.low %v1730_v21, %v1733_v11 }
  0x7b   : > { %v1059_v32 = vor.u32 %v1058_v1, %v1055_v20  ;;  %v6394_v33 = vrot.slane %v1591_v13, 9  ;;  %v6369_v35 = vcombine.low %v1041_v26, %v1051_v30  ;;  %v1074_v37 = vrot.slane %v1072_v29, 5  ;;  %v1597_v13 = vld [vmem:[%s8151_s13 + $0x9c] sm:$0xe] }
  0x7c   : > { %v1069_v36 = vor.u32 %v1068_v28, %v1064_v17  ;;  %v1736_v38 = vrot.slane %v1592_v19, 5  ;;  %7482 = vmatprep.mubr.bf16.mxu0 %v6425_v31  ;;  %v1739_v42 = vrot.slane %v1593_v25, 5  ;;  %v1077_v44 = vshrl.u32 %v773_v39, 16  ;;  %v1598_v19 = vld [vmem:[%s8151_s13 + $0xa0] sm:$0xf] }
  0x7d   : > { %v1060_v41 = vrot.slane %v1059_v32, 4  ;;  %v1080_v47 = vshll.u32 %v773_v39, 16  ;;  %7434 = vmatprep.mubr.bf16.mxu1 %v6369_v35  ;;  %v1086_v51 = vshll.u32 %v774_v40, 16  ;;  %v1090_v54 = vshrl.u32 %v774_v40, 16  ;;  %v1599_v25 = vld [vmem:[%s8151_s13 + $0xa4] sm:$0x1] }
  0x7e   : > { %v1070_v48 = vrot.slane %v1069_v36, 4  ;;  %v1737_v49 = vsel %vm8222_vm4, %v6394_v33, %v1736_v38  ;;  %v1738_v50 = vrot.slane %v1736_v38, 4  ;;  %v1079_v52 = vrot.slane %v1077_v44, 4  ;;  %v779_v39 = vld [vmem:[%s8151_s13 + $0xa8] sm:$0xf] }
  0x7f   : > { %v1065_v45 = vsel %vm8241_vm5, %v1060_v41, %v1064_v17  ;;  %v1082_v53 = vrot.slane %v1080_v47, 5  ;;  %v1088_v60 = vrot.slane %v1086_v51, 5  ;;  %v1096_v61 = vshll.u32 %v775_v43, 16  ;;  %v780_v40 = vld [vmem:[%s8151_s13 + $0xac] sm:$0xf] }
  0x80   : > { %v1075_v58 = vsel %vm8241_vm5, %v1070_v48, %v1074_v37  ;;  %v1740_v59 = vsel %vm8222_vm4, %v1738_v50, %v1739_v42  ;;  %v1092_v4 = vrot.slane %v1090_v54, 4  ;;  %v6395_v9 = vrot.slane %v1594_v34, 9  ;;  %v781_v43 = vld [vmem:[%s8151_s13 + $0xb0] sm:$0x1]  ;;  %v1600_v34 = vld [vmem:[%s8151_s13 + $0xa8] sm:$0xe] }
  0x81   : > { %v6370_v0 = vcombine.low %v1065_v45, %v1075_v58  ;;  %v6426_v2 = vcombine.low %v1737_v49, %v1740_v59  ;;  %v1083_v3 = vor.u32 %v1082_v53, %v1079_v52  ;;  %v1098_v8 = vrot.slane %v1096_v61, 5 }
  0x82   : > { %v1743_v10 = vrot.slane %v1595_v55, 5  ;;  %v1746_v12 = vrot.slane %v1596_v62, 5  ;;  %v1093_v15 = vor.u32 %v1092_v4, %v1088_v60  ;;  %v1101_v16 = vshrl.u32 %v776_v63, 16  ;;  %v1601_v55 = vld [vmem:[%s8151_s13 + $0xac] sm:$0xf] }
  0x83   : > { %7435 = vmatmul.mubr.bf16.gmra.mxu1 %v6370_v0  ;;  %7483 = vmatmul.mubr.bf16.gmra.mxu0 %v6426_v2  ;;  %v1084_v14 = vrot.slane %v1083_v3, 4  ;;  %v1104_v18 = vshll.u32 %v776_v63, 16  ;;  %v1110_v23 = vshll.u32 %v777_v5, 16  ;;  %v1114_v24 = vshrl.u32 %v777_v5, 16  ;;  %v1602_v62 = vld [vmem:[%s8151_s13 + $0xb0] sm:$0x1] }
  0x84   : > { %v1744_v21 = vsel %vm8222_vm4, %v6395_v9, %v1743_v10  ;;  %v1745_v22 = vrot.slane %v1743_v10, 4  ;;  %v1094_v27 = vrot.slane %v1093_v15, 4  ;;  %v1103_v20 = vrot.slane %v1101_v16, 4  ;;  %v782_v63 = vld [vmem:[%s8151_s13 + $0xb4] sm:$0xf] }
  0x85   : > { %v1089_v26 = vsel %vm8241_vm5, %v1084_v14, %v1088_v60  ;;  %v1106_v1 = vrot.slane %v1104_v18, 5  ;;  %v1112_v17 = vrot.slane %v1110_v23, 5  ;;  %v1116_v28 = vrot.slane %v1114_v24, 4  ;;  %v783_v5 = vld [vmem:[%s8151_s13 + $0xb8] sm:$0xf] }
  0x86   : > { %v1747_v11 = vsel %vm8222_vm4, %v1745_v22, %v1746_v12  ;;  %v1120_v29 = vshll.u32 %v778_v6, 16  ;;  %v1099_v30 = vsel %vm8241_vm5, %v1094_v27, %v1098_v8  ;;  %v6396_v33 = vrot.slane %v1597_v13, 9  ;;  %v784_v6 = vld [vmem:[%s8151_s13 + $0xbc] sm:$0x1]  ;;  %v1603_v13 = vld [vmem:[%s8151_s13 + $0xb4] sm:$0xe] }
  0x87   : > { %v6427_v31 = vcombine.low %v1744_v21, %v1747_v11  ;;  %v1107_v32 = vor.u32 %v1106_v1, %v1103_v20  ;;  %v6371_v35 = vcombine.low %v1089_v26, %v1099_v30  ;;  %v1117_v36 = vor.u32 %v1116_v28, %v1112_v17 }
  0x88   : > { %v1122_v37 = vrot.slane %v1120_v29, 5  ;;  %v1750_v38 = vrot.slane %v1598_v19, 5  ;;  %v1753_v42 = vrot.slane %v1599_v25, 5  ;;  %v1125_v44 = vshrl.u32 %v779_v39, 16  ;;  %v1604_v19 = vld [vmem:[%s8151_s13 + $0xb8] sm:$0xf] }
  0x89   : > { %7486 = vmatprep.mubr.bf16.mxu0 %v6427_v31  ;;  %v1108_v41 = vrot.slane %v1107_v32, 4  ;;  %v1128_v47 = vshll.u32 %v779_v39, 16  ;;  %7438 = vmatprep.mubr.bf16.mxu1 %v6371_v35  ;;  %v1118_v48 = vrot.slane %v1117_v36, 4  ;;  %v1134_v51 = vshll.u32 %v780_v40, 16  ;;  %v1605_v25 = vld [vmem:[%s8151_s13 + $0xbc] sm:$0x1] }
  0x8a   : > { %v1751_v49 = vsel %vm8222_vm4, %v6396_v33, %v1750_v38  ;;  %v1752_v50 = vrot.slane %v1750_v38, 4  ;;  %v1127_v52 = vrot.slane %v1125_v44, 4  ;;  %v1138_v54 = vshrl.u32 %v780_v40, 16 }
  0x8b   : > { %v1113_v45 = vsel %vm8241_vm5, %v1108_v41, %v1112_v17  ;;  %v1130_v53 = vrot.slane %v1128_v47, 5  ;;  %v1123_v58 = vsel %vm8241_vm5, %v1118_v48, %v1122_v37  ;;  %v1136_v60 = vrot.slane %v1134_v51, 5  ;;  %v6511_v41 = vld [vmem:[%s8151_s13 + $0xc] sm:$0xf]  ;;  %v6513_v48 = vld [vmem:[%s8151_s13 + $0x14] sm:$0x1] }
  0x8c   : > { %v1754_v59 = vsel %vm8222_vm4, %v1752_v50, %v1753_v42  ;;  %v1144_v61 = vshll.u32 %v781_v43, 16  ;;  %v6372_v0 = vcombine.low %v1113_v45, %v1123_v58  ;;  %v1140_v4 = vrot.slane %v1138_v54, 4  ;;  %v6512_v42 = vld [vmem:[%s8151_s13 + $0x10] sm:$0xf] }
  0x8d   : > { %v6428_v2 = vcombine.low %v1751_v49, %v1754_v59  ;;  %v1131_v3 = vor.u32 %v1130_v53, %v1127_v52  ;;  %v6397_v9 = vrot.slane %v1600_v34, 9  ;;  %v1757_v10 = vrot.slane %v1601_v55, 5  ;;  %v7912_v51 = vld [vmem:[%s8151_s13 + $0xc] sm:$0xff]   ;;  %v6514_v59 = vld [vmem:[%s8151_s13 + $0x18] sm:$0xf] }
  0x8e   : > { %v1146_v8 = vrot.slane %v1144_v61, 5  ;;  %v1760_v12 = vrot.slane %v1602_v62, 5  ;;  %7439 = vmatmul.mubr.bf16.gmra.mxu1 %v6372_v0  ;;  %v1141_v15 = vor.u32 %v1140_v4, %v1136_v60  ;;  %v1149_v16 = vshrl.u32 %v782_v63, 16  ;;  %v6515_v0 = vld [vmem:[%s8151_s13 + $0x1c] sm:$0xf] }
  0x8f   : > { %7487 = vmatmul.mubr.bf16.gmra.mxu0 %v6428_v2  ;;  %v1132_v14 = vrot.slane %v1131_v3, 4  ;;  %v1152_v18 = vshll.u32 %v782_v63, 16  ;;  %v1758_v21 = vsel %vm8222_vm4, %v6397_v9, %v1757_v10  ;;  %v1759_v22 = vrot.slane %v1757_v10, 4  ;;  %v6516_v2 = vld [vmem:[%s8151_s13 + $0x20] sm:$0x1] }
  0x90   : > { %v1158_v23 = vshll.u32 %v783_v5, 16  ;;  %v1162_v24 = vshrl.u32 %v783_v5, 16  ;;  %v1142_v27 = vrot.slane %v1141_v15, 4  ;;  %v1151_v20 = vrot.slane %v1149_v16, 4 }
  0x91   : > { %v1137_v26 = vsel %vm8241_vm5, %v1132_v14, %v1136_v60  ;;  %v1154_v1 = vrot.slane %v1152_v18, 5  ;;  %v1761_v11 = vsel %vm8222_vm4, %v1759_v22, %v1760_v12  ;;  %v1168_v29 = vshll.u32 %v784_v6, 16  ;;  %v7913_v18 = vld [vmem:[%s8151_s13 + $0x18] sm:$0xff]  }
  0x92   : > { %v1160_v17 = vrot.slane %v1158_v23, 5  ;;  %v1164_v28 = vrot.slane %v1162_v24, 4  ;;  %v1147_v30 = vsel %vm8241_vm5, %v1142_v27, %v1146_v8  ;;  %v6429_v31 = vcombine.low %v1758_v21, %v1761_v11 }
  0x93   : > { %v1155_v32 = vor.u32 %v1154_v1, %v1151_v20  ;;  %v6398_v33 = vrot.slane %v1603_v13, 9  ;;  %v6373_v35 = vcombine.low %v1137_v26, %v1147_v30  ;;  %v1170_v37 = vrot.slane %v1168_v29, 5  ;;  %v6518_v20 = vld [vmem:[%s8151_s13 + $0x28] sm:$0xf]  ;;  %v6519_v1 = vld [vmem:[%s8151_s13 + $0x2c] sm:$0x1] }
  0x94   : > { %v1165_v36 = vor.u32 %v1164_v28, %v1160_v17  ;;  %v1764_v38 = vrot.slane %v1604_v19, 5  ;;  %7490 = vmatprep.mubr.bf16.mxu0 %v6429_v31  ;;  %v1767_v40 = vrot.slane %v1605_v25, 5  ;;  %v2655_v49 = vshrl.u32 %v6511_v41, 16  ;;  %v6517_v25 = vld [vmem:[%s8151_s13 + $0x24] sm:$0xf] }
  0x95   : > { %v1156_v39 = vrot.slane %v1155_v32, 4  ;;  %7442 = vmatprep.mubr.bf16.mxu1 %v6373_v35  ;;  %v2658_v34 = vshll.u32 %v6511_v41, 16  ;;  %v2664_v45 = vshll.u32 %v6512_v42, 16  ;;  %v2668_v52 = vshrl.u32 %v6512_v42, 16  ;;  %v7916_v30 = vld [vmem:[%s8151_s13 + $0x24] sm:$0xff]  }
  0x96   : > { %v1166_v43 = vrot.slane %v1165_v36, 4  ;;  %v1765_v44 = vsel %vm8222_vm4, %v6398_v33, %v1764_v38  ;;  %v1766_v47 = vrot.slane %v1764_v38, 4  ;;  %v2657_v55 = vrot.slane %v2655_v49, 4  ;;  %v7918_v38 = vld [vmem:[%s10020_s1 + $0x170] sm:$0xff]  }
  0x97   : > { %v1161_v50 = vsel %vm8241_vm5, %v1156_v39, %v1160_v17  ;;  %v2674_v58 = vshll.u32 %v6513_v48, 16  ;;  %v2660_v62 = vrot.slane %v2658_v34, 5  ;;  %v2666_v63 = vrot.slane %v2664_v45, 5  ;;  %v6521_v49 = vld [vmem:[%s8151_s13 + $0x34] sm:$0xf]  ;;  %v7922_v45 = vld [vmem:[%s10020_s1 + $0x168] sm:$0xff]  }
  0x98   : > { %v1171_v53 = vsel %vm8241_vm5, %v1166_v43, %v1170_v37  ;;  %v1768_v54 = vsel %vm8222_vm4, %v1766_v47, %v1767_v40  ;;  %v2670_v3 = vrot.slane %v2668_v52, 4  ;;  %v2679_v5 = vshrl.u32 %v6514_v59, 16  ;;  %v6520_v43 = vld [vmem:[%s8151_s13 + $0x30] sm:$0xf] }
  0x99   : > { %v6374_v60 = vcombine.low %v1161_v50, %v1171_v53  ;;  %v6430_v61 = vcombine.low %v1765_v44, %v1768_v54  ;;  %v2676_v4 = vrot.slane %v2674_v58, 5  ;;  %v2682_v6 = vshll.u32 %v6514_v59, 16  ;;  %v7919_v44 = vld [vmem:[%s10020_s1 + $0x1b0] sm:$0xff]   ;;  %v6522_v50 = vld [vmem:[%s8151_s13 + $0x38] sm:$0x1] }
  0x9a   : > { %v2661_v8 = vor.u32 %v2660_v62, %v2657_v55  ;;  %v2688_v9 = vshll.u32 %v6515_v0, 16  ;;  %v2692_v10 = vshrl.u32 %v6515_v0, 16  ;;  %v2698_v12 = vshll.u32 %v6516_v2, 16  ;;  %v7917_v59 = vld [vmem:[%s8151_s13 + $0x30] sm:$0xff]  }
  0x9b   : > { %7443 = vmatmul.mubr.bf16.gmra.mxu1 %v6374_v60  ;;  %7491 = vmatmul.mubr.bf16.gmra.mxu0 %v6430_v61  ;;  %v2671_v13 = vor.u32 %v2670_v3, %v2666_v63  ;;  %v2681_v14 = vrot.slane %v2679_v5, 4  ;;  %v2684_v15 = vrot.slane %v2682_v6, 5  ;;  %v2703_v11 = vshrl.u32 %v6517_v25, 16  ;;  %v7920_v3 = vld [vmem:[%s8151_s13 + $0x3c] sm:$0xff]   ;;  %v7923_v6 = vld [vmem:[%s10020_s1 + $0x1a8] sm:$0xff]  }
  0x9c   : > { %7510 = vmatprep.mubr.bf16.mxu1 %v7912_v51  ;;  %v2662_v16 = vrot.slane %v2661_v8, 4  ;;  %v2690_v19 = vrot.slane %v2688_v9, 5  ;;  %v2694_v21 = vrot.slane %v2692_v10, 4  ;;  %v2700_v24 = vrot.slane %v2698_v12, 5  ;;  %v6523_v10 = vld [vmem:[%s8151_s13 + $0x3c] sm:$0xf] }
  0x9d   : > { %v2672_v22 = vrot.slane %v2671_v13, 4  ;;  %v2685_v23 = vor.u32 %v2684_v15, %v2681_v14  ;;  %v2706_v17 = vshll.u32 %v6517_v25, 16  ;;  %v2712_v31 = vshll.u32 %v6518_v20, 16  ;;  %v6524_v12 = vld [vmem:[%s8151_s13 + $0x40] sm:$0xf] }
  0x9e   : > { %v2667_v26 = vsel %vm8241_vm5, %v2662_v16, %v2666_v63  ;;  %v2695_v27 = vor.u32 %v2694_v21, %v2690_v19  ;;  %v2716_v32 = vshrl.u32 %v6518_v20, 16  ;;  %v2705_v36 = vrot.slane %v2703_v11, 4  ;;  %v6525_v16 = vld [vmem:[%s8151_s13 + $0x44] sm:$0x1]  ;;  %v6527_v20 = vld [vmem:[%s8151_s13 + $0x4c] sm:$0xf] }
  0x9f   : > { %v2677_v28 = vsel %vm8241_vm5, %v2672_v22, %v2676_v4  ;;  %v2686_v29 = vrot.slane %v2685_v23, 4  ;;  %v2708_v37 = vrot.slane %v2706_v17, 5  ;;  %v2714_v40 = vrot.slane %v2712_v31, 5  ;;  %v7921_v31 = vld [vmem:[%s8151_s13 + $0x48] sm:$0xff]  }
  0xa0   : > { %v6575_v33 = vcombine.low %v2667_v26, %v2677_v28  ;;  %v2696_v35 = vrot.slane %v2695_v27, 4  ;;  %v2718_v41 = vrot.slane %v2716_v32, 4  ;;  %v2722_v42 = vshll.u32 %v6519_v1, 16  ;;  %v6526_v27 = vld [vmem:[%s8151_s13 + $0x48] sm:$0xf] }
  0xa1   : > { %v2691_v39 = vsel %vm8241_vm5, %v2686_v29, %v2690_v19  ;;  %v2709_v48 = vor.u32 %v2708_v37, %v2705_v36  ;;  %v2727_v51 = vshrl.u32 %v6520_v43, 16  ;;  %v2730_v34 = vshll.u32 %v6520_v43, 16  ;;  %v6528_v29 = vld [vmem:[%s8151_s13 + $0x50] sm:$0x1]  ;;  %v7927_v36 = vld [vmem:[%s10020_s1 + $0x1a0] sm:$0xff]  }
  0xa2   : > { %7558 = vmatprep.mubr.bf16.mxu0 %v6575_v33  ;;  %v2701_v47 = vsel %vm8241_vm5, %v2696_v35, %v2700_v24  ;;  %v2719_v53 = vor.u32 %v2718_v41, %v2714_v40  ;;  %v2724_v54 = vrot.slane %v2722_v42, 5  ;;  %v2736_v55 = vshll.u32 %v6521_v49, 16  ;;  %v7930_v41 = vld [vmem:[%s10020_s1 + $0x158] sm:$0xff]  }
  0xa3   : > { %7511 = vmatmul.mubr.bf16.vlgmr.msra.gmra.mxu1 %v7913_v18  ;;  %v6576_v52 = vcombine.low %v2691_v39, %v2701_v47  ;;  %v2710_v58 = vrot.slane %v2709_v48, 4  ;;  %v2729_v60 = vrot.slane %v2727_v51, 4  ;;  %v2732_v61 = vrot.slane %v2730_v34, 5  ;;  %v7924_v51 = vld [vmem:[%s8151_s13 + $0x54] sm:$0xff]  }
  0xa4   : > { %7591 = vmatpush3.bf16.msra.mxu1 %v8468_v57  ;;  %7514 = vmatprep.mubr.bf16.mxu1 %v7916_v30  ;;  %v2740_v62 = vshrl.u32 %v6521_v49, 16  ;;  %v2720_v63 = vrot.slane %v2719_v53, 4  ;;  %v2738_v0 = vrot.slane %v2736_v55, 5  ;;  %v2746_v2 = vshll.u32 %v6522_v50, 16 }
  0xa5   : > { %7592 = vmatprep.subr.bf16.mxu1 %v7918_v38  ;;  %7559 = vmatmul.mubr.bf16.vlgmr.msra.gmra.mxu0 %v6576_v52  ;;  %v2715_v57 = vsel %vm8241_vm5, %v2710_v58, %v2714_v40  ;;  %v2733_v4 = vor.u32 %v2732_v61, %v2729_v60  ;;  %v2751_v18 = vshrl.u32 %v6523_v10, 16  ;;  %v2754_v19 = vshll.u32 %v6523_v10, 16  ;;  %v6529_v52 = vld [vmem:[%s8151_s13 + $0x54] sm:$0xf]  ;;  %v6530_v58 = vld [vmem:[%s8151_s13 + $0x58] sm:$0xf] }
  0xa6   : > { %7639 = vmatpush3.bf16.msra.mxu0 %v8483_v7  ;;  %v2742_v5 = vrot.slane %v2740_v62, 4  ;;  %v2725_v8 = vsel %vm8241_vm5, %v2720_v63, %v2724_v54  ;;  %v2748_v9 = vrot.slane %v2746_v2, 5  ;;  %v7926_v7 = vld [vmem:[%s10020_s1 + $0x160] sm:$0xff]   ;;  %v2760_v21 = vshll.u32 %v6524_v12, 16  ;;  %v7931_v61 = vld [vmem:[%s10020_s1 + $0x198] sm:$0xff]  }
  0xa7   : > { %7640 = vmatprep.subr.bf16.mxu0 %v7919_v44  ;;  %v6577_v13 = vcombine.low %v2715_v57, %v2725_v8  ;;  %v2734_v14 = vrot.slane %v2733_v4, 4  ;;  %v2764_v22 = vshrl.u32 %v6524_v12, 16  ;;  %v2770_v23 = vshll.u32 %v6525_v16, 16  ;;  %v7925_v12 = vld [vmem:[%s8151_s13 + $0x60] sm:$0xff]  }
  0xa8   : > { %7593 = vmatpush3.bf16.msra.mxu1 %v7918_v38  ;;  %v2743_v15 = vor.u32 %v2742_v5, %v2738_v0  ;;  %v2753_v26 = vrot.slane %v2751_v18, 4  ;;  %v2756_v1 = vrot.slane %v2754_v19, 5  ;;  %v2762_v11 = vrot.slane %v2760_v21, 5  ;;  %v6534_v18 = vld [vmem:[%s8151_s13 + $0x68] sm:$0x1]  ;;  %v7928_v21 = vld [vmem:[%s8151_s13 + $0x6c] sm:$0xff]  }
  0xa9   : > { %7594 = vmatprep.subr.bf16.mxu1 %v7922_v45  ;;  %7562 = vmatprep.mubr.bf16.mxu0 %v6577_v13  ;;  %v2739_v24 = vsel %vm8241_vm5, %v2734_v14, %v2738_v0  ;;  %v2766_v17 = vrot.slane %v2764_v22, 4  ;;  %v2772_v28 = vrot.slane %v2770_v23, 5  ;;  %v2775_v32 = vshrl.u32 %v6526_v27, 16  ;;  %v6533_v13 = vld [vmem:[%s8151_s13 + $0x64] sm:$0xf]  ;;  %v7935_v22 = vld [vmem:[%s10020_s1 + $0x190] sm:$0xff]  }
  0xaa   : > { %v2744_v25 = vrot.slane %v2743_v15, 4  ;;  %7641 = vmatpush3.bf16.msra.mxu0 %v7919_v44  ;;  %v2778_v33 = vshll.u32 %v6526_v27, 16  ;;  %v2784_v35 = vshll.u32 %v6527_v20, 16  ;;  %v2757_v38 = vor.u32 %v2756_v1, %v2753_v26 }
  0xab   : > { %7515 = vmatmul.mubr.bf16.gmra.mxu1 %v7917_v59  ;;  %7642 = vmatprep.subr.bf16.mxu0 %v7923_v6  ;;  %v2767_v39 = vor.u32 %v2766_v17, %v2762_v11  ;;  %v2788_v40 = vshrl.u32 %v6527_v20, 16  ;;  %v2777_v42 = vrot.slane %v2775_v32, 4  ;;  %v2794_v47 = vshll.u32 %v6528_v29, 16  ;;  %v6531_v59 = vld [vmem:[%s8151_s13 + $0x5c] sm:$0x1]  ;;  %v7938_v17 = vld [vmem:[%s10020_s1 + $0x148] sm:$0xff]  }
  0xac   : > { %7518 = vmatprep.mubr.bf16.mxu1 %v7920_v3  ;;  %v2749_v30 = vsel %vm8241_vm5, %v2744_v25, %v2748_v9  ;;  %7595 = vmatpush3.bf16.msra.mxu1 %v7922_v45  ;;  %v2780_v43 = vrot.slane %v2778_v33, 5  ;;  %v2786_v44 = vrot.slane %v2784_v35, 5  ;;  %v2758_v48 = vrot.slane %v2757_v38, 4  ;;  %v7934_v3 = vld [vmem:[%s10020_s1 + $0x150] sm:$0xff]  }
  0xad   : > { %v6578_v37 = vcombine.low %v2739_v24, %v2749_v30  ;;  %7596 = vmatprep.subr.bf16.mxu1 %v7926_v7  ;;  %v2768_v49 = vrot.slane %v2767_v39, 4  ;;  %v2790_v50 = vrot.slane %v2788_v40, 4  ;;  %v2796_v45 = vrot.slane %v2794_v47, 5  ;;  %v6535_v39 = vld [vmem:[%s8151_s13 + $0x6c] sm:$0xf] }
  0xae   : > { %v2781_v34 = vor.u32 %v2780_v43, %v2777_v42  ;;  %7643 = vmatpush3.bf16.msra.mxu0 %v7923_v6  ;;  %v2763_v53 = vsel %vm8241_vm5, %v2758_v48, %v2762_v11  ;;  %v2799_v60 = vshrl.u32 %v6529_v52, 16  ;;  %v2802_v0 = vshll.u32 %v6529_v52, 16  ;;  %v6536_v40 = vld [vmem:[%s8151_s13 + $0x70] sm:$0xf]  ;;  %v6537_v43 = vld [vmem:[%s8151_s13 + $0x74] sm:$0x1] }
  0xaf   : > { %7563 = vmatmul.mubr.bf16.gmra.mxu0 %v6578_v37  ;;  %v2773_v54 = vsel %vm8241_vm5, %v2768_v49, %v2772_v28  ;;  %v2791_v55 = vor.u32 %v2790_v50, %v2786_v44  ;;  %7644 = vmatprep.subr.bf16.mxu0 %v7927_v36  ;;  %v2808_v2 = vshll.u32 %v6530_v58, 16  ;;  %v2812_v5 = vshrl.u32 %v6530_v58, 16  ;;  %v7932_v58 = vld [vmem:[%s8151_s13 + $0x84] sm:$0xff]  }
  0xb0   : > { %7597 = vmatpush3.bf16.msra.mxu1 %v7926_v7  ;;  %v6579_v62 = vcombine.low %v2763_v53, %v2773_v54  ;;  %v2782_v63 = vrot.slane %v2781_v34, 4  ;;  %v2801_v4 = vrot.slane %v2799_v60, 4  ;;  %v2818_v6 = vshll.u32 %v6531_v59, 16  ;;  %v6532_v7 = vld [vmem:[%s8151_s13 + $0x60] sm:$0xf]  ;;  %v7929_v34 = vld [vmem:[%s8151_s13 + $0x78] sm:$0xff]  }
  0xb1   : > { %7598 = vmatprep.subr.bf16.mxu1 %v7930_v41  ;;  %v2792_v57 = vrot.slane %v2791_v55, 4  ;;  %v2804_v9 = vrot.slane %v2802_v0, 5  ;;  %v2810_v10 = vrot.slane %v2808_v2, 5  ;;  %v2814_v15 = vrot.slane %v2812_v5, 4  ;;  %v6538_v55 = vld [vmem:[%s8151_s13 + $0x78] sm:$0xf] }
  0xb2   : > { %7566 = vmatprep.mubr.bf16.mxu0 %v6579_v62  ;;  %v2787_v8 = vsel %vm8241_vm5, %v2782_v63, %v2786_v44  ;;  %7645 = vmatpush3.bf16.msra.mxu0 %v7927_v36  ;;  %v2820_v16 = vrot.slane %v2818_v6, 5  ;;  %v2823_v19 = vshrl.u32 %v6532_v7, 16  ;;  %v2826_v25 = vshll.u32 %v6532_v7, 16  ;;  %v7942_v36 = vld [vmem:[%s10020_s1 + $0x140] sm:$0xff]   ;;  %v6539_v63 = vld [vmem:[%s8151_s13 + $0x7c] sm:$0xf] }
  0xb3   : > { %7519 = vmatmul.mubr.bf16.gmra.mxu1 %v7921_v31  ;;  %v2797_v14 = vsel %vm8241_vm5, %v2792_v57, %v2796_v45  ;;  %7646 = vmatprep.subr.bf16.mxu0 %v7931_v61  ;;  %v2805_v24 = vor.u32 %v2804_v9, %v2801_v4  ;;  %v2832_v26 = vshll.u32 %v6533_v13, 16  ;;  %v2815_v27 = vor.u32 %v2814_v15, %v2810_v10  ;;  %v7939_v31 = vld [vmem:[%s10020_s1 + $0x188] sm:$0xff]   ;;  %v7943_v59 = vld [vmem:[%s10020_s1 + $0x180] sm:$0xff]   ;;  %v8710_v2 = vld [vmem:[%s10020_s1 + $0x1f8] sm:$0xff]  }
  0xb4   : > { %7522 = vmatprep.mubr.bf16.mxu1 %v7924_v51  ;;  %7599 = vmatpush3.bf16.msra.mxu1 %v7930_v41  ;;  %v6580_v23 = vcombine.low %v2787_v8, %v2797_v14  ;;  %v2825_v20 = vrot.slane %v2823_v19, 4  ;;  %v2836_v1 = vshrl.u32 %v6533_v13, 16  ;;  %v2842_v11 = vshll.u32 %v6534_v18, 16  ;;  %v6540_v0 = vld [vmem:[%s8151_s13 + $0x80] sm:$0x1]  ;;  %v8717_v19 = vld [vmem:[%s10020_s1 + $0x238] sm:$0xff]  }
  0xb5   : > { %7600 = vmatprep.subr.bf16.mxu1 %v7934_v3  ;;  %v2806_v28 = vrot.slane %v2805_v24, 4  ;;  %v2828_v29 = vrot.slane %v2826_v25, 5  ;;  %v2834_v30 = vrot.slane %v2832_v26, 5  ;;  %v2816_v32 = vrot.slane %v2815_v27, 4  ;;  %v6541_v24 = vld [vmem:[%s8151_s13 + $0x84] sm:$0xf] }
  0xb6   : > { %v2838_v33 = vrot.slane %v2836_v1, 4  ;;  %v2844_v35 = vrot.slane %v2842_v11, 5  ;;  %7647 = vmatpush3.bf16.msra.mxu0 %v7931_v61  ;;  %v2847_v44 = vshrl.u32 %v6535_v39, 16  ;;  %v2850_v47 = vshll.u32 %v6535_v39, 16  ;;  %v6542_v25 = vld [vmem:[%s8151_s13 + $0x88] sm:$0xf] }
  0xb7   : > { %7567 = vmatmul.mubr.bf16.gmra.mxu0 %v6580_v23  ;;  %v2811_v37 = vsel %vm8241_vm5, %v2806_v28, %v2810_v10  ;;  %v2829_v38 = vor.u32 %v2828_v29, %v2825_v20  ;;  %7648 = vmatprep.subr.bf16.mxu0 %v7935_v22  ;;  %v2821_v41 = vsel %vm8241_vm5, %v2816_v32, %v2820_v16  ;;  %v2856_v50 = vshll.u32 %v6536_v40, 16  ;;  %v6543_v20 = vld [vmem:[%s8151_s13 + $0x8c] sm:$0x1]  ;;  %v6544_v32 = vld [vmem:[%s8151_s13 + $0x90] sm:$0xf] }
  0xb8   : > { %7601 = vmatpush3.bf16.msra.mxu1 %v7934_v3  ;;  %v2839_v42 = vor.u32 %v2838_v33, %v2834_v30  ;;  %v6581_v48 = vcombine.low %v2811_v37, %v2821_v41  ;;  %v2860_v51 = vshrl.u32 %v6536_v40, 16  ;;  %v2849_v52 = vrot.slane %v2847_v44, 4  ;;  %v7936_v33 = vld [vmem:[%s8151_s13 + $0x9c] sm:$0xff]   ;;  %v6545_v39 = vld [vmem:[%s8151_s13 + $0x94] sm:$0xf] }
  0xb9   : > { %7602 = vmatprep.subr.bf16.mxu1 %v7938_v17  ;;  %v2830_v49 = vrot.slane %v2829_v38, 4  ;;  %v2852_v53 = vrot.slane %v2850_v47, 5  ;;  %v2866_v54 = vshll.u32 %v6537_v43, 16  ;;  %v2858_v61 = vrot.slane %v2856_v50, 5  ;;  %v6546_v43 = vld [vmem:[%s8151_s13 + $0x98] sm:$0x1] }
  0xba   : > { %v2840_v45 = vrot.slane %v2839_v42, 4  ;;  %7649 = vmatpush3.bf16.msra.mxu0 %v7935_v22  ;;  %7570 = vmatprep.mubr.bf16.mxu0 %v6581_v48  ;;  %v2862_v62 = vrot.slane %v2860_v51, 4  ;;  %v2871_v5 = vshrl.u32 %v6538_v55, 16  ;;  %v2874_v9 = vshll.u32 %v6538_v55, 16 }
  0xbb   : > { %7523 = vmatmul.mubr.bf16.gmra.mxu1 %v7925_v12  ;;  %v2835_v60 = vsel %vm8241_vm5, %v2830_v49, %v2834_v30  ;;  %7650 = vmatprep.subr.bf16.mxu0 %v7939_v31  ;;  %v2853_v57 = vor.u32 %v2852_v53, %v2849_v52  ;;  %v2868_v4 = vrot.slane %v2866_v54, 5  ;;  %v2880_v10 = vshll.u32 %v6539_v63, 16 }
  0xbc   : > { %7526 = vmatprep.mubr.bf16.mxu1 %v7928_v21  ;;  %7603 = vmatpush3.bf16.msra.mxu1 %v7938_v17  ;;  %v2845_v3 = vsel %vm8241_vm5, %v2840_v45, %v2844_v35  ;;  %v2863_v8 = vor.u32 %v2862_v62, %v2858_v61  ;;  %v2873_v7 = vrot.slane %v2871_v5, 4  ;;  %v2884_v13 = vshrl.u32 %v6539_v63, 16  ;;  %v7933_v17 = vld [vmem:[%s8151_s13 + $0x90] sm:$0xff]  }
  0xbd   : > { %7604 = vmatprep.subr.bf16.mxu1 %v7942_v36  ;;  %v6582_v6 = vcombine.low %v2835_v60, %v2845_v3  ;;  %v2854_v12 = vrot.slane %v2853_v57, 4  ;;  %v2890_v14 = vshll.u32 %v6540_v0, 16  ;;  %v2876_v16 = vrot.slane %v2874_v9, 5  ;;  %v6547_v3 = vld [vmem:[%s8151_s13 + $0x9c] sm:$0xf] }
  0xbe   : > { %7651 = vmatpush3.bf16.msra.mxu0 %v7939_v31  ;;  %v2864_v15 = vrot.slane %v2863_v8, 4  ;;  %v2882_v18 = vrot.slane %v2880_v10, 5  ;;  %v2886_v22 = vrot.slane %v2884_v13, 4  ;;  %v2895_v1 = vshrl.u32 %v6541_v24, 16  ;;  %v6548_v57 = vld [vmem:[%s8151_s13 + $0xa0] sm:$0xf] }
  0xbf   : > { %7571 = vmatmul.mubr.bf16.gmra.mxu0 %v6582_v6  ;;  %v2859_v21 = vsel %vm8241_vm5, %v2854_v12, %v2858_v61  ;;  %v2892_v23 = vrot.slane %v2890_v14, 5  ;;  %7652 = vmatprep.subr.bf16.mxu0 %v7943_v59  ;;  %v2877_v27 = vor.u32 %v2876_v16, %v2873_v7  ;;  %v2898_v11 = vshll.u32 %v6541_v24, 16  ;;  %v6549_v8 = vld [vmem:[%s8151_s13 + $0xa4] sm:$0x1]  ;;  %v7940_v12 = vld [vmem:[%s8151_s13 + $0xb4] sm:$0xff]  }
  0xc0   : > { %7605 = vmatpush3.bf16.msra.mxu1 %v7942_v36  ;;  %v2869_v26 = vsel %vm8241_vm5, %v2864_v15, %v2868_v4  ;;  %v2887_v29 = vor.u32 %v2886_v22, %v2882_v18  ;;  %v2904_v30 = vshll.u32 %v6542_v25, 16  ;;  %v2908_v31 = vshrl.u32 %v6542_v25, 16  ;;  %v7937_v4 = vld [vmem:[%s8151_s13 + $0xa8] sm:$0xff]  }
  0xc1   : > { %7686 = vmatprep.subr.bf16.mxu1 %v8710_v2  ;;  %v6583_v28 = vcombine.low %v2859_v21, %v2869_v26  ;;  %v2878_v35 = vrot.slane %v2877_v27, 4  ;;  %v2897_v36 = vrot.slane %v2895_v1, 4  ;;  %v2900_v37 = vrot.slane %v2898_v11, 5  ;;  %v6551_v27 = vld [vmem:[%s8151_s13 + $0xac] sm:$0xf] }
  0xc2   : > { %7653 = vmatpush3.bf16.msra.mxu0 %v7943_v59  ;;  %v2914_v38 = vshll.u32 %v6543_v20, 16  ;;  %v2888_v40 = vrot.slane %v2887_v29, 4  ;;  %v2906_v41 = vrot.slane %v2904_v30, 5  ;;  %v2910_v42 = vrot.slane %v2908_v31, 4  ;;  %v6552_v20 = vld [vmem:[%s8151_s13 + $0xb0] sm:$0x1] }
  0xc3   : > { %7527 = vmatmul.mubr.bf16.gmra.mxu1 %v7929_v34  ;;  %7734 = vmatprep.subr.bf16.mxu0 %v8717_v19  ;;  %v2919_v44 = vshrl.u32 %v6544_v32, 16  ;;  %v2883_v47 = vsel %vm8241_vm5, %v2878_v35, %v2882_v18  ;;  %v2901_v48 = vor.u32 %v2900_v37, %v2897_v36  ;;  %v2922_v50 = vshll.u32 %v6544_v32, 16 }
  0xc4   : > { %7530 = vmatprep.mubr.bf16.mxu1 %v7932_v58  ;;  %7574 = vmatprep.mubr.bf16.mxu0 %v6583_v28  ;;  %v2916_v49 = vrot.slane %v2914_v38, 5  ;;  %v2893_v51 = vsel %vm8241_vm5, %v2888_v40, %v2892_v23  ;;  %v2911_v34 = vor.u32 %v2910_v42, %v2906_v41  ;;  %v2928_v52 = vshll.u32 %v6545_v39, 16  ;;  %v6550_v23 = vld [vmem:[%s8151_s13 + $0xa8] sm:$0xf] }
  0xc5   : > { %v2921_v45 = vrot.slane %v2919_v44, 4  ;;  %v6584_v53 = vcombine.low %v2883_v47, %v2893_v51  ;;  %v2902_v54 = vrot.slane %v2901_v48, 4  ;;  %v2924_v55 = vrot.slane %v2922_v50, 5  ;;  %v6553_v44 = vld [vmem:[%s8151_s13 + $0xb4] sm:$0xf]  ;;  %v7941_v47 = vld [vmem:[%s8151_s13 + $0xc0] sm:$0xff]  }
  0xc6   : > { %v2932_v58 = vshrl.u32 %v6545_v39, 16  ;;  %v2912_v59 = vrot.slane %v2911_v34, 4  ;;  %v2930_v60 = vrot.slane %v2928_v52, 5  ;;  %v2938_v61 = vshll.u32 %v6546_v43, 16  ;;  %v6554_v51 = vld [vmem:[%s8151_s13 + $0xb8] sm:$0xf] }
  0xc7   : > { %7575 = vmatmul.mubr.bf16.gmra.mxu0 %v6584_v53  ;;  %v2907_v62 = vsel %vm8241_vm5, %v2902_v54, %v2906_v41  ;;  %v2925_v63 = vor.u32 %v2924_v55, %v2921_v45  ;;  %v2943_v9 = vshrl.u32 %v6547_v3, 16  ;;  %v2946_v10 = vshll.u32 %v6547_v3, 16  ;;  %v6555_v34 = vld [vmem:[%s8151_s13 + $0xbc] sm:$0x1] }
  0xc8   : > { %v2934_v0 = vrot.slane %v2932_v58, 4  ;;  %v2917_v5 = vsel %vm8241_vm5, %v2912_v59, %v2916_v49  ;;  %v2940_v6 = vrot.slane %v2938_v61, 5  ;;  %v2952_v15 = vshll.u32 %v6548_v57, 16 }
  0xc9   : > { %v6585_v7 = vcombine.low %v2907_v62, %v2917_v5  ;;  %v2926_v13 = vrot.slane %v2925_v63, 4  ;;  %v2945_v16 = vrot.slane %v2943_v9, 4  ;;  %v2948_v18 = vrot.slane %v2946_v10, 5 }
  0xca   : > { %v2935_v14 = vor.u32 %v2934_v0, %v2930_v60  ;;  %v2956_v21 = vshrl.u32 %v6548_v57, 16  ;;  %v2962_v22 = vshll.u32 %v6549_v8, 16  ;;  %v2954_v26 = vrot.slane %v2952_v15, 5  ;;  %v6556_v57 = vld [vmem:[%s8151_s13 + $0xc0] sm:$0xf] }
  0xcb   : > { %7531 = vmatmul.mubr.bf16.gmra.mxu1 %v7933_v17  ;;  %7578 = vmatprep.mubr.bf16.mxu0 %v6585_v7  ;;  %v2931_v24 = vsel %vm8241_vm5, %v2926_v13, %v2930_v60  ;;  %v2949_v1 = vor.u32 %v2948_v18, %v2945_v16  ;;  %v2967_v28 = vshrl.u32 %v6550_v23, 16  ;;  %v2970_v30 = vshll.u32 %v6550_v23, 16  ;;  %v6558_v8 = vld [vmem:[%s8151_s13 + $0xc8] sm:$0x1] }
  0xcc   : > { %7534 = vmatprep.mubr.bf16.mxu1 %v7936_v33  ;;  %v2936_v25 = vrot.slane %v2935_v14, 4  ;;  %v2958_v11 = vrot.slane %v2956_v21, 4  ;;  %v2964_v17 = vrot.slane %v2962_v22, 5  ;;  %v2976_v31 = vshll.u32 %v6551_v27, 16 }
  0xcd   : > { %v2980_v32 = vshrl.u32 %v6551_v27, 16  ;;  %v2950_v35 = vrot.slane %v2949_v1, 4  ;;  %v2969_v37 = vrot.slane %v2967_v28, 4  ;;  %v2972_v38 = vrot.slane %v2970_v30, 5  ;;  %v6600_v1 = vld [vmem:[%s8151_s13 + $0x10] sm:$0xf] }
  0xce   : > { %v2941_v29 = vsel %vm8241_vm5, %v2936_v25, %v2940_v6  ;;  %v2959_v36 = vor.u32 %v2958_v11, %v2954_v26  ;;  %v2978_v39 = vrot.slane %v2976_v31, 5  ;;  %v2986_v41 = vshll.u32 %v6552_v20, 16  ;;  %v6557_v6 = vld [vmem:[%s8151_s13 + $0xc4] sm:$0xf]  ;;  %v6599_v20 = vld [vmem:[%s8151_s13 + $0xc] sm:$0xe] }
  0xcf   : > { %v6586_v33 = vcombine.low %v2931_v24, %v2941_v29  ;;  %v2982_v40 = vrot.slane %v2980_v32, 4  ;;  %v2955_v42 = vsel %vm8241_vm5, %v2950_v35, %v2954_v26  ;;  %v2973_v48 = vor.u32 %v2972_v38, %v2969_v37  ;;  %v6601_v29 = vld [vmem:[%s8151_s13 + $0x14] sm:$0x1]  ;;  %v6603_v38 = vld [vmem:[%s8151_s13 + $0x1c] sm:$0xf] }
  0xd0   : > { %v2960_v43 = vrot.slane %v2959_v36, 4  ;;  %v2988_v50 = vrot.slane %v2986_v41, 5  ;;  %v2991_v45 = vshrl.u32 %v6553_v44, 16  ;;  %v2994_v53 = vshll.u32 %v6553_v44, 16  ;;  %v6602_v36 = vld [vmem:[%s8151_s13 + $0x18] sm:$0xe] }
  0xd1   : > { %7579 = vmatmul.mubr.bf16.gmra.mxu0 %v6586_v33  ;;  %v2983_v49 = vor.u32 %v2982_v40, %v2978_v39  ;;  %v3000_v54 = vshll.u32 %v6554_v51, 16  ;;  %v3004_v55 = vshrl.u32 %v6554_v51, 16  ;;  %v2974_v59 = vrot.slane %v2973_v48, 4 }
  0xd2   : > { %v2965_v52 = vsel %vm8241_vm5, %v2960_v43, %v2964_v17  ;;  %v2993_v61 = vrot.slane %v2991_v45, 4  ;;  %v2996_v62 = vrot.slane %v2994_v53, 5  ;;  %v3010_v3 = vshll.u32 %v6555_v34, 16  ;;  %v6605_v34 = vld [vmem:[%s8151_s13 + $0x24] sm:$0xe] }
  0xd3   : > { %7535 = vmatmul.mubr.bf16.gmra.mxu1 %v7937_v4  ;;  %v6587_v58 = vcombine.low %v2955_v42, %v2965_v52  ;;  %v2984_v60 = vrot.slane %v2983_v49, 4  ;;  %v3002_v63 = vrot.slane %v3000_v54, 5  ;;  %v3006_v0 = vrot.slane %v3004_v55, 4  ;;  %v6606_v55 = vld [vmem:[%s8151_s13 + $0x28] sm:$0xf] }
  0xd4   : > { %7538 = vmatprep.mubr.bf16.mxu1 %v7940_v12  ;;  %v2979_v4 = vsel %vm8241_vm5, %v2974_v59, %v2978_v39  ;;  %v3015_v9 = vshrl.u32 %v6556_v57, 16  ;;  %v3018_v10 = vshll.u32 %v6556_v57, 16  ;;  %v2997_v7 = vor.u32 %v2996_v62, %v2993_v61  ;;  %v6604_v39 = vld [vmem:[%s8151_s13 + $0x20] sm:$0x1]  ;;  %v7950_v62 = vld [vmem:[%s10020_s1 + $0x1f0] sm:$0xff]  }
  0xd5   : > { %7582 = vmatprep.mubr.bf16.mxu0 %v6587_v58  ;;  %v2989_v5 = vsel %vm8241_vm5, %v2984_v60, %v2988_v50  ;;  %v3007_v13 = vor.u32 %v3006_v0, %v3002_v63  ;;  %v3012_v14 = vrot.slane %v3010_v3, 5  ;;  %v3024_v18 = vshll.u32 %v6557_v6, 16  ;;  %v6607_v58 = vld [vmem:[%s8151_s13 + $0x2c] sm:$0x1]  ;;  %v6608_v0 = vld [vmem:[%s8151_s13 + $0x30] sm:$0xe] }
  0xd6   : > { %v6588_v12 = vcombine.low %v2979_v4, %v2989_v5  ;;  %v3017_v15 = vrot.slane %v3015_v9, 4  ;;  %v3020_v16 = vrot.slane %v3018_v10, 5  ;;  %v3028_v21 = vshrl.u32 %v6557_v6, 16  ;;  %v6609_v3 = vld [vmem:[%s8151_s13 + $0x34] sm:$0xf]  ;;  %v7945_v9 = vld [vmem:[%s8151_s13 + $0x24] sm:$0xff]  }
  0xd7   : > { %v2998_v22 = vrot.slane %v2997_v7, 4  ;;  %v3008_v23 = vrot.slane %v3007_v13, 4  ;;  %v3034_v24 = vshll.u32 %v6558_v8, 16  ;;  %v3026_v26 = vrot.slane %v3024_v18, 5  ;;  %v6610_v6 = vld [vmem:[%s8151_s13 + $0x38] sm:$0x1] }
  0xd8   : > { %v3021_v25 = vor.u32 %v3020_v16, %v3017_v15  ;;  %v3030_v27 = vrot.slane %v3028_v21, 4  ;;  %v6647_v30 = vrot.slane %v6599_v20, 9  ;;  %v3522_v35 = vrot.slane %v6600_v1, 5  ;;  %v7948_v13 = vld [vmem:[%s8151_s13 + $0x30] sm:$0xff]   ;;  %v6611_v21 = vld [vmem:[%s8151_s13 + $0x3c] sm:$0xe] }
  0xd9   : > { %7583 = vmatmul.mubr.bf16.gmra.mxu0 %v6588_v12  ;;  %v3003_v11 = vsel %vm8241_vm5, %v2998_v22, %v3002_v63  ;;  %v3013_v17 = vsel %vm8241_vm5, %v3008_v23, %v3012_v14  ;;  %v3036_v28 = vrot.slane %v3034_v24, 5  ;;  %v3525_v37 = vrot.slane %v6601_v29, 5  ;;  %v7951_v18 = vld [vmem:[%s10020_s1 + $0x230] sm:$0xff]   ;;  %v6612_v22 = vld [vmem:[%s8151_s13 + $0x40] sm:$0xf]  ;;  %v7954_v20 = vld [vmem:[%s10020_s1 + $0x1e8] sm:$0xff]  }
  0xda   : > { %v6589_v31 = vcombine.low %v3003_v11, %v3013_v17  ;;  %v3022_v32 = vrot.slane %v3021_v25, 4  ;;  %v3031_v33 = vor.u32 %v3030_v27, %v3026_v26  ;;  %v6648_v40 = vrot.slane %v6602_v36, 9  ;;  %v6613_v23 = vld [vmem:[%s8151_s13 + $0x44] sm:$0x1]  ;;  %v6614_v27 = vld [vmem:[%s8151_s13 + $0x48] sm:$0xe] }
  0xdb   : > { %7539 = vmatmul.mubr.bf16.gmra.mxu1 %v7941_v47  ;;  %v3523_v43 = vsel %vm8222_vm4, %v6647_v30, %v3522_v35  ;;  %v3524_v44 = vrot.slane %v3522_v35, 4  ;;  %v7944_v47 = vld [vmem:[%s8151_s13 + $0x18] sm:$0xff]   ;;  %v3529_v48 = vrot.slane %v6603_v38, 5  ;;  %v3532_v49 = vrot.slane %v6604_v39, 5  ;;  %v6616_v29 = vld [vmem:[%s8151_s13 + $0x50] sm:$0x1] }
  0xdc   : > { %7586 = vmatprep.mubr.bf16.mxu0 %v6589_v31  ;;  %v3027_v41 = vsel %vm8241_vm5, %v3022_v32, %v3026_v26  ;;  %v3032_v42 = vrot.slane %v3031_v33, 4  ;;  %v6649_v59 = vrot.slane %v6605_v34, 9  ;;  %v3536_v60 = vrot.slane %v6606_v55, 5  ;;  %v7958_v31 = vld [vmem:[%s10020_s1 + $0x1e0] sm:$0xff]  }
  0xdd   : > { %v3526_v51 = vsel %vm8222_vm4, %v3524_v44, %v3525_v37  ;;  %v3530_v53 = vsel %vm8222_vm4, %v6648_v40, %v3529_v48  ;;  %v3531_v54 = vrot.slane %v3529_v48, 4  ;;  %v3539_v61 = vrot.slane %v6607_v58, 5  ;;  %v7949_v40 = vld [vmem:[%s8151_s13 + $0x3c] sm:$0xff]   ;;  %v6617_v44 = vld [vmem:[%s8151_s13 + $0x54] sm:$0xe] }
  0xde   : > { %v3037_v50 = vsel %vm8241_vm5, %v3032_v42, %v3036_v28  ;;  %v6679_v52 = vcombine.low %v3523_v43, %v3526_v51  ;;  %v3537_v4 = vsel %vm8222_vm4, %v6649_v59, %v3536_v60  ;;  %v3538_v5 = vrot.slane %v3536_v60, 4  ;;  %v6615_v28 = vld [vmem:[%s8151_s13 + $0x4c] sm:$0xf]  ;;  %v6619_v48 = vld [vmem:[%s8151_s13 + $0x5c] sm:$0x1] }
  0xdf   : > { %v6590_v45 = vcombine.low %v3027_v41, %v3037_v50  ;;  %v3533_v63 = vsel %vm8222_vm4, %v3531_v54, %v3532_v49  ;;  %v6650_v8 = vrot.slane %v6608_v0, 9  ;;  %v3543_v10 = vrot.slane %v6609_v3, 5  ;;  %v7955_v43 = vld [vmem:[%s10020_s1 + $0x228] sm:$0xff]   ;;  %v6620_v54 = vld [vmem:[%s8151_s13 + $0x60] sm:$0xe]  ;;  %v7962_v3 = vld [vmem:[%s10020_s1 + $0x1d8] sm:$0xff]  }
  0xe0   : > { %7606 = vmatprep.mubr.bf16.mxu1 %v6679_v52  ;;  %v6680_v57 = vcombine.low %v3530_v53, %v3533_v63  ;;  %v3546_v12 = vrot.slane %v6610_v6, 5  ;;  %v3540_v7 = vsel %vm8222_vm4, %v3538_v5, %v3539_v61  ;;  %v6651_v24 = vrot.slane %v6611_v21, 9  ;;  %v6621_v55 = vld [vmem:[%s8151_s13 + $0x64] sm:$0xf]  ;;  %v6622_v58 = vld [vmem:[%s8151_s13 + $0x68] sm:$0x1] }
  0xe1   : > { %7587 = vmatmul.mubr.bf16.gmra.mxu0 %v6590_v45  ;;  %v6681_v14 = vcombine.low %v3537_v4, %v3540_v7  ;;  %v3544_v15 = vsel %vm8222_vm4, %v6650_v8, %v3543_v10  ;;  %v3545_v16 = vrot.slane %v3543_v10, 4  ;;  %v3550_v25 = vrot.slane %v6612_v22, 5  ;;  %v7959_v0 = vld [vmem:[%s10020_s1 + $0x220] sm:$0xff]   ;;  %v7966_v8 = vld [vmem:[%s10020_s1 + $0x1d0] sm:$0xff]   ;;  %v7963_v7 = vld [vmem:[%s10020_s1 + $0x218] sm:$0xff]  }
  0xe2   : > { %7654 = vmatprep.mubr.bf16.mxu0 %v7944_v47  ;;  %v3553_v26 = vrot.slane %v6613_v23, 5  ;;  %v6652_v30 = vrot.slane %v6614_v27, 9  ;;  %v3557_v35 = vrot.slane %v6615_v28, 5  ;;  %v3560_v36 = vrot.slane %v6616_v29, 5  ;;  %v6618_v47 = vld [vmem:[%s8151_s13 + $0x58] sm:$0xf] }
  0xe3   : > { %7607 = vmatmul.mubr.bf16.vlgmr.msra.gmra.mxu1 %v6680_v57  ;;  %v3551_v11 = vsel %vm8222_vm4, %v6651_v24, %v3550_v25  ;;  %v3552_v17 = vrot.slane %v3550_v25, 4  ;;  %v6653_v49 = vrot.slane %v6617_v44, 9  ;;  %v3564_v52 = vrot.slane %v6618_v47, 5  ;;  %v7953_v21 = vld [vmem:[%s8151_s13 + $0x54] sm:$0xff]   ;;  %v7956_v25 = vld [vmem:[%s8151_s13 + $0x60] sm:$0xff]  }
  0xe4   : > { %7687 = vmatpush3.bf16.msra.mxu1 %v8710_v2  ;;  %7610 = vmatprep.mubr.bf16.mxu1 %v6681_v14  ;;  %v3547_v2 = vsel %vm8222_vm4, %v3545_v16, %v3546_v12  ;;  %v3559_v42 = vrot.slane %v3557_v35, 4  ;;  %v3558_v34 = vsel %vm8222_vm4, %v6652_v30, %v3557_v35  ;;  %v3567_v53 = vrot.slane %v6619_v48, 5  ;;  %v6623_v14 = vld [vmem:[%s8151_s13 + $0x6c] sm:$0xe]  ;;  %v6625_v22 = vld [vmem:[%s8151_s13 + $0x74] sm:$0x1] }
  0xe5   : > { %7688 = vmatprep.subr.bf16.mxu1 %v7950_v62  ;;  %v6682_v1 = vcombine.low %v3544_v15, %v3547_v2  ;;  %v3554_v37 = vsel %vm8222_vm4, %v3552_v17, %v3553_v26  ;;  %v3565_v61 = vsel %vm8222_vm4, %v6653_v49, %v3564_v52  ;;  %v3571_v63 = vrot.slane %v6621_v55, 5  ;;  %v6624_v15 = vld [vmem:[%s8151_s13 + $0x70] sm:$0xf]  ;;  %v6626_v26 = vld [vmem:[%s8151_s13 + $0x78] sm:$0xe]  ;;  %v7974_v49 = vld [vmem:[%s10020_s1 + $0x1c0] sm:$0xff]  }
  0xe6   : > { %v6683_v41 = vcombine.low %v3551_v11, %v3554_v37  ;;  %v3561_v45 = vsel %vm8222_vm4, %v3559_v42, %v3560_v36  ;;  %v6654_v4 = vrot.slane %v6620_v54, 9  ;;  %v3574_v12 = vrot.slane %v6622_v58, 5  ;;  %v6627_v28 = vld [vmem:[%s8151_s13 + $0x7c] sm:$0xf]  ;;  %v6628_v29 = vld [vmem:[%s8151_s13 + $0x80] sm:$0x1] }
  0xe7   : > { %v6684_v57 = vcombine.low %v3558_v34, %v3561_v45  ;;  %v3573_v10 = vrot.slane %v3571_v63, 4  ;;  %v6655_v23 = vrot.slane %v6623_v14, 9  ;;  %v3578_v24 = vrot.slane %v6624_v15, 5  ;;  %v7967_v30 = vld [vmem:[%s10020_s1 + $0x210] sm:$0xff]   ;;  %v7971_v55 = vld [vmem:[%s10020_s1 + $0x208] sm:$0xff]   ;;  %v7975_v15 = vld [vmem:[%s10020_s1 + $0x200] sm:$0xff]  }
  0xe8   : > { %7689 = vmatpush3.bf16.msra.mxu1 %v7950_v62  ;;  %v3566_v62 = vrot.slane %v3564_v52, 4  ;;  %v3581_v2 = vrot.slane %v6625_v22, 5  ;;  %v3585_v35 = vrot.slane %v6627_v28, 5  ;;  %v3588_v44 = vrot.slane %v6628_v29, 5  ;;  %v6630_v52 = vld [vmem:[%s8151_s13 + $0x88] sm:$0xf] }
  0xe9   : > { %7655 = vmatmul.mubr.bf16.vlgmr.msra.gmra.mxu0 %v7945_v9  ;;  %7690 = vmatprep.subr.bf16.mxu1 %v7954_v20  ;;  %v3575_v11 = vsel %vm8222_vm4, %v3573_v10, %v3574_v12  ;;  %v3580_v17 = vrot.slane %v3578_v24, 4  ;;  %v3592_v58 = vrot.slane %v6630_v52, 5  ;;  %v6637_v28 = vld [vmem:[%s8151_s13 + $0xa4] sm:$0x1] }
  0xea   : > { %7735 = vmatpush3.bf16.msra.mxu0 %v8717_v19  ;;  %7658 = vmatprep.mubr.bf16.mxu0 %v7948_v13  ;;  %v7952_v19 = vld [vmem:[%s8151_s13 + $0x48] sm:$0xff]   ;;  %v3568_v9 = vsel %vm8222_vm4, %v3566_v62, %v3567_v53  ;;  %v3587_v45 = vrot.slane %v3585_v35, 4 }
  0xeb   : > { %7736 = vmatprep.subr.bf16.mxu0 %v7951_v18  ;;  %7611 = vmatmul.mubr.bf16.gmra.mxu1 %v6682_v1  ;;  %v6685_v13 = vcombine.low %v3565_v61, %v3568_v9  ;;  %v3572_v1 = vsel %vm8222_vm4, %v6654_v4, %v3571_v63  ;;  %v6631_v53 = vld [vmem:[%s8151_s13 + $0x8c] sm:$0x1]  ;;  %v3594_v9 = vrot.slane %v3592_v58, 4 }
  0xec   : > { %7614 = vmatprep.mubr.bf16.mxu1 %v6683_v41  ;;  %7691 = vmatpush3.bf16.msra.mxu1 %v7954_v20  ;;  %v3582_v41 = vsel %vm8222_vm4, %v3580_v17, %v3581_v2  ;;  %v6686_v42 = vcombine.low %v3572_v1, %v3575_v11  ;;  %v3595_v61 = vrot.slane %v6631_v53, 5  ;;  %v7957_v4 = vld [vmem:[%s8151_s13 + $0x6c] sm:$0xff]   ;;  %v3589_v14 = vsel %vm8222_vm4, %v3587_v45, %v3588_v44  ;;  %v6636_v1 = vld [vmem:[%s8151_s13 + $0xa0] sm:$0xf] }
  0xed   : > { %7692 = vmatprep.subr.bf16.mxu1 %v7958_v31  ;;  %v3606_v29 = vrot.slane %v6636_v1, 5  ;;  %v6639_v44 = vld [vmem:[%s8151_s13 + $0xac] sm:$0xf] }
  0xee   : > { %7737 = vmatpush3.bf16.msra.mxu0 %v7951_v18  ;;  %v3596_v22 = vsel %vm8222_vm4, %v3594_v9, %v3595_v61  ;;  %v3613_v53 = vrot.slane %v6639_v44, 5  ;;  %v7964_v9 = vld [vmem:[%s8151_s13 + $0x90] sm:$0xff]  }
  0xef   : > { %7738 = vmatprep.subr.bf16.mxu0 %v7955_v43 }
  0xf0   : > { %7693 = vmatpush3.bf16.msra.mxu1 %v7958_v31  ;;  %v3579_v31 = vsel %vm8222_vm4, %v6655_v23, %v3578_v24 }
  0xf1   : > { %7659 = vmatmul.mubr.bf16.gmra.mxu0 %v7949_v40  ;;  %7694 = vmatprep.subr.bf16.mxu1 %v7962_v3  ;;  %v7970_v40 = vld [vmem:[%s10020_s1 + $0x1c8] sm:$0xff]   ;;  %v6687_v34 = vcombine.low %v3579_v31, %v3582_v41  ;;  %v3609_v41 = vrot.slane %v6637_v28, 5  ;;  %v6644_v28 = vld [vmem:[%s8151_s13 + $0xc0] sm:$0xe] }
  0xf2   : > { %7662 = vmatprep.mubr.bf16.mxu0 %v7952_v19  ;;  %7739 = vmatpush3.bf16.msra.mxu0 %v7955_v43  ;;  %v6656_v43 = vrot.slane %v6626_v26, 9  ;;  %v6629_v19 = vld [vmem:[%s8151_s13 + $0x84] sm:$0xe]  ;;  %v6635_v26 = vld [vmem:[%s8151_s13 + $0x9c] sm:$0xe] }
  0xf3   : > { %7740 = vmatprep.subr.bf16.mxu0 %v7959_v0  ;;  %7615 = vmatmul.mubr.bf16.gmra.mxu1 %v6684_v57  ;;  %v6657_v54 = vrot.slane %v6629_v19, 9  ;;  %v6634_v57 = vld [vmem:[%s8151_s13 + $0x98] sm:$0x1]  ;;  %v6640_v19 = vld [vmem:[%s8151_s13 + $0xb0] sm:$0x1] }
  0xf4   : > { %7618 = vmatprep.mubr.bf16.mxu1 %v6685_v13  ;;  %7695 = vmatpush3.bf16.msra.mxu1 %v7962_v3  ;;  %v6633_v3 = vld [vmem:[%s8151_s13 + $0x94] sm:$0xf]  ;;  %v3586_v13 = vsel %vm8222_vm4, %v6656_v43, %v3585_v35  ;;  %v3602_v24 = vrot.slane %v6634_v57, 5  ;;  %v3608_v43 = vrot.slane %v3606_v29, 4 }
  0xf5   : > { %v8828_v32 = vpop.f32.mrf.mxu0  ;;  %v8830_v33 = vpop.f32.mrf.mxu1  ;;  %7696 = vmatprep.subr.bf16.mxu1 %v7966_v8  ;;  %v3599_v10 = vrot.slane %v6633_v3, 5  ;;  %v6688_v11 = vcombine.low %v3586_v13, %v3589_v14  ;;  %v6643_v13 = vld [vmem:[%s8151_s13 + $0xbc] sm:$0x1] }
  0xf6   : > { %7741 = vmatpush3.bf16.msra.mxu0 %v7959_v0  ;;  %v6632_v0 = vld [vmem:[%s8151_s13 + $0x90] sm:$0xe]  ;;  %v3610_v57 = vsel %vm8222_vm4, %v3608_v43, %v3609_v41  ;;  %v6662_v43 = vrot.slane %v6644_v28, 9 }
  0xf7   : > { %v8835_v38 = vpop.f32.mrf.mxu0  ;;  %v8837_v39 = vpop.f32.mrf.mxu1  ;;  %7742 = vmatprep.subr.bf16.mxu0 %v7963_v7  ;;  %v6658_v23 = vrot.slane %v6632_v0, 9  ;;  %v3601_v17 = vrot.slane %v3599_v10, 4 }
  0xf8   : > { %7697 = vmatpush3.bf16.msra.mxu1 %v7966_v8  ;;  %v7960_v8 = vld [vmem:[%s8151_s13 + $0x78] sm:$0xff]  }
  0xf9   : > { %v8847_v50 = vpop.f32.mrf.mxu0  ;;  %v8849_v51 = vpop.f32.mrf.mxu1  ;;  %7663 = vmatmul.mubr.bf16.gmra.mxu0 %v7953_v21  ;;  %7698 = vmatprep.subr.bf16.mxu1 %v7970_v40  ;;  %v3593_v21 = vsel %vm8222_vm4, %v6657_v54, %v3592_v58  ;;  %v3616_v54 = vrot.slane %v6640_v19, 5  ;;  %v3603_v0 = vsel %vm8222_vm4, %v3601_v17, %v3602_v24  ;;  %v3623_v24 = vrot.slane %v6643_v13, 5 }
  0xfa   : > { %7666 = vmatprep.mubr.bf16.mxu0 %v7956_v25  ;;  %7743 = vmatpush3.bf16.msra.mxu0 %v7963_v7 }
  0xfb   : > { %v8858_v59 = vpop.f32.mrf.mxu0  ;;  %v8860_v60 = vpop.f32.mrf.mxu1  ;;  %7744 = vmatprep.subr.bf16.mxu0 %v7967_v30  ;;  %7619 = vmatmul.mubr.bf16.gmra.mxu1 %v6686_v42  ;;  %v6638_v42 = vld [vmem:[%s8151_s13 + $0xa8] sm:$0xe] }
  0xfc   : > { %7622 = vmatprep.mubr.bf16.mxu1 %v6687_v34  ;;  %7699 = vmatpush3.bf16.msra.mxu1 %v7970_v40  ;;  %v6659_v40 = vrot.slane %v6635_v26, 9  ;;  %v6660_v34 = vrot.slane %v6638_v42, 9 }
  0xfd   : > { %v8870_v5 = vpop.f32.mrf.mxu0  ;;  %v8872_v6 = vpop.f32.mrf.mxu1  ;;  %7700 = vmatprep.subr.bf16.mxu1 %v7974_v49 }
  0xfe   : > { %7745 = vmatpush3.bf16.msra.mxu0 %v7967_v30  ;;  %v6689_v30 = vcombine.low %v3593_v21, %v3596_v22  ;;  %v3607_v3 = vsel %vm8222_vm4, %v6659_v40, %v3606_v29  ;;  %v6645_v29 = vld [vmem:[%s8151_s13 + $0xc4] sm:$0xf] }
  0xff   : > { %v8884_v16 = vpop.f32.mrf.mxu0  ;;  %v8886_v18 = vpop.f32.mrf.mxu1  ;;  %7746 = vmatprep.subr.bf16.mxu0 %v7971_v55  ;;  %v6691_v1 = vcombine.low %v3607_v3, %v3610_v57  ;;  %v3627_v44 = vrot.slane %v6645_v29, 5 }
 0x100   : > { %7701 = vmatpush3.bf16.msra.mxu1 %v7974_v49  ;;  %v3600_v49 = vsel %vm8222_vm4, %v6658_v23, %v3599_v10  ;;  %v6642_v10 = vld [vmem:[%s8151_s13 + $0xb8] sm:$0xf] }
 0x101   : > { %v8892_v27 = vpop.f32.mrf.mxu0  ;;  %v8894_v20 = vpop.f32.mrf.mxu1  ;;  %7667 = vmatmul.mubr.bf16.gmra.mxu0 %v7957_v4  ;;  %v3615_v4 = vrot.slane %v3613_v53, 4  ;;  %v3620_v23 = vrot.slane %v6642_v10, 5  ;;  %v6690_v26 = vcombine.low %v3600_v49, %v3603_v0  ;;  %v7965_v49 = vld [vmem:[%s8151_s13 + $0x9c] sm:$0xff]   ;;  %v9015_v0 = vsel %vm8222_vm4, %v6662_v43, %v3627_v44 }
 0x102   : > { %10030 = vst [vmem:[#allocation6_spill] sm:$0xff] %v8894_v20  ;;  %7670 = vmatprep.mubr.bf16.mxu0 %v7960_v8  ;;  %7747 = vmatpush3.bf16.msra.mxu0 %v7971_v55  ;;  %v7961_v55 = vld [vmem:[%s8151_s13 + $0x84] sm:$0xff]   ;;  %v6641_v8 = vld [vmem:[%s8151_s13 + $0xb4] sm:$0xe]  ;;  %v3629_v3 = vrot.slane %v3627_v44, 4 }
 0x103   : > { %v8907_v36 = vpop.f32.mrf.mxu0  ;;  %v8909_v37 = vpop.f32.mrf.mxu1  ;;  %7748 = vmatprep.subr.bf16.mxu0 %v7975_v15  ;;  %7623 = vmatmul.mubr.bf16.gmra.mxu1 %v6688_v11  ;;  %v6661_v14 = vrot.slane %v6641_v8, 9  ;;  %v8994_v11 = vsel %vm8222_vm4, %v6660_v34, %v3613_v53  ;;  %v8998_v17 = vsel %vm8222_vm4, %v3615_v4, %v3616_v54  ;;  %v3622_v42 = vrot.slane %v3620_v23, 4  ;;  %v6775_v8 = vld [vmem:[%s8151_s13 + $0x18] sm:$0xf] }
 0x104   : > { %10031 = vst [vmem:[#allocation7_spill] sm:$0xff] %v8909_v37  ;;  %7626 = vmatprep.mubr.bf16.mxu1 %v6689_v30  ;;  %v6785_v37 = vld [vmem:[%s8151_s13 + $0x40] sm:$0xf] }
 0x105   : > { %v8917_v47 = vpop.f32.mrf.mxu0  ;;  %v8919_v48 = vpop.f32.mrf.mxu1  ;;  %v9005_v41 = vsel %vm8222_vm4, %v6661_v14, %v3620_v23  ;;  %v7968_v23 = vld [vmem:[%s8151_s13 + $0xa8] sm:$0xff]  }
 0x106   : > { %10032 = vst [vmem:[#allocation8_spill] sm:$0xff] %v8919_v48  ;;  %7749 = vmatpush3.bf16.msra.mxu0 %v7975_v15  ;;  %v6646_v15 = vld [vmem:[%s8151_s13 + $0xc8] sm:$0x1] }
 0x107   : > { %v8929_v62 = vpop.f32.mrf.mxu0  ;;  %v8931_v63 = vpop.f32.mrf.mxu1  ;;  %v3630_v19 = vrot.slane %v6646_v15, 5 }
 0x108   : > { %10033 = vst [vmem:[#allocation9_spill] sm:$0xff] %v8931_v63 }
 0x109   : > { %v8938_v12 = vpop.f32.mrf.mxu0  ;;  %v8940_v7 = vpop.f32.mrf.mxu1  ;;  %7671 = vmatmul.mubr.bf16.gmra.mxu0 %v7961_v55  ;;  %v9011_v55 = vsel %vm8222_vm4, %v3622_v42, %v3623_v24  ;;  %v6777_v24 = vld [vmem:[%s8151_s13 + $0x20] sm:$0x1] }
 0x10a   : > { %10034 = vst [vmem:[#allocation10_spill] sm:$0xff] %v8940_v7  ;;  %7674 = vmatprep.mubr.bf16.mxu0 %v7964_v9  ;;  %v6693_v4 = vcombine.low %v9005_v41, %v9011_v55  ;;  %v6776_v9 = vld [vmem:[%s8151_s13 + $0x1c] sm:$0xf]  ;;  %v4537_v15 = vshll.u32 %v6777_v24, 16  ;;  %v6778_v24 = vld [vmem:[%s8151_s13 + $0x24] sm:$0xf] }
 0x10b   : > { %v8953_v25 = vpop.f32.mrf.mxu0  ;;  %v8955_v2 = vpop.f32.mrf.mxu1  ;;  %7627 = vmatmul.mubr.bf16.gmra.mxu1 %v6690_v26  ;;  %v4518_v26 = vshrl.u32 %v6775_v8, 16  ;;  %v4531_v29 = vshrl.u32 %v6776_v9, 16 }
 0x10c   : > { %10035 = vst [vmem:[#allocation11_spill] sm:$0xff] %v8955_v2  ;;  %7630 = vmatprep.mubr.bf16.mxu1 %v6691_v1  ;;  %v6781_v2 = vld [vmem:[%s8151_s13 + $0x30] sm:$0xf] }
 0x10d   : > { %v8960_v31 = vpop.f32.mrf.mxu0  ;;  %v8962_v35 = vpop.f32.mrf.mxu1  ;;  %v4520_v43 = vrot.slane %v4518_v26, 4  ;;  %v4533_v55 = vrot.slane %v4531_v29, 4  ;;  %v4542_v26 = vshrl.u32 %v6778_v24, 16 }
 0x10e   : > { %10036 = vst [vmem:[#allocation12_spill] sm:$0xff] %v8962_v35 }
 0x10f   : > { %v8967_v45 = vpop.f32.mrf.mxu0  ;;  %v8969_v52 = vpop.f32.mrf.mxu1 }
 0x110   : > { %10037 = vst [vmem:[#allocation13_spill] sm:$0xff] %v8969_v52 }
 0x111   : > { %v8973_v58 = vpop.f32.mrf.mxu0  ;;  %v8975_v61 = vpop.f32.mrf.mxu1  ;;  %7675 = vmatmul.mubr.bf16.gmra.mxu0 %v7965_v49 }
 0x112   : > { %10038 = vst [vmem:[#allocation14_spill] sm:$0xff] %v8975_v61  ;;  %7678 = vmatprep.mubr.bf16.mxu0 %v7968_v23 }
 0x113   : > { %v8988_v21 = vpop.f32.mrf.mxu0  ;;  %v8990_v22 = vpop.f32.mrf.mxu1 }
 0x114   : > { %10039 = vst [vmem:[#allocation15_spill] sm:$0xff] %v8990_v22  ;;  %v4544_v22 = vrot.slane %v4542_v26, 4 }
 0x115   : > { %v7416_v30 = vpop.f32.mrf.mxu1  ;;  %v7464_v40 = vpop.f32.mrf.mxu0 }
 0x116   : > { %v1496_v34 = vadd.f32 %v7416_v30, %v8828_v32  ;;  %v6692_v32 = vcombine.low %v8994_v11, %v8998_v17  ;;  %v4521_v11 = vshll.u32 %v6775_v8, 16  ;;  %v4527_v17 = vshll.u32 %v6776_v9, 16  ;;  %v6863_v30 = vld [vmem:[%s8151_s13 + $0x18] sm:$0xe] }
 0x117   : > { %v1367_v53 = vpop.f32.mrf.mxu1  ;;  %v1964_v54 = vpop.f32.mrf.mxu0 }
 0x118   : > { %v1494_v57 = vadd.f32 %v1367_v53, %v8835_v38  ;;  %v9024_v10 = vadd.f32 %v7464_v40, %v1496_v34  ;;  %v9031_v38 = vsel %vm8222_vm4, %v3629_v3, %v3630_v19  ;;  %v6864_v40 = vld [vmem:[%s8151_s13 + $0x1c] sm:$0xf]  ;;  %v4523_v44 = vrot.slane %v4521_v11, 5  ;;  %v6865_v34 = vld [vmem:[%s8151_s13 + $0x20] sm:$0x1]  ;;  %7631 = vmatmul.mubr.bf16.gmra.mxu1 %v6692_v32 }
 0x119   : > { %v7417_v13 = vpop.f32.mrf.mxu1  ;;  %v9026_v14 = vpop.f32.mrf.mxu0  ;;  %v4529_v19 = vrot.slane %v4527_v17, 5  ;;  %v6911_v53 = vrot.slane %v6863_v30, 9  ;;  %v4539_v3 = vrot.slane %v4537_v15, 5  ;;  %v5385_v8 = vrot.slane %v6864_v40, 5  ;;  %7634 = vmatprep.mubr.bf16.mxu1 %v6693_v4 }
 0x11a   : > { %10040 = vst [vmem:[#allocation16_spill] sm:$0xff] %v9024_v10  ;;  %v9038_v41 = vadd.f32 %v1964_v54, %v1494_v57  ;;  %v5388_v9 = vrot.slane %v6865_v34, 5  ;;  %v4524_v57 = vor.u32 %v4523_v44, %v4520_v43  ;;  %v6780_v10 = vld [vmem:[%s8151_s13 + $0x2c] sm:$0x1]  ;;  %v4545_v11 = vshll.u32 %v6778_v24, 16 }
 0x11b   : > { %v9040_v1 = vpop.f32.mrf.mxu1  ;;  %v9042_v42 = vpop.f32.mrf.mxu0  ;;  %v1497_v17 = vadd.f32 %v7417_v13, %v8847_v50  ;;  %v4534_v29 = vor.u32 %v4533_v55, %v4529_v19  ;;  %v9055_v15 = vsel %vm8222_vm4, %v6911_v53, %v5385_v8  ;;  %v5387_v30 = vrot.slane %v5385_v8, 4  ;;  %v6866_v34 = vld [vmem:[%s8151_s13 + $0x24] sm:$0xe]  ;;  %v6867_v50 = vld [vmem:[%s8151_s13 + $0x28] sm:$0xf] }
 0x11c   : > { %10041 = vst [vmem:[#allocation17_spill] sm:$0xff] %v9038_v41  ;;  %v6779_v41 = vld [vmem:[%s8151_s13 + $0x28] sm:$0xf]  ;;  %v4525_v44 = vrot.slane %v4524_v57, 4  ;;  %v4547_v24 = vrot.slane %v4545_v11, 5  ;;  %v4561_v55 = vshll.u32 %v6780_v10, 16 }
 0x11d   : > { %v9046_v28 = vpop.f32.mrf.mxu1  ;;  %v9048_v54 = vpop.f32.mrf.mxu0  ;;  %v4551_v40 = vshll.u32 %v6779_v41, 16  ;;  %v4555_v61 = vshrl.u32 %v6779_v41, 16  ;;  %v4535_v13 = vrot.slane %v4534_v29, 4  ;;  %v9065_v23 = vsel %vm8222_vm4, %v5387_v30, %v5388_v9  ;;  %v6868_v8 = vld [vmem:[%s8151_s13 + $0x2c] sm:$0x1]  ;;  %v7969_v57 = vld [vmem:[%s8151_s13 + $0xb4] sm:$0xff]  }
 0x11e   : > { %v4530_v41 = vsel %vm8241_vm5, %v4525_v44, %v4529_v19  ;;  %v4548_v26 = vor.u32 %v4547_v24, %v4544_v22  ;;  %v7972_v11 = vld [vmem:[%s8151_s13 + $0xc0] sm:$0xff]   ;;  %v4563_v29 = vrot.slane %v4561_v55, 5  ;;  %v6912_v30 = vrot.slane %v6866_v34, 9  ;;  %v6782_v22 = vld [vmem:[%s8151_s13 + $0x34] sm:$0xf]  ;;  %7679 = vmatmul.mubr.bf16.gmra.mxu0 %v7969_v57 }
 0x11f   : > { %v9058_v49 = vpop.f32.mrf.mxu1  ;;  %v9060_v43 = vpop.f32.mrf.mxu0  ;;  %v4553_v53 = vrot.slane %v4551_v40, 5  ;;  %v4557_v9 = vrot.slane %v4555_v61, 4  ;;  %v4540_v10 = vsel %vm8241_vm5, %v4535_v13, %v4539_v3  ;;  %v5392_v40 = vrot.slane %v6867_v50, 5  ;;  %v6783_v50 = vld [vmem:[%s8151_s13 + $0x38] sm:$0x1]  ;;  %7682 = vmatprep.mubr.bf16.mxu0 %v7972_v11 }
 0x120   : > { %v6839_v19 = vcombine.low %v4530_v41, %v4540_v10  ;;  %v4549_v44 = vrot.slane %v4548_v26, 4  ;;  %v5395_v32 = vrot.slane %v6868_v8, 5  ;;  %v9091_v24 = vadd.f32 %v9026_v14, %v1497_v17  ;;  %v6869_v14 = vld [vmem:[%s8151_s13 + $0x30] sm:$0xe]  ;;  %v6871_v57 = vld [vmem:[%s8151_s13 + $0x38] sm:$0x1] }
 0x121   : > { %v9068_v52 = vpop.f32.mrf.mxu1  ;;  %v9070_v35 = vpop.f32.mrf.mxu0  ;;  %v4558_v63 = vor.u32 %v4557_v9, %v4553_v53  ;;  %v9088_v61 = vsel %vm8222_vm4, %v6912_v30, %v5392_v40  ;;  %v5394_v3 = vrot.slane %v5392_v40, 4  ;;  %v1495_v34 = vadd.f32 %v9040_v1, %v8858_v59  ;;  %v6870_v30 = vld [vmem:[%s8151_s13 + $0x34] sm:$0xf] }
 0x122   : > { %10042 = vst [vmem:[#allocation18_spill] sm:$0xff] %v9091_v24  ;;  %v4554_v8 = vsel %vm8241_vm5, %v4549_v44, %v4553_v53  ;;  %v4566_v26 = vshrl.u32 %v6781_v2, 16  ;;  %v4569_v9 = vshll.u32 %v6781_v2, 16  ;;  %v4575_v1 = vshll.u32 %v6782_v22, 16 }
 0x123   : > { %v9081_v7 = vpop.f32.mrf.mxu1  ;;  %v9083_v4 = vpop.f32.mrf.mxu0  ;;  %v4559_v41 = vrot.slane %v4558_v63, 4  ;;  %v9105_v17 = vsel %vm8222_vm4, %v5394_v3, %v5395_v32  ;;  %v9108_v59 = vadd.f32 %v9042_v42, %v1495_v34  ;;  %v4579_v10 = vshrl.u32 %v6782_v22, 16  ;;  %v6784_v42 = vld [vmem:[%s8151_s13 + $0x3c] sm:$0xf] }
 0x124   : > { %v4568_v32 = vrot.slane %v4566_v26, 4  ;;  %v4571_v11 = vrot.slane %v4569_v9, 5  ;;  %v10044_v44 = vcombine.low %v9015_v0, %v9031_v38  ;;  %v4577_v3 = vrot.slane %v4575_v1, 5 }
 0x125   : > { %v9096_v13 = vpop.f32.mrf.mxu1  ;;  %v9098_v55 = vpop.f32.mrf.mxu0  ;;  %10043 = vst [vmem:[#allocation19_spill] sm:$0xff] %v9108_v59  ;;  %v4564_v2 = vsel %vm8241_vm5, %v4559_v41, %v4563_v29  ;;  %v4581_v34 = vrot.slane %v4579_v10, 4  ;;  %v4585_v59 = vshll.u32 %v6783_v50, 16  ;;  %v7973_v29 = vld [vmem:[%s8151_s13 + $0xcc] sm:$0xff]   ;;  %v6913_v26 = vrot.slane %v6869_v14, 9 }
 0x126   : > { %7635 = vmatmul.mubr.bf16.gmra.mxu1 %v10044_v44  ;;  %v6840_v22 = vcombine.low %v4554_v8, %v4564_v2  ;;  %v4572_v41 = vor.u32 %v4571_v11, %v4568_v32  ;;  %v5399_v53 = vrot.slane %v6870_v30, 5  ;;  %v5402_v9 = vrot.slane %v6871_v57, 5  ;;  %v6872_v32 = vld [vmem:[%s8151_s13 + $0x3c] sm:$0xe]  ;;  %7683 = vmatmul.mubr.bf16.gmra.mxu0 %v7973_v29  ;;  %v6873_v44 = vld [vmem:[%s8151_s13 + $0x40] sm:$0xf] }
 0x127   : > { %v9112_v40 = vpop.f32.mrf.mxu1  ;;  %v9114_v63 = vpop.f32.mrf.mxu0  ;;  %7702 = vmatprep.mubr.bf16.mxu1 %v6839_v19  ;;  %v4582_v20 = vor.u32 %v4581_v34, %v4577_v3  ;;  %v4587_v0 = vrot.slane %v4585_v59, 5  ;;  %v1500_v38 = vadd.f32 %v9046_v28, %v8870_v5  ;;  %v4590_v8 = vshrl.u32 %v6784_v42, 16  ;;  %v6786_v19 = vld [vmem:[%s8151_s13 + $0x44] sm:$0x1] }
 0x128   : > { %v4573_v50 = vrot.slane %v4572_v41, 4  ;;  %v9134_v1 = vsel %vm8222_vm4, %v6913_v26, %v5399_v53  ;;  %v5401_v10 = vrot.slane %v5399_v53, 4  ;;  %v4593_v14 = vshll.u32 %v6784_v42, 16 }
 0x129   : > { %v9124_v24 = vpop.f32.mrf.mxu1  ;;  %v9126_v48 = vpop.f32.mrf.mxu0  ;;  %v4583_v30 = vrot.slane %v4582_v20, 4  ;;  %v9138_v57 = vadd.f32 %v9048_v54, %v1500_v38  ;;  %v4592_v2 = vrot.slane %v4590_v8, 4  ;;  %v4599_v59 = vshll.u32 %v6785_v37, 16  ;;  %v6874_v54 = vld [vmem:[%s8151_s13 + $0x44] sm:$0x1] }
 0x12a   : > { %v4578_v28 = vsel %vm8241_vm5, %v4573_v50, %v4577_v3  ;;  %v5403_v53 = vsel %vm8222_vm4, %v5401_v10, %v5402_v9  ;;  %v4595_v42 = vrot.slane %v4593_v14, 5  ;;  %v4603_v20 = vshrl.u32 %v6785_v37, 16  ;;  %v6787_v10 = vld [vmem:[%s8151_s13 + $0x48] sm:$0xf] }
 0x12b   : > { %10045 = vst [vmem:[#allocation20_spill] sm:$0xff] %v9138_v57  ;;  %v9141_v11 = vpop.f32.mrf.mxu1  ;;  %v9143_v5 = vpop.f32.mrf.mxu0  ;;  %v10046_v34 = vcombine.low %v9055_v15, %v9065_v23  ;;  %v4588_v41 = vsel %vm8241_vm5, %v4583_v30, %v4587_v0  ;;  %v6945_v29 = vcombine.low %v9134_v1, %v5403_v53  ;;  %v4601_v26 = vrot.slane %v4599_v59, 5 }
 0x12c   : > { %v4609_v38 = vshll.u32 %v6786_v19, 16  ;;  %v6841_v8 = vcombine.low %v4578_v28, %v4588_v41  ;;  %v4596_v3 = vor.u32 %v4595_v42, %v4592_v2  ;;  %v4605_v50 = vrot.slane %v4603_v20, 4  ;;  %v6788_v2 = vld [vmem:[%s8151_s13 + $0x4c] sm:$0xf]  ;;  %v6875_v20 = vld [vmem:[%s8151_s13 + $0x48] sm:$0xe] }
 0x12d   : > { %7750 = vmatprep.mubr.bf16.mxu0 %v10046_v34  ;;  %v6914_v9 = vrot.slane %v6872_v32, 9  ;;  %v5406_v14 = vrot.slane %v6873_v44, 5  ;;  %v5409_v57 = vrot.slane %v6874_v54, 5  ;;  %v1498_v15 = vadd.f32 %v9058_v49, %v8884_v16  ;;  %v9160_v23 = vpop.f32.mrf.mxu1  ;;  %v9162_v0 = vpop.f32.mrf.mxu0  ;;  %v6789_v32 = vld [vmem:[%s8151_s13 + $0x50] sm:$0x1] }
 0x12e   : > { %7703 = vmatmul.mubr.bf16.vlgmr.msra.gmra.mxu1 %v6840_v22  ;;  %v4611_v37 = vrot.slane %v4609_v38, 5  ;;  %v4597_v1 = vrot.slane %v4596_v3, 4  ;;  %v4606_v19 = vor.u32 %v4605_v50, %v4601_v26  ;;  %v1501_v30 = vadd.f32 %v9068_v52, %v8892_v27  ;;  %v6877_v38 = vld [vmem:[%s8151_s13 + $0x50] sm:$0x1] }
 0x12f   : > { %7706 = vmatprep.mubr.bf16.mxu1 %v6841_v8  ;;  %v1499_v22 = vadd.f32 %v9081_v7, %v8907_v36  ;;  %v9171_v59 = vsel %vm8222_vm4, %v6914_v9, %v5406_v14  ;;  %v5408_v16 = vrot.slane %v5406_v14, 4  ;;  %v9174_v49 = vadd.f32 %v9060_v43, %v1498_v15  ;;  %v9177_v53 = vpop.f32.mrf.mxu1  ;;  %v9179_v42 = vpop.f32.mrf.mxu0  ;;  %v6876_v43 = vld [vmem:[%s8151_s13 + $0x4c] sm:$0xf]  ;;  %v6790_v9 = vld [vmem:[%s8151_s13 + $0x54] sm:$0xf] }
 0x130   : > { %v4614_v28 = vshrl.u32 %v6787_v10, 16  ;;  %v4602_v27 = vsel %vm8241_vm5, %v4597_v1, %v4601_v26  ;;  %v4607_v36 = vrot.slane %v4606_v19, 4  ;;  %v9184_v7 = vadd.f32 %v9070_v35, %v1501_v30  ;;  %v6791_v19 = vld [vmem:[%s8151_s13 + $0x58] sm:$0xf] }
 0x131   : > { %v9187_v52 = vadd.f32 %v9083_v4, %v1499_v22  ;;  %v5410_v44 = vsel %vm8222_vm4, %v5408_v16, %v5409_v57  ;;  %v4617_v34 = vshll.u32 %v6787_v10, 16  ;;  %v4623_v41 = vshll.u32 %v6788_v2, 16  ;;  %v9194_v8 = vpop.f32.mrf.mxu1  ;;  %v9196_v26 = vpop.f32.mrf.mxu0 }
 0x132   : > { %v4616_v54 = vrot.slane %v4614_v28, 4  ;;  %v10047_v35 = vcombine.low %v9088_v61, %v9105_v17  ;;  %v4612_v4 = vsel %vm8241_vm5, %v4607_v36, %v4611_v37  ;;  %v6946_v3 = vcombine.low %v9171_v59, %v5410_v44  ;;  %v6878_v44 = vld [vmem:[%s8151_s13 + $0x54] sm:$0xe] }
 0x133   : > { %v4627_v50 = vshrl.u32 %v6788_v2, 16  ;;  %v4633_v57 = vshll.u32 %v6789_v32, 16  ;;  %v6842_v10 = vcombine.low %v4602_v27, %v4612_v4  ;;  %v4619_v14 = vrot.slane %v4617_v34, 5  ;;  %v9210_v32 = vpop.f32.mrf.mxu0 }
 0x134   : > { %7751 = vmatmul.mubr.bf16.vlgmr.msra.gmra.mxu0 %v10047_v35  ;;  %v4625_v15 = vrot.slane %v4623_v41, 5  ;;  %v6915_v1 = vrot.slane %v6875_v20, 9  ;;  %v5413_v61 = vrot.slane %v6876_v43, 5  ;;  %v5416_v17 = vrot.slane %v6877_v38, 5  ;;  %v6792_v20 = vld [vmem:[%s8151_s13 + $0x5c] sm:$0x1] }
 0x135   : > { %7754 = vmatprep.mubr.bf16.mxu0 %v6945_v29  ;;  %v4629_v30 = vrot.slane %v4627_v50, 4  ;;  %v4635_v22 = vrot.slane %v4633_v57, 5  ;;  %v4620_v16 = vor.u32 %v4619_v14, %v4616_v54  ;;  %v1504_v37 = vadd.f32 %v9096_v13, %v8917_v47  ;;  %v9208_v29 = vpop.f32.mrf.mxu1  ;;  %v6879_v41 = vld [vmem:[%s8151_s13 + $0x58] sm:$0xf]  ;;  %v6880_v57 = vld [vmem:[%s8151_s13 + $0x5c] sm:$0x1] }
 0x136   : > { %7707 = vmatmul.mubr.bf16.gmra.mxu1 %v6842_v10  ;;  %v4638_v2 = vshrl.u32 %v6790_v9, 16  ;;  %v4641_v59 = vshll.u32 %v6790_v9, 16  ;;  %v5414_v27 = vsel %vm8222_vm4, %v6915_v1, %v5413_v61  ;;  %v5415_v36 = vrot.slane %v5413_v61, 4 }
 0x137   : > { %v4630_v28 = vor.u32 %v4629_v30, %v4625_v15  ;;  %v4647_v43 = vshll.u32 %v6791_v19, 16  ;;  %v4621_v54 = vrot.slane %v4620_v16, 4  ;;  %v9217_v34 = vadd.f32 %v9098_v55, %v1504_v37  ;;  %v9227_v55 = vpop.f32.mrf.mxu0 }
 0x138   : > { %v4640_v47 = vrot.slane %v4638_v2, 4  ;;  %v4643_v13 = vrot.slane %v4641_v59, 5  ;;  %v5417_v35 = vsel %vm8222_vm4, %v5415_v36, %v5416_v17  ;;  %v4651_v50 = vshrl.u32 %v6791_v19, 16  ;;  %v6793_v2 = vld [vmem:[%s8151_s13 + $0x60] sm:$0xf] }
 0x139   : > { %v4631_v38 = vrot.slane %v4630_v28, 4  ;;  %v4649_v4 = vrot.slane %v4647_v43, 5  ;;  %v4626_v9 = vsel %vm8241_vm5, %v4621_v54, %v4625_v15  ;;  %v6947_v10 = vcombine.low %v5414_v27, %v5417_v35  ;;  %v9225_v30 = vpop.f32.mrf.mxu1  ;;  %v9234_v36 = vpop.f32.mrf.mxu0 }
 0x13a   : > { %v4644_v14 = vor.u32 %v4643_v13, %v4640_v47  ;;  %v4657_v1 = vshll.u32 %v6792_v20, 16  ;;  %v4653_v16 = vrot.slane %v4651_v50, 4  ;;  %v6916_v37 = vrot.slane %v6878_v44, 9  ;;  %v6794_v13 = vld [vmem:[%s8151_s13 + $0x64] sm:$0xf] }
 0x13b   : > { %v4636_v61 = vsel %vm8241_vm5, %v4631_v38, %v4635_v22  ;;  %v5420_v17 = vrot.slane %v6879_v41, 5  ;;  %v5423_v28 = vrot.slane %v6880_v57, 5  ;;  %v9232_v27 = vpop.f32.mrf.mxu1  ;;  %v1502_v43 = vadd.f32 %v9112_v40, %v8929_v62  ;;  %v6795_v41 = vld [vmem:[%s8151_s13 + $0x68] sm:$0x1]  ;;  %v9250_v50 = vpop.f32.mrf.mxu0 }
 0x13c   : > { %7755 = vmatmul.mubr.bf16.gmra.mxu0 %v6946_v3  ;;  %v6843_v19 = vcombine.low %v4626_v9, %v4636_v61  ;;  %v4645_v15 = vrot.slane %v4644_v14, 4  ;;  %v4659_v59 = vrot.slane %v4657_v1, 5  ;;  %v4654_v20 = vor.u32 %v4653_v16, %v4649_v4  ;;  %v6883_v14 = vld [vmem:[%s8151_s13 + $0x68] sm:$0x1] }
 0x13d   : > { %7758 = vmatprep.mubr.bf16.mxu0 %v6947_v10  ;;  %v5421_v3 = vsel %vm8222_vm4, %v6916_v37, %v5420_v17  ;;  %v5422_v22 = vrot.slane %v5420_v17, 4  ;;  %v1505_v54 = vadd.f32 %v9124_v24, %v8938_v12  ;;  %v1503_v47 = vadd.f32 %v9141_v11, %v8953_v25  ;;  %v9248_v35 = vpop.f32.mrf.mxu1  ;;  %v6881_v12 = vld [vmem:[%s8151_s13 + $0x60] sm:$0xe]  ;;  %v6882_v24 = vld [vmem:[%s8151_s13 + $0x64] sm:$0xf] }
 0x13e   : > { %7710 = vmatprep.mubr.bf16.mxu1 %v6843_v19  ;;  %v4650_v44 = vsel %vm8241_vm5, %v4645_v15, %v4649_v4  ;;  %v4662_v38 = vshrl.u32 %v6793_v2, 16  ;;  %v4655_v57 = vrot.slane %v4654_v20, 4  ;;  %v9255_v40 = vadd.f32 %v9114_v63, %v1502_v43  ;;  %v6796_v15 = vld [vmem:[%s8151_s13 + $0x6c] sm:$0xf] }
 0x13f   : > { %v5424_v62 = vsel %vm8222_vm4, %v5422_v22, %v5423_v28  ;;  %v4665_v4 = vshll.u32 %v6793_v2, 16  ;;  %v9260_v11 = vadd.f32 %v9126_v48, %v1505_v54  ;;  %v9263_v9 = vadd.f32 %v9143_v5, %v1503_v47  ;;  %v9269_v48 = vpop.f32.mrf.mxu1  ;;  %v9271_v28 = vpop.f32.mrf.mxu0  ;;  %v6797_v22 = vld [vmem:[%s8151_s13 + $0x70] sm:$0xf] }
 0x140   : > { %v6948_v25 = vcombine.low %v5421_v3, %v5424_v62  ;;  %v4664_v10 = vrot.slane %v4662_v38, 4  ;;  %v4660_v1 = vsel %vm8241_vm5, %v4655_v57, %v4659_v59  ;;  %v4671_v63 = vshll.u32 %v6794_v13, 16 }
 0x141   : > { %10048 = vst [vmem:[#allocation21_spill] sm:$0xff] %v9263_v9  ;;  %v4667_v61 = vrot.slane %v4665_v4, 5  ;;  %v4675_v16 = vshrl.u32 %v6794_v13, 16  ;;  %v6844_v37 = vcombine.low %v4650_v44, %v4660_v1  ;;  %v4681_v17 = vshll.u32 %v6795_v41, 16  ;;  %v6798_v13 = vld [vmem:[%s8151_s13 + $0x74] sm:$0x1] }
 0x142   : > { %v6917_v2 = vrot.slane %v6881_v12, 9  ;;  %v5427_v19 = vrot.slane %v6882_v24, 5  ;;  %v4673_v20 = vrot.slane %v4671_v63, 5  ;;  %v5430_v59 = vrot.slane %v6883_v14, 5  ;;  %v6884_v4 = vld [vmem:[%s8151_s13 + $0x6c] sm:$0xe] }
 0x143   : > { %v4668_v5 = vor.u32 %v4667_v61, %v4664_v10  ;;  %v4677_v3 = vrot.slane %v4675_v16, 4  ;;  %7711 = vmatmul.mubr.bf16.gmra.mxu1 %v6844_v37  ;;  %v4683_v43 = vrot.slane %v4681_v17, 5  ;;  %v1508_v47 = vadd.f32 %v9160_v23, %v8960_v31  ;;  %v6885_v14 = vld [vmem:[%s8151_s13 + $0x70] sm:$0xf]  ;;  %v6886_v1 = vld [vmem:[%s8151_s13 + $0x74] sm:$0x1]  ;;  %v9287_v61 = vpop.f32.mrf.mxu1  ;;  %v9289_v63 = vpop.f32.mrf.mxu0 }
 0x144   : > { %7759 = vmatmul.mubr.bf16.gmra.mxu0 %v6948_v25  ;;  %v5428_v44 = vsel %vm8222_vm4, %v6917_v2, %v5427_v19  ;;  %v5429_v54 = vrot.slane %v5427_v19, 4  ;;  %v4686_v57 = vshrl.u32 %v6796_v15, 16  ;;  %v4689_v62 = vshll.u32 %v6796_v15, 16 }
 0x145   : > { %v4669_v41 = vrot.slane %v4668_v5, 4  ;;  %v4678_v38 = vor.u32 %v4677_v3, %v4673_v20  ;;  %v9283_v24 = vadd.f32 %v9162_v0, %v1508_v47  ;;  %v4695_v25 = vshll.u32 %v6797_v22, 16  ;;  %v9293_v15 = vpop.f32.mrf.mxu1  ;;  %v9295_v5 = vpop.f32.mrf.mxu0 }
 0x146   : > { %v5431_v12 = vsel %vm8222_vm4, %v5429_v54, %v5430_v59  ;;  %v4699_v10 = vshrl.u32 %v6797_v22, 16  ;;  %v4688_v37 = vrot.slane %v4686_v57, 4  ;;  %v4691_v17 = vrot.slane %v4689_v62, 5 }
 0x147   : > { %10049 = vst [vmem:[#allocation22_spill] sm:$0xff] %v9283_v24  ;;  %v4674_v31 = vsel %vm8241_vm5, %v4669_v41, %v4673_v20  ;;  %v4679_v23 = vrot.slane %v4678_v38, 4  ;;  %v6949_v16 = vcombine.low %v5428_v44, %v5431_v12  ;;  %v4697_v2 = vrot.slane %v4695_v25, 5  ;;  %v6799_v20 = vld [vmem:[%s8151_s13 + $0x78] sm:$0xf]  ;;  %v9300_v57 = vpop.f32.mrf.mxu1 }
 0x148   : > { %v4701_v19 = vrot.slane %v4699_v10, 4  ;;  %v4705_v0 = vshll.u32 %v6798_v13, 16  ;;  %v6918_v59 = vrot.slane %v6884_v4, 9  ;;  %v5434_v22 = vrot.slane %v6885_v14, 5  ;;  %v9302_v13 = vpop.f32.mrf.mxu0  ;;  %v6800_v25 = vld [vmem:[%s8151_s13 + $0x7c] sm:$0xf] }
 0x149   : > { %v4684_v3 = vsel %vm8241_vm5, %v4679_v23, %v4683_v43  ;;  %7762 = vmatprep.mubr.bf16.mxu0 %v6949_v16  ;;  %v5437_v54 = vrot.slane %v6886_v1, 5  ;;  %v4692_v47 = vor.u32 %v4691_v17, %v4688_v37  ;;  %v1506_v4 = vadd.f32 %v9177_v53, %v8967_v45  ;;  %v6887_v53 = vld [vmem:[%s8151_s13 + $0x78] sm:$0xe] }
 0x14a   : > { %v6845_v44 = vcombine.low %v4674_v31, %v4684_v3  ;;  %v4702_v41 = vor.u32 %v4701_v19, %v4697_v2  ;;  %v4707_v38 = vrot.slane %v4705_v0, 5  ;;  %v5435_v62 = vsel %vm8222_vm4, %v6918_v59, %v5434_v22  ;;  %v6801_v31 = vld [vmem:[%s8151_s13 + $0x80] sm:$0x1]  ;;  %v9334_v3 = vpop.f32.mrf.mxu0 }
 0x14b   : > { %v5436_v43 = vrot.slane %v5434_v22, 4  ;;  %v1509_v12 = vadd.f32 %v9194_v8, %v8973_v58  ;;  %v4693_v10 = vrot.slane %v4692_v47, 4  ;;  %v1507_v1 = vadd.f32 %v9208_v29, %v8988_v21  ;;  %v6888_v8 = vld [vmem:[%s8151_s13 + $0x7c] sm:$0xf]  ;;  %v6889_v0 = vld [vmem:[%s8151_s13 + $0x80] sm:$0x1] }
 0x14c   : > { %7714 = vmatprep.mubr.bf16.mxu1 %v6845_v44  ;;  %v4703_v14 = vrot.slane %v4702_v41, 4  ;;  %v4710_v23 = vshrl.u32 %v6799_v20, 16  ;;  %v9317_v37 = vadd.f32 %v9179_v42, %v1506_v4  ;;  %v4713_v58 = vshll.u32 %v6799_v20, 16  ;;  %v9332_v42 = vpop.f32.mrf.mxu1  ;;  %v6802_v41 = vld [vmem:[%s8151_s13 + $0x84] sm:$0xf] }
 0x14d   : > { %v5438_v16 = vsel %vm8222_vm4, %v5436_v43, %v5437_v54  ;;  %v9320_v45 = vadd.f32 %v9196_v26, %v1509_v12  ;;  %v4698_v17 = vsel %vm8241_vm5, %v4693_v10, %v4697_v2  ;;  %v9329_v19 = vadd.f32 %v9210_v32, %v1507_v1  ;;  %v6803_v4 = vld [vmem:[%s8151_s13 + $0x88] sm:$0xf]  ;;  %v6804_v1 = vld [vmem:[%s8151_s13 + $0x8c] sm:$0x1] }
 0x14e   : > { %10050 = vst [vmem:[#allocation23_spill] sm:$0xff] %v9317_v37  ;;  %v4708_v21 = vsel %vm8241_vm5, %v4703_v14, %v4707_v38  ;;  %v6950_v29 = vcombine.low %v5435_v62, %v5438_v16  ;;  %v4712_v59 = vrot.slane %v4710_v23, 4  ;;  %v4715_v22 = vrot.slane %v4713_v58, 5 }
 0x14f   : > { %10051 = vst [vmem:[#allocation24_spill] sm:$0xff] %v9320_v45  ;;  %10052 = vst [vmem:[#allocation25_spill] sm:$0xff] %v9329_v19  ;;  %v6846_v26 = vcombine.low %v4698_v17, %v4708_v21  ;;  %v4719_v54 = vshll.u32 %v6800_v25, 16  ;;  %v4723_v2 = vshrl.u32 %v6800_v25, 16  ;;  %v4729_v20 = vshll.u32 %v6801_v31, 16  ;;  %v9343_v31 = vpop.f32.mrf.mxu1  ;;  %v9345_v23 = vpop.f32.mrf.mxu0 }
 0x150   : > { %7763 = vmatmul.mubr.bf16.gmra.mxu0 %v6950_v29  ;;  %v6919_v44 = vrot.slane %v6887_v53, 9  ;;  %v5441_v47 = vrot.slane %v6888_v8, 5  ;;  %v4716_v32 = vor.u32 %v4715_v22, %v4712_v59  ;;  %v5444_v62 = vrot.slane %v6889_v0, 5  ;;  %v6891_v0 = vld [vmem:[%s8151_s13 + $0x88] sm:$0xf] }
 0x151   : > { %7715 = vmatmul.mubr.bf16.gmra.mxu1 %v6846_v26  ;;  %v4721_v38 = vrot.slane %v4719_v54, 5  ;;  %v1512_v43 = vadd.f32 %v9225_v30, %v8830_v33  ;;  %v4725_v12 = vrot.slane %v4723_v2, 4  ;;  %v4731_v10 = vrot.slane %v4729_v20, 5  ;;  %v6890_v30 = vld [vmem:[%s8151_s13 + $0x84] sm:$0xe]  ;;  %v9355_v59 = vpop.f32.mrf.mxu1  ;;  %v9357_v22 = vpop.f32.mrf.mxu0 }
 0x152   : > { %v5442_v25 = vsel %vm8222_vm4, %v6919_v44, %v5441_v47  ;;  %v5443_v14 = vrot.slane %v5441_v47, 4  ;;  %v4717_v16 = vrot.slane %v4716_v32, 4  ;;  %v4734_v53 = vshrl.u32 %v6802_v41, 16  ;;  %v6892_v26 = vld [vmem:[%s8151_s13 + $0x8c] sm:$0x1] }
 0x153   : > { %v9348_v58 = vadd.f32 %v9227_v55, %v1512_v43  ;;  %v4737_v33 = vshll.u32 %v6802_v41, 16  ;;  %v4726_v8 = vor.u32 %v4725_v12, %v4721_v38  ;;  %v4743_v21 = vshll.u32 %v6803_v4, 16  ;;  %v9363_v43 = vpop.f32.mrf.mxu0 }
 0x154   : > { %v5445_v17 = vsel %vm8222_vm4, %v5443_v14, %v5444_v62  ;;  %v4747_v29 = vshrl.u32 %v6803_v4, 16  ;;  %v4722_v54 = vsel %vm8241_vm5, %v4717_v16, %v4721_v38  ;;  %v4736_v2 = vrot.slane %v4734_v53, 4  ;;  %v9361_v62 = vpop.f32.mrf.mxu1 }
 0x155   : > { %10053 = vst [vmem:[#allocation26_spill] sm:$0xff] %v9348_v58  ;;  %v6951_v55 = vcombine.low %v5442_v25, %v5445_v17  ;;  %v4739_v20 = vrot.slane %v4737_v33, 5  ;;  %v4727_v44 = vrot.slane %v4726_v8, 4  ;;  %v4745_v47 = vrot.slane %v4743_v21, 5 }
 0x156   : > { %v4749_v41 = vrot.slane %v4747_v29, 4  ;;  %v4753_v32 = vshll.u32 %v6804_v1, 16  ;;  %v6920_v12 = vrot.slane %v6890_v30, 9  ;;  %v5448_v14 = vrot.slane %v6891_v0, 5  ;;  %v6805_v1 = vld [vmem:[%s8151_s13 + $0x90] sm:$0xf] }
 0x157   : > { %7766 = vmatprep.mubr.bf16.mxu0 %v6951_v55  ;;  %v4740_v4 = vor.u32 %v4739_v20, %v4736_v2  ;;  %v5451_v58 = vrot.slane %v6892_v26, 5  ;;  %v4732_v38 = vsel %vm8241_vm5, %v4727_v44, %v4731_v10  ;;  %v1510_v53 = vadd.f32 %v9232_v27, %v8837_v39  ;;  %v6806_v39 = vld [vmem:[%s8151_s13 + $0x94] sm:$0xf]  ;;  %v6807_v27 = vld [vmem:[%s8151_s13 + $0x98] sm:$0x1]  ;;  %v9381_v26 = vpop.f32.mrf.mxu1 }
 0x158   : > { %v4750_v25 = vor.u32 %v4749_v41, %v4745_v47  ;;  %v4755_v16 = vrot.slane %v4753_v32, 5  ;;  %v6847_v33 = vcombine.low %v4722_v54, %v4732_v38  ;;  %v5449_v17 = vsel %vm8222_vm4, %v6920_v12, %v5448_v14  ;;  %v9383_v54 = vpop.f32.mrf.mxu0  ;;  %v6895_v32 = vld [vmem:[%s8151_s13 + $0x98] sm:$0x1] }
 0x159   : > { %v4741_v8 = vrot.slane %v4740_v4, 4  ;;  %v5450_v30 = vrot.slane %v5448_v14, 4  ;;  %v9373_v29 = vadd.f32 %v9234_v36, %v1510_v53  ;;  %v1513_v10 = vadd.f32 %v9248_v35, %v8849_v51  ;;  %v6893_v51 = vld [vmem:[%s8151_s13 + $0x90] sm:$0xe]  ;;  %v6894_v35 = vld [vmem:[%s8151_s13 + $0x94] sm:$0xf] }
 0x15a   : > { %v4751_v21 = vrot.slane %v4750_v25, 4  ;;  %v1511_v0 = vadd.f32 %v9269_v48, %v8860_v60  ;;  %7718 = vmatprep.mubr.bf16.mxu1 %v6847_v33  ;;  %v4758_v2 = vshrl.u32 %v6805_v1, 16  ;;  %v4761_v20 = vshll.u32 %v6805_v1, 16 }
 0x15b   : > { %10054 = vst [vmem:[#allocation27_spill] sm:$0xff] %v9373_v29  ;;  %v4746_v55 = vsel %vm8241_vm5, %v4741_v8, %v4745_v47  ;;  %v5452_v36 = vsel %vm8222_vm4, %v5450_v30, %v5451_v58  ;;  %v9394_v44 = vadd.f32 %v9250_v50, %v1513_v10  ;;  %v4767_v12 = vshll.u32 %v6806_v39, 16  ;;  %v9401_v1 = vpop.f32.mrf.mxu1  ;;  %v9403_v50 = vpop.f32.mrf.mxu0  ;;  %v6809_v30 = vld [vmem:[%s8151_s13 + $0xa0] sm:$0xf] }
 0x15c   : > { %v4756_v60 = vsel %vm8241_vm5, %v4751_v21, %v4755_v16  ;;  %v6952_v48 = vcombine.low %v5449_v17, %v5452_v36  ;;  %v9397_v41 = vadd.f32 %v9271_v28, %v1511_v0  ;;  %v4760_v4 = vrot.slane %v4758_v2, 4  ;;  %v6808_v16 = vld [vmem:[%s8151_s13 + $0x9c] sm:$0xf] }
 0x15d   : > { %10055 = vst [vmem:[#allocation28_spill] sm:$0xff] %v9394_v44  ;;  %v6848_v47 = vcombine.low %v4746_v55, %v4756_v60  ;;  %v4763_v58 = vrot.slane %v4761_v20, 5  ;;  %v4771_v14 = vshrl.u32 %v6806_v39, 16  ;;  %v4777_v38 = vshll.u32 %v6807_v27, 16  ;;  %v6810_v27 = vld [vmem:[%s8151_s13 + $0xa4] sm:$0x1]  ;;  %v9411_v55 = vpop.f32.mrf.mxu1  ;;  %v9413_v36 = vpop.f32.mrf.mxu0 }
 0x15e   : > { %10056 = vst [vmem:[#allocation29_spill] sm:$0xff] %v9397_v41  ;;  %7767 = vmatmul.mubr.bf16.gmra.mxu0 %v6952_v48  ;;  %v6921_v25 = vrot.slane %v6893_v51, 9  ;;  %v5455_v53 = vrot.slane %v6894_v35, 5  ;;  %v4769_v33 = vrot.slane %v4767_v12, 5  ;;  %v5458_v8 = vrot.slane %v6895_v32, 5 }
 0x15f   : > { %7719 = vmatmul.mubr.bf16.gmra.mxu1 %v6848_v47  ;;  %v4764_v28 = vor.u32 %v4763_v58, %v4760_v4  ;;  %v1516_v17 = vadd.f32 %v9287_v61, %v8872_v6  ;;  %v4773_v21 = vrot.slane %v4771_v14, 4  ;;  %v4779_v10 = vrot.slane %v4777_v38, 5  ;;  %v6896_v61 = vld [vmem:[%s8151_s13 + $0x9c] sm:$0xe]  ;;  %v6897_v47 = vld [vmem:[%s8151_s13 + $0xa0] sm:$0xf]  ;;  %v9423_v58 = vpop.f32.mrf.mxu1  ;;  %v9425_v12 = vpop.f32.mrf.mxu0 }
 0x160   : > { %v5456_v0 = vsel %vm8222_vm4, %v6921_v25, %v5455_v53  ;;  %v5457_v39 = vrot.slane %v5455_v53, 4  ;;  %v4782_v51 = vshrl.u32 %v6808_v16, 16  ;;  %v4785_v6 = vshll.u32 %v6808_v16, 16  ;;  %v6898_v4 = vld [vmem:[%s8151_s13 + $0xa4] sm:$0x1] }
 0x161   : > { %v4765_v2 = vrot.slane %v4764_v28, 4  ;;  %v9416_v20 = vadd.f32 %v9289_v63, %v1516_v17  ;;  %v4774_v35 = vor.u32 %v4773_v21, %v4769_v33  ;;  %v4791_v48 = vshll.u32 %v6809_v30, 16  ;;  %v9431_v41 = vpop.f32.mrf.mxu0 }
 0x162   : > { %v5459_v60 = vsel %vm8222_vm4, %v5457_v39, %v5458_v8  ;;  %v4795_v32 = vshrl.u32 %v6809_v30, 16  ;;  %v4784_v38 = vrot.slane %v4782_v51, 4  ;;  %v4787_v25 = vrot.slane %v4785_v6, 5  ;;  %v9429_v8 = vpop.f32.mrf.mxu1 }
 0x163   : > { %10057 = vst [vmem:[#allocation30_spill] sm:$0xff] %v9416_v20  ;;  %v4770_v14 = vsel %vm8241_vm5, %v4765_v2, %v4769_v33  ;;  %v6953_v63 = vcombine.low %v5456_v0, %v5459_v60  ;;  %v4775_v53 = vrot.slane %v4774_v35, 4  ;;  %v4793_v16 = vrot.slane %v4791_v48, 5 }
 0x164   : > { %v4797_v28 = vrot.slane %v4795_v32, 4  ;;  %v4801_v17 = vshll.u32 %v6810_v27, 16  ;;  %v4788_v30 = vor.u32 %v4787_v25, %v4784_v38  ;;  %v6922_v21 = vrot.slane %v6896_v61, 9  ;;  %v6811_v27 = vld [vmem:[%s8151_s13 + $0xa8] sm:$0xf]  ;;  %v9438_v6 = vpop.f32.mrf.mxu1 }
 0x165   : > { %7770 = vmatprep.mubr.bf16.mxu0 %v6953_v63  ;;  %v5462_v39 = vrot.slane %v6897_v47, 5  ;;  %v5465_v20 = vrot.slane %v6898_v4, 5  ;;  %v4780_v33 = vsel %vm8241_vm5, %v4775_v53, %v4779_v10  ;;  %v1514_v51 = vadd.f32 %v9293_v15, %v8886_v18  ;;  %v10059_v10 = vld [vmem:[#allocation6_spill] sm:$0xff]  ;;  %v10060_v63 = vld [vmem:[#allocation7_spill] sm:$0xff] }
 0x166   : > { %v4798_v0 = vor.u32 %v4797_v28, %v4793_v16  ;;  %v4803_v2 = vrot.slane %v4801_v17, 5  ;;  %v6849_v35 = vcombine.low %v4770_v14, %v4780_v33  ;;  %v4789_v61 = vrot.slane %v4788_v30, 4  ;;  %v6812_v15 = vld [vmem:[%s8151_s13 + $0xac] sm:$0xf]  ;;  %v6813_v14 = vld [vmem:[%s8151_s13 + $0xb0] sm:$0x1]  ;;  %v9451_v38 = vpop.f32.mrf.mxu1 }
 0x167   : > { %v5463_v60 = vsel %vm8222_vm4, %v6922_v21, %v5462_v39  ;;  %v5464_v48 = vrot.slane %v5462_v39, 4  ;;  %v9443_v47 = vadd.f32 %v9295_v5, %v1514_v51  ;;  %v1517_v4 = vadd.f32 %v9300_v57, %v10059_v10  ;;  %v6899_v17 = vld [vmem:[%s8151_s13 + $0xa8] sm:$0xe]  ;;  %v6900_v30 = vld [vmem:[%s8151_s13 + $0xac] sm:$0xf]  ;;  %v9459_v57 = vpop.f32.mrf.mxu0 }
 0x168   : > { %v4799_v32 = vrot.slane %v4798_v0, 4  ;;  %v1515_v18 = vadd.f32 %v9332_v42, %v10060_v63  ;;  %7722 = vmatprep.mubr.bf16.mxu1 %v6849_v35  ;;  %v4794_v25 = vsel %vm8241_vm5, %v4789_v61, %v4793_v16  ;;  %v4806_v5 = vshrl.u32 %v6811_v27, 16  ;;  %v6901_v16 = vld [vmem:[%s8151_s13 + $0xb0] sm:$0x1]  ;;  %v9470_v0 = vpop.f32.mrf.mxu1 }
 0x169   : > { %10058 = vst [vmem:[#allocation31_spill] sm:$0xff] %v9443_v47  ;;  %v5466_v53 = vsel %vm8222_vm4, %v5464_v48, %v5465_v20  ;;  %v4809_v28 = vshll.u32 %v6811_v27, 16  ;;  %v9464_v39 = vadd.f32 %v9302_v13, %v1517_v4  ;;  %v4815_v35 = vshll.u32 %v6812_v15, 16  ;;  %v9472_v61 = vpop.f32.mrf.mxu0 }
 0x16a   : > { %v4804_v42 = vsel %vm8241_vm5, %v4799_v32, %v4803_v2  ;;  %v6954_v21 = vcombine.low %v5463_v60, %v5466_v53  ;;  %v9467_v33 = vadd.f32 %v9334_v3, %v1515_v18  ;;  %v4808_v51 = vrot.slane %v4806_v5, 4  ;;  %v6814_v32 = vld [vmem:[%s8151_s13 + $0xb4] sm:$0xf]  ;;  %v9475_v10 = vpop.f32.mrf.mxu1  ;;  %v6815_v53 = vld [vmem:[%s8151_s13 + $0xb8] sm:$0xf] }
 0x16b   : > { %10061 = vst [vmem:[#allocation6_spill] sm:$0xff] %v9464_v39  ;;  %v6850_v20 = vcombine.low %v4794_v25, %v4804_v42  ;;  %v4811_v27 = vrot.slane %v4809_v28, 5  ;;  %v4819_v2 = vshrl.u32 %v6812_v15, 16  ;;  %v4825_v48 = vshll.u32 %v6813_v14, 16  ;;  %v10063_v18 = vld [vmem:[#allocation8_spill] sm:$0xff]  ;;  %v9480_v5 = vpop.f32.mrf.mxu0 }
 0x16c   : > { %10062 = vst [vmem:[#allocation7_spill] sm:$0xff] %v9467_v33  ;;  %7771 = vmatmul.mubr.bf16.gmra.mxu0 %v6954_v21  ;;  %v6923_v60 = vrot.slane %v6899_v17, 9  ;;  %v5469_v13 = vrot.slane %v6900_v30, 5  ;;  %v4817_v4 = vrot.slane %v4815_v35, 5  ;;  %v5472_v63 = vrot.slane %v6901_v16, 5  ;;  %v9485_v42 = vpop.f32.mrf.mxu1 }
 0x16d   : > { %7723 = vmatmul.mubr.bf16.gmra.mxu1 %v6850_v20  ;;  %v4812_v3 = vor.u32 %v4811_v27, %v4808_v51  ;;  %v1520_v25 = vadd.f32 %v9343_v31, %v10063_v18  ;;  %v4821_v28 = vrot.slane %v4819_v2, 4  ;;  %v4827_v15 = vrot.slane %v4825_v48, 5  ;;  %v6816_v30 = vld [vmem:[%s8151_s13 + $0xbc] sm:$0x1]  ;;  %v6902_v51 = vld [vmem:[%s8151_s13 + $0xb4] sm:$0xe]  ;;  %v9491_v27 = vpop.f32.mrf.mxu0 }
 0x16e   : > { %v5470_v14 = vsel %vm8222_vm4, %v6923_v60, %v5469_v13  ;;  %v5471_v17 = vrot.slane %v5469_v13, 4  ;;  %v4830_v20 = vshrl.u32 %v6814_v32, 16  ;;  %v4833_v31 = vshll.u32 %v6814_v32, 16  ;;  %v6903_v60 = vld [vmem:[%s8151_s13 + $0xb8] sm:$0xf]  ;;  %v9497_v33 = vpop.f32.mrf.mxu1 }
 0x16f   : > { %v4813_v21 = vrot.slane %v4812_v3, 4  ;;  %v9488_v16 = vadd.f32 %v9345_v23, %v1520_v25  ;;  %v4822_v35 = vor.u32 %v4821_v28, %v4817_v4  ;;  %v4839_v48 = vshll.u32 %v6815_v53, 16  ;;  %v6904_v13 = vld [vmem:[%s8151_s13 + $0xbc] sm:$0x1]  ;;  %v9503_v19 = vpop.f32.mrf.mxu0 }
 0x170   : > { %v5473_v2 = vsel %vm8222_vm4, %v5471_v17, %v5472_v63  ;;  %v4843_v18 = vshrl.u32 %v6815_v53, 16  ;;  %v4832_v25 = vrot.slane %v4830_v20, 4  ;;  %v4849_v28 = vshll.u32 %v6816_v30, 16  ;;  %v9501_v44 = vpop.f32.mrf.mxu1  ;;  %v10065_v20 = vld [vmem:[#allocation9_spill] sm:$0xff]  ;;  %v6817_v30 = vld [vmem:[%s8151_s13 + $0xc0] sm:$0xf] }
 0x171   : > { %10064 = vst [vmem:[#allocation8_spill] sm:$0xff] %v9488_v16  ;;  %v4818_v3 = vsel %vm8241_vm5, %v4813_v21, %v4817_v4  ;;  %v6955_v23 = vcombine.low %v5470_v14, %v5473_v2  ;;  %v4835_v16 = vrot.slane %v4833_v31, 5  ;;  %v4823_v32 = vrot.slane %v4822_v35, 4 }
 0x172   : > { %v4841_v39 = vrot.slane %v4839_v48, 5  ;;  %v4845_v47 = vrot.slane %v4843_v18, 4  ;;  %v6924_v53 = vrot.slane %v6902_v51, 9  ;;  %v5476_v17 = vrot.slane %v6903_v60, 5  ;;  %v9510_v35 = vpop.f32.mrf.mxu1  ;;  %v9514_v18 = vpop.f32.mrf.mxu0  ;;  %v10067_v60 = vld [vmem:[#allocation10_spill] sm:$0xff] }
 0x173   : > { %7774 = vmatprep.mubr.bf16.mxu0 %v6955_v23  ;;  %v4836_v63 = vor.u32 %v4835_v16, %v4832_v25  ;;  %v5479_v29 = vrot.slane %v6904_v13, 5  ;;  %v4828_v4 = vsel %vm8241_vm5, %v4823_v32, %v4827_v15  ;;  %v4851_v21 = vrot.slane %v4849_v28, 5  ;;  %v10068_v13 = vld [vmem:[#allocation11_spill] sm:$0xff] }
 0x174   : > { %v4846_v14 = vor.u32 %v4845_v47, %v4841_v39  ;;  %v1518_v31 = vadd.f32 %v9355_v59, %v10065_v20  ;;  %v6851_v2 = vcombine.low %v4818_v3, %v4828_v4  ;;  %v5477_v51 = vsel %vm8222_vm4, %v6924_v53, %v5476_v17  ;;  %v6818_v3 = vld [vmem:[%s8151_s13 + $0xc4] sm:$0xf]  ;;  %v6819_v25 = vld [vmem:[%s8151_s13 + $0xc8] sm:$0x1]  ;;  %v9525_v32 = vpop.f32.mrf.mxu1 }
 0x175   : > { %v4837_v16 = vrot.slane %v4836_v63, 4  ;;  %v5478_v48 = vrot.slane %v5476_v17, 4  ;;  %v1521_v59 = vadd.f32 %v9361_v62, %v10067_v60  ;;  %v1519_v23 = vadd.f32 %v9381_v26, %v10068_v13  ;;  %v6905_v17 = vld [vmem:[%s8151_s13 + $0xc0] sm:$0xe]  ;;  %v6906_v4 = vld [vmem:[%s8151_s13 + $0xc4] sm:$0xf]  ;;  %v9533_v62 = vpop.f32.mrf.mxu0 }
 0x176   : > { %v4847_v15 = vrot.slane %v4846_v14, 4  ;;  %v9517_v47 = vadd.f32 %v9357_v22, %v1518_v31  ;;  %7726 = vmatprep.mubr.bf16.mxu1 %v6851_v2  ;;  %v4854_v22 = vshrl.u32 %v6817_v30, 16  ;;  %v4857_v53 = vshll.u32 %v6817_v30, 16  ;;  %v9544_v2 = vpop.f32.mrf.mxu1 }
 0x177   : > { %v4842_v28 = vsel %vm8241_vm5, %v4837_v16, %v4841_v39  ;;  %v5480_v63 = vsel %vm8222_vm4, %v5478_v48, %v5479_v29  ;;  %v9538_v20 = vadd.f32 %v9363_v43, %v1521_v59  ;;  %v9541_v31 = vadd.f32 %v9383_v54, %v1519_v23  ;;  %v6907_v39 = vld [vmem:[%s8151_s13 + $0xc8] sm:$0x1]  ;;  %v9546_v60 = vpop.f32.mrf.mxu0  ;;  %v6820_v59 = vld [vmem:[%s8151_s13 + $0xcc] sm:$0xf] }
 0x178   : > { %10066 = vst [vmem:[#allocation9_spill] sm:$0xff] %v9517_v47  ;;  %v4852_v26 = vsel %vm8241_vm5, %v4847_v15, %v4851_v21  ;;  %v6956_v14 = vcombine.low %v5477_v51, %v5480_v63  ;;  %v4856_v30 = vrot.slane %v4854_v22, 4  ;;  %v4859_v16 = vrot.slane %v4857_v53, 5  ;;  %v9549_v13 = vpop.f32.mrf.mxu1  ;;  %v10072_v63 = vld [vmem:[#allocation12_spill] sm:$0xff] }
 0x179   : > { %10069 = vst [vmem:[#allocation10_spill] sm:$0xff] %v9538_v20  ;;  %10070 = vst [vmem:[#allocation11_spill] sm:$0xff] %v9541_v31  ;;  %v6852_v29 = vcombine.low %v4842_v28, %v4852_v26  ;;  %v4863_v48 = vshll.u32 %v6818_v3, 16  ;;  %v4867_v21 = vshrl.u32 %v6818_v3, 16  ;;  %v4873_v51 = vshll.u32 %v6819_v25, 16 }
 0x17a   : > { %7775 = vmatmul.mubr.bf16.gmra.mxu0 %v6956_v14  ;;  %v6925_v15 = vrot.slane %v6905_v17, 9  ;;  %v5483_v43 = vrot.slane %v6906_v4, 5  ;;  %10071 = vst [vmem:[#allocation32_spill] sm:$0xff] %v9549_v13  ;;  %v4860_v54 = vor.u32 %v4859_v16, %v4856_v30  ;;  %v5486_v28 = vrot.slane %v6907_v39, 5  ;;  %v6821_v53 = vld [vmem:[%s8151_s13 + $0xd0] sm:$0xf]  ;;  %v9557_v4 = vpop.f32.mrf.mxu0 }
 0x17b   : > { %7727 = vmatmul.mubr.bf16.gmra.mxu1 %v6852_v29  ;;  %v4865_v23 = vrot.slane %v4863_v48, 5  ;;  %v1524_v22 = vadd.f32 %v9401_v1, %v10072_v63  ;;  %v4869_v26 = vrot.slane %v4867_v21, 4  ;;  %v4875_v14 = vrot.slane %v4873_v51, 5  ;;  %v6822_v17 = vld [vmem:[%s8151_s13 + $0xd4] sm:$0x1]  ;;  %v9559_v29 = vpop.f32.mrf.mxu1 }
 0x17c   : > { %v5484_v3 = vsel %vm8222_vm4, %v6925_v15, %v5483_v43  ;;  %v5485_v25 = vrot.slane %v5483_v43, 4  ;;  %10073 = vst [vmem:[#allocation12_spill] sm:$0xff] %v9559_v29  ;;  %v4861_v30 = vrot.slane %v4860_v54, 4  ;;  %v4878_v16 = vshrl.u32 %v6820_v59, 16  ;;  %v6908_v48 = vld [vmem:[%s8151_s13 + $0xcc] sm:$0xe]  ;;  %v9569_v20 = vpop.f32.mrf.mxu0 }
 0x17d   : > { %v9562_v39 = vadd.f32 %v9403_v50, %v1524_v22  ;;  %v4881_v1 = vshll.u32 %v6820_v59, 16  ;;  %v4870_v21 = vor.u32 %v4869_v26, %v4865_v23  ;;  %v4887_v63 = vshll.u32 %v6821_v53, 16  ;;  %v6909_v15 = vld [vmem:[%s8151_s13 + $0xd0] sm:$0xf]  ;;  %v6910_v43 = vld [vmem:[%s8151_s13 + $0xd4] sm:$0x1]  ;;  %v9571_v47 = vpop.f32.mrf.mxu1 }
 0x17e   : > { %v5487_v51 = vsel %vm8222_vm4, %v5485_v25, %v5486_v28  ;;  %v4891_v31 = vshrl.u32 %v6821_v53, 16  ;;  %10075 = vst [vmem:[#allocation34_spill] sm:$0xff] %v9571_v47  ;;  %v4866_v54 = vsel %vm8241_vm5, %v4861_v30, %v4865_v23  ;;  %v4880_v22 = vrot.slane %v4878_v16, 4  ;;  %v9575_v24 = vpop.f32.mrf.mxu0 }
 0x17f   : > { %10074 = vst [vmem:[#allocation33_spill] sm:$0xff] %v9562_v39  ;;  %v6957_v50 = vcombine.low %v5484_v3, %v5487_v51  ;;  %v4883_v39 = vrot.slane %v4881_v1, 5  ;;  %v4871_v59 = vrot.slane %v4870_v21, 4  ;;  %v4889_v45 = vrot.slane %v4887_v63, 5  ;;  %v2463_v28 = vpop.f32.mrf.mxu1  ;;  %v10076_v3 = vld [vmem:[#allocation13_spill] sm:$0xff]  ;;  %v10077_v63 = vld [vmem:[#allocation14_spill] sm:$0xff] }
 0x180   : > { %v4893_v26 = vrot.slane %v4891_v31, 4  ;;  %v4897_v37 = vshll.u32 %v6822_v17, 16  ;;  %v6926_v25 = vrot.slane %v6908_v48, 9  ;;  %v5490_v29 = vrot.slane %v6909_v15, 5  ;;  %v3268_v16 = vpop.f32.mrf.mxu0  ;;  %v10078_v15 = vld [vmem:[#allocation15_spill] sm:$0xff] }
 0x181   : > { %7778 = vmatprep.mubr.bf16.mxu0 %v6957_v50  ;;  %v4884_v53 = vor.u32 %v4883_v39, %v4880_v22  ;;  %v5493_v9 = vrot.slane %v6910_v43, 5  ;;  %v4876_v47 = vsel %vm8241_vm5, %v4871_v59, %v4875_v14  ;;  %v1522_v30 = vadd.f32 %v9411_v55, %v10076_v3  ;;  %v7525_v1 = vpop.f32.mrf.mxu1 }
 0x182   : > { %v4894_v13 = vor.u32 %v4893_v26, %v4889_v45  ;;  %v4899_v23 = vrot.slane %v4897_v37, 5  ;;  %v6853_v31 = vcombine.low %v4866_v54, %v4876_v47  ;;  %v5491_v21 = vsel %vm8222_vm4, %v6926_v25, %v5490_v29  ;;  %v10079_v54 = vld [vmem:[#allocation16_spill] sm:$0xff]  ;;  %v10082_v26 = vld [vmem:[#allocation19_spill] sm:$0xff] }
 0x183   : > { %v4885_v17 = vrot.slane %v4884_v53, 4  ;;  %v5492_v51 = vrot.slane %v5490_v29, 4  ;;  %v9584_v48 = vadd.f32 %v9413_v36, %v1522_v30  ;;  %v1525_v14 = vadd.f32 %v9423_v58, %v10077_v63  ;;  %v2466_v43 = vpop.f32.mrf.mxu1  ;;  %v10080_v29 = vld [vmem:[#allocation17_spill] sm:$0xff]  ;;  %v10083_v53 = vld [vmem:[#allocation20_spill] sm:$0xff]  ;;  %v10087_v30 = vld [vmem:[#allocation22_spill] sm:$0xff] }
 0x184   : > { %v4895_v39 = vrot.slane %v4894_v13, 4  ;;  %v1523_v37 = vadd.f32 %v9429_v8, %v10078_v15  ;;  %7730 = vmatprep.mubr.bf16.mxu1 %v6853_v31  ;;  %v2544_v13 = vadd.f32 %v9438_v6, %v10079_v54  ;;  %v2542_v36 = vadd.f32 %v9451_v38, %v10080_v29  ;;  %v10081_v38 = vld [vmem:[#allocation18_spill] sm:$0xff] }
 0x185   : > { %v4890_v55 = vsel %vm8241_vm5, %v4885_v17, %v4889_v45  ;;  %v5494_v47 = vsel %vm8222_vm4, %v5492_v51, %v5493_v9  ;;  %v9601_v8 = vadd.f32 %v9425_v12, %v1525_v14  ;;  %v7572_v45 = vpop.f32.mrf.mxu0  ;;  %v7528_v59 = vpop.f32.mrf.mxu1  ;;  %v2545_v56 = vadd.f32 %v9470_v0, %v10081_v38  ;;  %v10089_v17 = vld [vmem:[#allocation23_spill] sm:$0xff]  ;;  %v10090_v51 = vld [vmem:[#allocation24_spill] sm:$0xff]  ;;  %v10092_v15 = vld [vmem:[#allocation26_spill] sm:$0xff] }
 0x186   : > { %v4900_v58 = vsel %vm8241_vm5, %v4895_v39, %v4899_v23  ;;  %v6958_v50 = vcombine.low %v5491_v21, %v5494_v47  ;;  %v9604_v22 = vadd.f32 %v9431_v41, %v1523_v37  ;;  %v9607_v9 = vadd.f32 %v9459_v57, %v2544_v13 }
 0x187   : > { %v6854_v46 = vcombine.low %v4890_v55, %v4900_v58  ;;  %v9610_v6 = vadd.f32 %v9472_v61, %v2542_v36  ;;  %v2543_v12 = vadd.f32 %v9475_v10, %v10082_v26  ;;  %v2548_v41 = vadd.f32 %v9485_v42, %v10083_v53  ;;  %v3281_v23 = vpop.f32.mrf.mxu0  ;;  %v2479_v3 = vpop.f32.mrf.mxu1  ;;  %v10094_v36 = vld [vmem:[#allocation28_spill] sm:$0xff]  ;;  %v10095_v58 = vld [vmem:[#allocation29_spill] sm:$0xff] }
 0x188   : > { %7779 = vmatmul.mubr.bf16.gmra.mxu0 %v6958_v50  ;;  %v2546_v25 = vadd.f32 %v9497_v33, %v9174_v49  ;;  %v2549_v57 = vadd.f32 %v9501_v44, %v9184_v7  ;;  %v9623_v61 = vadd.f32 %v9480_v5, %v2545_v56  ;;  %v2547_v0 = vadd.f32 %v9510_v35, %v9187_v52 }
 0x189   : > { %7731 = vmatmul.mubr.bf16.gmra.mxu1 %v6854_v46  ;;  %v2552_v10 = vadd.f32 %v9525_v32, %v9217_v34  ;;  %v2550_v42 = vadd.f32 %v9544_v2, %v9255_v40  ;;  %v9632_v49 = vadd.f32 %v9491_v27, %v2543_v12  ;;  %v9635_v7 = vadd.f32 %v9503_v19, %v2548_v41  ;;  %v7573_v5 = vpop.f32.mrf.mxu0  ;;  %v7529_v52 = vpop.f32.mrf.mxu1  ;;  %v10084_v19 = vld [vmem:[#allocation32_spill] sm:$0xff]  ;;  %v10085_v32 = vld [vmem:[#allocation21_spill] sm:$0xff]  ;;  %v10098_v41 = vld [vmem:[#allocation6_spill] sm:$0xff] }
 0x18a   : > { %v9638_v44 = vadd.f32 %v9514_v18, %v2546_v25  ;;  %v9641_v33 = vadd.f32 %v9533_v62, %v2549_v57  ;;  %v9644_v35 = vadd.f32 %v9546_v60, %v2547_v0  ;;  %v2553_v27 = vadd.f32 %v10084_v19, %v9260_v11  ;;  %v10086_v18 = vld [vmem:[#allocation12_spill] sm:$0xff]  ;;  %v10088_v62 = vld [vmem:[#allocation34_spill] sm:$0xff]  ;;  %v10093_v11 = vld [vmem:[#allocation27_spill] sm:$0xff] }
 0x18b   : > { %v9647_v34 = vadd.f32 %v9557_v4, %v2552_v10  ;;  %v9650_v40 = vadd.f32 %v9569_v20, %v2550_v42  ;;  %v2551_v2 = vadd.f32 %v10086_v18, %v10085_v32  ;;  %v2556_v31 = vadd.f32 %v10088_v62, %v10087_v30  ;;  %v3284_v39 = vpop.f32.mrf.mxu0  ;;  %v2482_v63 = vpop.f32.mrf.mxu1  ;;  %v10091_v20 = vld [vmem:[#allocation25_spill] sm:$0xff]  ;;  %v10099_v0 = vld [vmem:[#allocation7_spill] sm:$0xff]  ;;  %v10100_v19 = vld [vmem:[#allocation8_spill] sm:$0xff] }
 0x18c   : > { %v2554_v21 = vadd.f32 %v2463_v28, %v10089_v17  ;;  %v2557_v60 = vadd.f32 %v7525_v1, %v10090_v51  ;;  %v9661_v4 = vadd.f32 %v9575_v24, %v2553_v27  ;;  %v2555_v14 = vadd.f32 %v2466_v43, %v10091_v20  ;;  %v10096_v43 = vld [vmem:[#allocation30_spill] sm:$0xff]  ;;  %v10103_v20 = vld [vmem:[#allocation11_spill] sm:$0xff] }
 0x18d   : > { %v2560_v37 = vadd.f32 %v7528_v59, %v10092_v15  ;;  %v2558_v55 = vadd.f32 %v2479_v3, %v10093_v11  ;;  %v9666_v47 = vadd.f32 %v3268_v16, %v2551_v2  ;;  %v9668_v54 = vadd.f32 %v7572_v45, %v2556_v31  ;;  %v7532_v1 = vpop.f32.mrf.mxu1  ;;  %v7576_v59 = vpop.f32.mrf.mxu0  ;;  %v10097_v16 = vld [vmem:[#allocation31_spill] sm:$0xff]  ;;  %v10101_v2 = vld [vmem:[#allocation9_spill] sm:$0xff] }
 0x18e   : > { %v9670_v13 = vadd.f32 %v3281_v23, %v2554_v21  ;;  %v9672_v28 = vadd.f32 %v7573_v5, %v2557_v60  ;;  %v9674_v29 = vadd.f32 %v3284_v39, %v2555_v14  ;;  %v2561_v24 = vadd.f32 %v7529_v52, %v10094_v36  ;;  %v10102_v21 = vld [vmem:[#allocation10_spill] sm:$0xff] }
 0x18f   : > { %v2559_v50 = vadd.f32 %v2482_v63, %v10095_v58  ;;  %v2564_v46 = vadd.f32 %v7532_v1, %v10096_v43  ;;  %v2495_v38 = vpop.f32.mrf.mxu1  ;;  %v9679_v56 = vadd.f32 %v7576_v59, %v2560_v37  ;;  %v3297_v26 = vpop.f32.mrf.mxu0 }
 0x190   : > { %v2562_v45 = vadd.f32 %v2495_v38, %v10097_v16  ;;  %v9682_v53 = vadd.f32 %v3297_v26, %v2558_v55  ;;  %v10104_v55 = vld [vmem:[#allocation33_spill] sm:$0xff] }
 0x191   : > { %v7533_v12 = vpop.f32.mrf.mxu1  ;;  %v7577_v57 = vpop.f32.mrf.mxu0 }
 0x192   : > { %v2565_v25 = vadd.f32 %v7533_v12, %v10098_v41  ;;  %v9685_v3 = vadd.f32 %v7577_v57, %v2561_v24 }
 0x193   : > { %v2498_v23 = vpop.f32.mrf.mxu1  ;;  %v3300_v42 = vpop.f32.mrf.mxu0 }
 0x194   : > { %v2563_v10 = vadd.f32 %v2498_v23, %v10099_v0  ;;  %v9688_v52 = vadd.f32 %v3300_v42, %v2559_v50 }
 0x195   : > { %v7536_v5 = vpop.f32.mrf.mxu1  ;;  %v7580_v18 = vpop.f32.mrf.mxu0 }
 0x196   : > { %v2568_v27 = vadd.f32 %v7536_v5, %v10100_v19  ;;  %v9692_v62 = vadd.f32 %v7580_v18, %v2564_v46 }
 0x197   : > { %v2511_v32 = vpop.f32.mrf.mxu1  ;;  %v3313_v17 = vpop.f32.mrf.mxu0 }
 0x198   : > { %v2566_v30 = vadd.f32 %v2511_v32, %v10101_v2  ;;  %v9695_v60 = vadd.f32 %v3313_v17, %v2562_v45 }
 0x199   : > { %v7537_v31 = vpop.f32.mrf.mxu1  ;;  %v7581_v63 = vpop.f32.mrf.mxu0 }
 0x19a   : > { %v2569_v51 = vadd.f32 %v7537_v31, %v10102_v21  ;;  %v9698_v15 = vadd.f32 %v7581_v63, %v2565_v25 }
 0x19b   : > { %v2514_v39 = vpop.f32.mrf.mxu1  ;;  %v3316_v11 = vpop.f32.mrf.mxu0 }
 0x19c   : > { %v2567_v14 = vadd.f32 %v2514_v39, %v10103_v20  ;;  %v9701_v36 = vadd.f32 %v3316_v11, %v2563_v10 }
 0x19d   : > { %v7540_v37 = vpop.f32.mrf.mxu1  ;;  %v7584_v58 = vpop.f32.mrf.mxu0 }
 0x19e   : > { %v2572_v1 = vadd.f32 %v7540_v37, %v10104_v55  ;;  %v9704_v43 = vadd.f32 %v7584_v58, %v2568_v27 }
 0x19f   : > { %v2527_v24 = vpop.f32.mrf.mxu1  ;;  %v3329_v59 = vpop.f32.mrf.mxu0 }
 0x1a0   : > { %v2570_v50 = vadd.f32 %v2527_v24, %v9584_v48  ;;  %v9707_v16 = vadd.f32 %v3329_v59, %v2566_v30 }
 0x1a1   : > { %v7541_v46 = vpop.f32.mrf.mxu1  ;;  %v7585_v26 = vpop.f32.mrf.mxu0 }
 0x1a2   : > { %v2573_v38 = vadd.f32 %v7541_v46, %v9601_v8  ;;  %v9710_v41 = vadd.f32 %v7585_v26, %v2569_v51 }
 0x1a3   : > { %v2530_v45 = vpop.f32.mrf.mxu1  ;;  %v3332_v25 = vpop.f32.mrf.mxu0 }
 0x1a4   : > { %v2571_v12 = vadd.f32 %v2530_v45, %v9604_v22  ;;  %v9712_v57 = vadd.f32 %v3332_v25, %v2567_v14 }
 0x1a5   : > { %v7588_v23 = vpop.f32.mrf.mxu0  ;;  %v7608_v42 = vpop.f32.mrf.mxu1 }
 0x1a6   : > { %v9714_v0 = vadd.f32 %v7588_v23, %v2572_v1  ;;  %v3956_v8 = vadd.f32 %v7608_v42, %v9607_v9 }
 0x1a7   : > { %v3345_v48 = vpop.f32.mrf.mxu0  ;;  %v3827_v27 = vpop.f32.mrf.mxu1 }
 0x1a8   : > { %v9716_v10 = vadd.f32 %v3345_v48, %v2570_v50  ;;  %v3954_v22 = vadd.f32 %v3827_v27, %v9610_v6 }
 0x1a9   : > { %v7589_v5 = vpop.f32.mrf.mxu0  ;;  %v9724_v2 = vpop.f32.mrf.mxu1 }
 0x1aa   : > { %v9719_v19 = vadd.f32 %v7589_v5, %v2573_v38 }
 0x1ab   : > { %v3348_v32 = vpop.f32.mrf.mxu0  ;;  %v9728_v17 = vpop.f32.mrf.mxu1 }
 0x1ac   : > { %v9722_v18 = vadd.f32 %v3348_v32, %v2571_v12 }
 0x1ad   : > { %v7656_v30 = vpop.f32.mrf.mxu0  ;;  %v7612_v39 = vpop.f32.mrf.mxu1 }
 0x1ae   : > { %v9726_v31 = vadd.f32 %v7656_v30, %v3956_v8  ;;  %v3960_v63 = vadd.f32 %v7612_v39, %v9635_v7 }
 0x1af   : > { %v4278_v21 = vpop.f32.mrf.mxu0  ;;  %v3843_v20 = vpop.f32.mrf.mxu1 }
 0x1b0   : > { %v9730_v51 = vadd.f32 %v4278_v21, %v3954_v22  ;;  %v3958_v6 = vadd.f32 %v3843_v20, %v9638_v44 }
 0x1b1   : > { %v9732_v9 = vpop.f32.mrf.mxu0  ;;  %v9738_v37 = vpop.f32.mrf.mxu1 }
 0x1b3   : > { %v9735_v14 = vpop.f32.mrf.mxu0  ;;  %v9742_v1 = vpop.f32.mrf.mxu1 }
 0x1b5   : > { %v7660_v11 = vpop.f32.mrf.mxu0  ;;  %v7616_v50 = vpop.f32.mrf.mxu1 }
 0x1b6   : > { %v9740_v55 = vadd.f32 %v7660_v11, %v3960_v63  ;;  %v3964_v7 = vadd.f32 %v7616_v50, %v9647_v34 }
 0x1b7   : > { %v4294_v24 = vpop.f32.mrf.mxu0  ;;  %v3859_v59 = vpop.f32.mrf.mxu1 }
 0x1b8   : > { %v9744_v58 = vadd.f32 %v4294_v24, %v3958_v6  ;;  %v3962_v44 = vadd.f32 %v3859_v59, %v9650_v40 }
 0x1b9   : > { %v9746_v46 = vpop.f32.mrf.mxu0  ;;  %v9752_v45 = vpop.f32.mrf.mxu1 }
 0x1bb   : > { %v9749_v38 = vpop.f32.mrf.mxu0  ;;  %v9756_v25 = vpop.f32.mrf.mxu1 }
 0x1bd   : > { %v7664_v26 = vpop.f32.mrf.mxu0  ;;  %v7620_v42 = vpop.f32.mrf.mxu1 }
 0x1be   : > { %v9754_v12 = vadd.f32 %v7664_v26, %v3964_v7  ;;  %v3968_v34 = vadd.f32 %v7620_v42, %v9668_v54 }
 0x1bf   : > { %v4310_v23 = vpop.f32.mrf.mxu0  ;;  %v3875_v8 = vpop.f32.mrf.mxu1 }
 0x1c0   : > { %v9758_v48 = vadd.f32 %v4310_v23, %v3962_v44  ;;  %v3966_v40 = vadd.f32 %v3875_v8, %v9670_v13 }
 0x1c1   : > { %v9760_v5 = vpop.f32.mrf.mxu0  ;;  %v7621_v32 = vpop.f32.mrf.mxu1 }
 0x1c2   : > { %v3969_v30 = vadd.f32 %v7621_v32, %v9672_v28 }
 0x1c3   : > { %v9763_v27 = vpop.f32.mrf.mxu0  ;;  %v3878_v39 = vpop.f32.mrf.mxu1 }
 0x1c4   : > { %v3967_v20 = vadd.f32 %v3878_v39, %v9674_v29 }
 0x1c5   : > { %v7668_v22 = vpop.f32.mrf.mxu0  ;;  %v7624_v11 = vpop.f32.mrf.mxu1 }
 0x1c6   : > { %v9767_v21 = vadd.f32 %v7668_v22, %v3968_v34  ;;  %v3972_v54 = vadd.f32 %v7624_v11, %v9679_v56 }
 0x1c7   : > { %v4326_v63 = vpop.f32.mrf.mxu0  ;;  %v3891_v7 = vpop.f32.mrf.mxu1 }
 0x1c8   : > { %v9770_v6 = vadd.f32 %v4326_v63, %v3966_v40  ;;  %v3970_v59 = vadd.f32 %v3891_v7, %v9682_v53 }
 0x1c9   : > { %v7669_v24 = vpop.f32.mrf.mxu0  ;;  %v7625_v28 = vpop.f32.mrf.mxu1 }
 0x1ca   : > { %v9773_v50 = vadd.f32 %v7669_v24, %v3969_v30  ;;  %v3973_v23 = vadd.f32 %v7625_v28, %v9685_v3 }
 0x1cb   : > { %v4329_v13 = vpop.f32.mrf.mxu0  ;;  %v3894_v29 = vpop.f32.mrf.mxu1 }
 0x1cc   : > { %v9776_v44 = vadd.f32 %v4329_v13, %v3967_v20  ;;  %v3971_v8 = vadd.f32 %v3894_v29, %v9688_v52 }
 0x1cd   : > { %v7672_v26 = vpop.f32.mrf.mxu0  ;;  %v7628_v56 = vpop.f32.mrf.mxu1 }
 0x1ce   : > { %v9779_v42 = vadd.f32 %v7672_v26, %v3972_v54  ;;  %v3976_v22 = vadd.f32 %v7628_v56, %v9692_v62 }
 0x1cf   : > { %v4342_v34 = vpop.f32.mrf.mxu0  ;;  %v3907_v53 = vpop.f32.mrf.mxu1 }
 0x1d0   : > { %v9782_v40 = vadd.f32 %v4342_v34, %v3970_v59  ;;  %v3974_v63 = vadd.f32 %v3907_v53, %v9695_v60 }
 0x1d1   : > { %v7673_v32 = vpop.f32.mrf.mxu0  ;;  %v7629_v3 = vpop.f32.mrf.mxu1 }
 0x1d2   : > { %v9785_v30 = vadd.f32 %v7673_v32, %v3973_v23  ;;  %v3977_v24 = vadd.f32 %v7629_v3, %v9698_v15 }
 0x1d3   : > { %v4345_v39 = vpop.f32.mrf.mxu0  ;;  %v3910_v52 = vpop.f32.mrf.mxu1 }
 0x1d4   : > { %v9788_v20 = vadd.f32 %v4345_v39, %v3971_v8  ;;  %v3975_v13 = vadd.f32 %v3910_v52, %v9701_v36 }
 0x1d5   : > { %v7676_v11 = vpop.f32.mrf.mxu0 }
 0x1d6   : > { %v9791_v54 = vadd.f32 %v7676_v11, %v3976_v22 }
 0x1d7   : > { %v4358_v7 = vpop.f32.mrf.mxu0 }
 0x1d8   : > { %v9794_v59 = vadd.f32 %v4358_v7, %v3974_v63  ;;  %v7632_v62 = vpop.f32.mrf.mxu1 }
 0x1d9   : > { %v7677_v28 = vpop.f32.mrf.mxu0  ;;  %v3980_v26 = vadd.f32 %v7632_v62, %v9704_v43 }
 0x1da   : > { %v9797_v23 = vadd.f32 %v7677_v28, %v3977_v24  ;;  %v3923_v60 = vpop.f32.mrf.mxu1 }
 0x1db   : > { %v4361_v29 = vpop.f32.mrf.mxu0  ;;  %v3978_v34 = vadd.f32 %v3923_v60, %v9707_v16 }
 0x1dc   : > { %v9800_v8 = vadd.f32 %v4361_v29, %v3975_v13  ;;  %v7633_v15 = vpop.f32.mrf.mxu1 }
 0x1dd   : > { %v3981_v32 = vadd.f32 %v7633_v15, %v9710_v41 }
 0x1de   : > { %v7680_v56 = vpop.f32.mrf.mxu0  ;;  %v3926_v36 = vpop.f32.mrf.mxu1 }
 0x1df   : > { %v9803_v22 = vadd.f32 %v7680_v56, %v3980_v26  ;;  %v3979_v39 = vadd.f32 %v3926_v36, %v9712_v57 }
 0x1e0   : > { %v4374_v53 = vpop.f32.mrf.mxu0 }
 0x1e1   : > { %v9806_v63 = vadd.f32 %v4374_v53, %v3978_v34 }
 0x1e2   : > { %v7681_v3 = vpop.f32.mrf.mxu0 }
 0x1e3   : > { %v9809_v24 = vadd.f32 %v7681_v3, %v3981_v32  ;;  %v9834_v3 = vld [vmem:[%s10021_s2] ss:$0 sm:$0xff] }
 0x1e4   : > { %v4377_v52 = vpop.f32.mrf.mxu0 }
 0x1e5   : > { %v9812_v13 = vadd.f32 %v4377_v52, %v3979_v39 }
 0x1e6   : > { %v7636_v43 = vpop.f32.mrf.mxu1  ;;  %v7684_v62 = vpop.f32.mrf.mxu0 }
 0x1e7   : > { %v3984_v11 = vadd.f32 %v7636_v43, %v9714_v0  ;;  %v3957_v0 = vadd.f32 %v9724_v2, %v9623_v61 }
 0x1e8   : > { %v3939_v16 = vpop.f32.mrf.mxu1  ;;  %v4390_v60 = vpop.f32.mrf.mxu0 }
 0x1e9   : > { %v3982_v7 = vadd.f32 %v3939_v16, %v9716_v10  ;;  %v9815_v26 = vadd.f32 %v7684_v62, %v3984_v11  ;;  %v3955_v10 = vadd.f32 %v9728_v17, %v9632_v49  ;;  %v4408_v39 = vadd.f32 %v9732_v9, %v3957_v0 }
 0x1ea   : > { %v7637_v41 = vpop.f32.mrf.mxu1  ;;  %v7685_v56 = vpop.f32.mrf.mxu0  ;;  %v3961_v62 = vadd.f32 %v9738_v37, %v9641_v33 }
 0x1eb   : > { %v3985_v28 = vadd.f32 %v7637_v41, %v9719_v19  ;;  %v9820_v34 = vadd.f32 %v4390_v60, %v3982_v7  ;;  %v4406_v49 = vadd.f32 %v9735_v14, %v3955_v10  ;;  %v3959_v14 = vadd.f32 %v9742_v1, %v9644_v35 }
 0x1ec   : > { %v3942_v57 = vpop.f32.mrf.mxu1  ;;  %v4393_v53 = vpop.f32.mrf.mxu0  ;;  %v4412_v35 = vadd.f32 %v9746_v46, %v3961_v62 }
 0x1ed   : > { %v3983_v29 = vadd.f32 %v3942_v57, %v9722_v18  ;;  %v9824_v32 = vadd.f32 %v7685_v56, %v3985_v28  ;;  %v4410_v1 = vadd.f32 %v9749_v38, %v3959_v14 }
 0x1ee   : > { %v7704_v15 = vpop.f32.mrf.mxu1 }
 0x1ef   : > { %v5225_v19 = vadd.f32 %v7704_v15, %v9726_v31  ;;  %v9828_v43 = vadd.f32 %v4393_v53, %v3983_v29 }
 0x1f0   : > { %v5096_v36 = vpop.f32.mrf.mxu1 }
 0x1f1   : > { %v5223_v18 = vadd.f32 %v5096_v36, %v9730_v51  ;;  %v9841_v51 = vld [vmem:[%s10022_s3] ss:$0 sm:$0xff] }
 0x1f2   : > { %v7705_v61 = vpop.f32.mrf.mxu1 }
 0x1f3   : > { %v5226_v11 = vadd.f32 %v7705_v61, %v4408_v39 }
 0x1f4   : > { %v7752_v2 = vpop.f32.mrf.mxu0  ;;  %v5099_v31 = vpop.f32.mrf.mxu1 }
 0x1f5   : > { %v5819_v17 = vadd.f32 %v7752_v2, %v5225_v19  ;;  %v5224_v7 = vadd.f32 %v5099_v31, %v4406_v49 }
 0x1f6   : > { %v5690_v16 = vpop.f32.mrf.mxu0  ;;  %v7708_v41 = vpop.f32.mrf.mxu1 }
 0x1f7   : > { %v5922_v9 = vmul.f32 %v9834_v3, %v5819_v17  ;;  %v5817_v52 = vadd.f32 %v5690_v16, %v5223_v18  ;;  %v5229_v29 = vadd.f32 %v7708_v41, %v9740_v55 }
 0x1f8   : > { %v7753_v28 = vpop.f32.mrf.mxu0  ;;  %v5112_v0 = vpop.f32.mrf.mxu1 }
 0x1f9   : > { %v5920_v57 = vmul.f32 %v9834_v3, %v5817_v52  ;;  %v5820_v60 = vadd.f32 %v7753_v28, %v5226_v11  ;;  %v5961_v15 = vadd.f32 %v9841_v51, %v5922_v9  ;;  %v5227_v33 = vadd.f32 %v5112_v0, %v9744_v58 }
 0x1fa   : > { %v5693_v56 = vpop.f32.mrf.mxu0  ;;  %v7709_v37 = vpop.f32.mrf.mxu1  ;;  %v3965_v28 = vadd.f32 %v9752_v45, %v9661_v4 }
 0x1fb   : > { %v5923_v10 = vmul.f32 %v9834_v3, %v5820_v60  ;;  %v5818_v19 = vadd.f32 %v5693_v56, %v5224_v7  ;;  %v5959_v53 = vadd.f32 %v9841_v51, %v5920_v57  ;;  %v5993_v2 = vmax.f32 %v5961_v15, 0.0 }
 0x1fc   : > { %v7756_v36 = vpop.f32.mrf.mxu0  ;;  %v5115_v61 = vpop.f32.mrf.mxu1  ;;  %v5230_v17 = vadd.f32 %v7709_v37, %v4412_v35  ;;  %v3963_v56 = vadd.f32 %v9756_v25, %v9666_v47  ;;  %v4416_v35 = vadd.f32 %v9760_v5, %v3965_v28 }
 0x1fd   : > { %v5962_v55 = vadd.f32 %v9841_v51, %v5923_v10  ;;  %v5921_v39 = vmul.f32 %v9834_v3, %v5818_v19  ;;  %v5823_v18 = vadd.f32 %v7756_v36, %v5229_v29  ;;  %v5228_v31 = vadd.f32 %v5115_v61, %v4410_v1 }
 0x1fe   : > { %v5706_v49 = vpop.f32.mrf.mxu0  ;;  %v5991_v9 = vmax.f32 %v5959_v53, 0.0 }
 0x1ff   : > { %v5994_v58 = vmax.f32 %v5962_v55, 0.0  ;;  %v5960_v11 = vadd.f32 %v9841_v51, %v5921_v39  ;;  %v5821_v46 = vadd.f32 %v5706_v49, %v5227_v33  ;;  %v5926_v38 = vmul.f32 %v9834_v3, %v5823_v18 }
 0x200   : > { %v7757_v16 = vpop.f32.mrf.mxu0  ;;  %v4414_v39 = vadd.f32 %v9763_v27, %v3963_v56 }
 0x201   : > { %v7047_v52 = vpack.c.bf16 %v5994_v58, %v5993_v2  ;;  %v5992_v7 = vmax.f32 %v5960_v11, 0.0  ;;  %v5924_v41 = vmul.f32 %v9834_v3, %v5821_v46  ;;  %v5824_v62 = vadd.f32 %v7757_v16, %v5230_v17 }
 0x202   : > { %v5709_v14 = vpop.f32.mrf.mxu0  ;;  %v5965_v29 = vadd.f32 %v9841_v51, %v5926_v38 }
 0x203   : > { %7119 = vst [vmem:[%s9865_s6 + $0x8] sm:$0xff] %v7047_v52   ;;  %v7042_v57 = vpack.c.bf16 %v5992_v7, %v5991_v9  ;;  %v5822_v60 = vadd.f32 %v5709_v14, %v5228_v31  ;;  %v5927_v0 = vmul.f32 %v9834_v3, %v5824_v62  ;;  %v5963_v10 = vadd.f32 %v9841_v51, %v5924_v41  ;;  %v7712_v45 = vpop.f32.mrf.mxu1 }
 0x204   : > { %v7760_v15 = vpop.f32.mrf.mxu0  ;;  %v5233_v33 = vadd.f32 %v7712_v45, %v9754_v12  ;;  %v5997_v53 = vmax.f32 %v5965_v29, 0.0 }
 0x205   : > { %7043 = vst [vmem:[%s9865_s6] sm:$0xff] %v7042_v57   ;;  %v5925_v4 = vmul.f32 %v9834_v3, %v5822_v60  ;;  %v5966_v19 = vadd.f32 %v9841_v51, %v5927_v0  ;;  %v5128_v36 = vpop.f32.mrf.mxu1  ;;  %v5995_v18 = vmax.f32 %v5963_v10, 0.0 }
 0x206   : > { %v5722_v37 = vpop.f32.mrf.mxu0  ;;  %v5827_v47 = vadd.f32 %v7760_v15, %v5233_v33  ;;  %v5231_v25 = vadd.f32 %v5128_v36, %v9758_v48 }
 0x207   : > { %v5964_v1 = vadd.f32 %v9841_v51, %v5925_v4  ;;  %v5998_v55 = vmax.f32 %v5966_v19, 0.0  ;;  %v7713_v2 = vpop.f32.mrf.mxu1 }
 0x208   : > { %v7761_v49 = vpop.f32.mrf.mxu0  ;;  %v5930_v17 = vmul.f32 %v9834_v3, %v5827_v47  ;;  %v5825_v5 = vadd.f32 %v5722_v37, %v5231_v25  ;;  %v5234_v58 = vadd.f32 %v7713_v2, %v4416_v35 }
 0x209   : > { %v5996_v61 = vmax.f32 %v5964_v1, 0.0  ;;  %v7057_v12 = vpack.c.bf16 %v5998_v55, %v5997_v53  ;;  %v5131_v46 = vpop.f32.mrf.mxu1 }
 0x20a   : > { %v5928_v31 = vmul.f32 %v9834_v3, %v5825_v5  ;;  %v5828_v38 = vadd.f32 %v7761_v49, %v5234_v58  ;;  %v5232_v16 = vadd.f32 %v5131_v46, %v4414_v39  ;;  %v5725_v48 = vpop.f32.mrf.mxu0  ;;  %v5969_v27 = vadd.f32 %v9841_v51, %v5930_v17 }
 0x20b   : > { %v7052_v11 = vpack.c.bf16 %v5996_v61, %v5995_v18  ;;  %7121 = vst [vmem:[%s9865_s6 + $0x18] sm:$0xff] %v7057_v12  }
 0x20c   : > { %v5931_v9 = vmul.f32 %v9834_v3, %v5828_v38  ;;  %v5826_v52 = vadd.f32 %v5725_v48, %v5232_v16  ;;  %v5967_v7 = vadd.f32 %v9841_v51, %v5928_v31  ;;  %v6001_v28 = vmax.f32 %v5969_v27, 0.0 }
 0x20d   : > { %7120 = vst [vmem:[%s9865_s6 + $0x10] sm:$0xff] %v7052_v11  }
 0x20e   : > { %v5970_v41 = vadd.f32 %v9841_v51, %v5931_v9  ;;  %v5929_v62 = vmul.f32 %v9834_v3, %v5826_v52  ;;  %v5999_v56 = vmax.f32 %v5967_v7, 0.0 }
 0x210   : > { %v7764_v14 = vpop.f32.mrf.mxu0  ;;  %v6002_v57 = vmax.f32 %v5970_v41, 0.0  ;;  %v5968_v60 = vadd.f32 %v9841_v51, %v5929_v62 }
 0x211   : > { %v7716_v29 = vpop.f32.mrf.mxu1 }
 0x212   : > { %v5237_v0 = vadd.f32 %v7716_v29, %v9767_v21  ;;  %v5738_v15 = vpop.f32.mrf.mxu0  ;;  %v7067_v10 = vpack.c.bf16 %v6002_v57, %v6001_v28  ;;  %v6000_v4 = vmax.f32 %v5968_v60, 0.0 }
 0x213   : > { %v5144_v45 = vpop.f32.mrf.mxu1 }
 0x214   : > { %v5831_v19 = vadd.f32 %v7764_v14, %v5237_v0  ;;  %v5235_v33 = vadd.f32 %v5144_v45, %v9770_v6  ;;  %7123 = vst [vmem:[%s9865_s6 + $0x28] sm:$0xff] %v7067_v10   ;;  %v7062_v37 = vpack.c.bf16 %v6000_v4, %v5999_v56  ;;  %v7765_v1 = vpop.f32.mrf.mxu0 }
 0x215   : > { %v7717_v35 = vpop.f32.mrf.mxu1 }
 0x216   : > { %v5934_v36 = vmul.f32 %v9834_v3, %v5831_v19  ;;  %v5829_v53 = vadd.f32 %v5738_v15, %v5235_v33  ;;  %v5238_v55 = vadd.f32 %v7717_v35, %v9773_v50  ;;  %7122 = vst [vmem:[%s9865_s6 + $0x20] sm:$0xff] %v7062_v37   ;;  %v5741_v18 = vpop.f32.mrf.mxu0 }
 0x217   : > { %v5147_v47 = vpop.f32.mrf.mxu1 }
 0x218   : > { %v5932_v21 = vmul.f32 %v9834_v3, %v5829_v53  ;;  %v5832_v25 = vadd.f32 %v7765_v1, %v5238_v55  ;;  %v5236_v39 = vadd.f32 %v5147_v47, %v9776_v44  ;;  %v5973_v61 = vadd.f32 %v9841_v51, %v5934_v36 }
 0x21a   : > { %v5935_v6 = vmul.f32 %v9834_v3, %v5832_v25  ;;  %v5830_v2 = vadd.f32 %v5741_v18, %v5236_v39  ;;  %v5971_v49 = vadd.f32 %v9841_v51, %v5932_v21  ;;  %v6005_v17 = vmax.f32 %v5973_v61, 0.0 }
 0x21c   : > { %v5974_v12 = vadd.f32 %v9841_v51, %v5935_v6  ;;  %v5933_v50 = vmul.f32 %v9834_v3, %v5830_v2  ;;  %v6003_v46 = vmax.f32 %v5971_v49, 0.0 }
 0x21e   : > { %v6006_v5 = vmax.f32 %v5974_v12, 0.0  ;;  %v5972_v58 = vadd.f32 %v9841_v51, %v5933_v50  ;;  %v7768_v11 = vpop.f32.mrf.mxu0 }
 0x21f   : > { %v7720_v44 = vpop.f32.mrf.mxu1 }
 0x220   : > { %v7077_v31 = vpack.c.bf16 %v6006_v5, %v6005_v17  ;;  %v6004_v38 = vmax.f32 %v5972_v58, 0.0  ;;  %v5241_v16 = vadd.f32 %v7720_v44, %v9779_v42  ;;  %v5754_v48 = vpop.f32.mrf.mxu0 }
 0x221   : > { %v5160_v27 = vpop.f32.mrf.mxu1 }
 0x222   : > { %7125 = vst [vmem:[%s9865_s6 + $0x38] sm:$0xff] %v7077_v31   ;;  %v7072_v9 = vpack.c.bf16 %v6004_v38, %v6003_v46  ;;  %v5835_v52 = vadd.f32 %v7768_v11, %v5241_v16  ;;  %v5239_v7 = vadd.f32 %v5160_v27, %v9782_v40  ;;  %v7769_v62 = vpop.f32.mrf.mxu0 }
 0x223   : > { %v7721_v41 = vpop.f32.mrf.mxu1 }
 0x224   : > { %7124 = vst [vmem:[%s9865_s6 + $0x30] sm:$0xff] %v7072_v9   ;;  %v5938_v14 = vmul.f32 %v9834_v3, %v5835_v52  ;;  %v5833_v28 = vadd.f32 %v5754_v48, %v5239_v7  ;;  %v5242_v57 = vadd.f32 %v7721_v41, %v9785_v30  ;;  %v5757_v15 = vpop.f32.mrf.mxu0 }
 0x225   : > { %v5163_v60 = vpop.f32.mrf.mxu1 }
 0x226   : > { %v5936_v29 = vmul.f32 %v9834_v3, %v5833_v28  ;;  %v5836_v0 = vadd.f32 %v7769_v62, %v5242_v57  ;;  %v5240_v42 = vadd.f32 %v5163_v60, %v9788_v20  ;;  %v5977_v56 = vadd.f32 %v9841_v51, %v5938_v14 }
 0x228   : > { %v5939_v10 = vmul.f32 %v9834_v3, %v5836_v0  ;;  %v5834_v40 = vadd.f32 %v5757_v15, %v5240_v42  ;;  %v5975_v4 = vadd.f32 %v9841_v51, %v5936_v29  ;;  %v6009_v30 = vmax.f32 %v5977_v56, 0.0 }
 0x22a   : > { %v5978_v45 = vadd.f32 %v9841_v51, %v5939_v10  ;;  %v5937_v19 = vmul.f32 %v9834_v3, %v5834_v40  ;;  %v6007_v1 = vmax.f32 %v5975_v4, 0.0 }
 0x22c   : > { %v6010_v33 = vmax.f32 %v5978_v45, 0.0  ;;  %v5976_v37 = vadd.f32 %v9841_v51, %v5937_v19  ;;  %v7772_v35 = vpop.f32.mrf.mxu0 }
 0x22d   : > { %v7724_v20 = vpop.f32.mrf.mxu1 }
 0x22e   : > { %v7087_v36 = vpack.c.bf16 %v6010_v33, %v6009_v30  ;;  %v6008_v53 = vmax.f32 %v5976_v37, 0.0  ;;  %v5245_v55 = vadd.f32 %v7724_v20, %v9791_v54  ;;  %v5770_v47 = vpop.f32.mrf.mxu0 }
 0x22f   : > { %v5176_v21 = vpop.f32.mrf.mxu1 }
 0x230   : > { %7127 = vst [vmem:[%s9865_s6 + $0x48] sm:$0xff] %v7087_v36   ;;  %v7082_v25 = vpack.c.bf16 %v6008_v53, %v6007_v1  ;;  %v5839_v39 = vadd.f32 %v7772_v35, %v5245_v55  ;;  %v5243_v18 = vadd.f32 %v5176_v21, %v9794_v59  ;;  %v7773_v6 = vpop.f32.mrf.mxu0 }
 0x231   : > { %v7725_v61 = vpop.f32.mrf.mxu1 }
 0x232   : > { %7126 = vst [vmem:[%s9865_s6 + $0x40] sm:$0xff] %v7082_v25   ;;  %v5942_v2 = vmul.f32 %v9834_v3, %v5839_v39  ;;  %v5837_v49 = vadd.f32 %v5770_v47, %v5243_v18  ;;  %v5246_v12 = vadd.f32 %v7725_v61, %v9797_v23  ;;  %v5773_v58 = vpop.f32.mrf.mxu0 }
 0x233   : > { %v5179_v50 = vpop.f32.mrf.mxu1 }
 0x234   : > { %v5940_v17 = vmul.f32 %v9834_v3, %v5837_v49  ;;  %v5840_v5 = vadd.f32 %v7773_v6, %v5246_v12  ;;  %v5244_v54 = vadd.f32 %v5179_v50, %v9800_v8  ;;  %v5981_v11 = vadd.f32 %v9841_v51, %v5942_v2 }
 0x236   : > { %v5943_v44 = vmul.f32 %v9834_v3, %v5840_v5  ;;  %v5838_v59 = vadd.f32 %v5773_v58, %v5244_v54  ;;  %v5979_v46 = vadd.f32 %v9841_v51, %v5940_v17  ;;  %v6013_v23 = vmax.f32 %v5981_v11, 0.0 }
 0x238   : > { %v5982_v31 = vadd.f32 %v9841_v51, %v5943_v44  ;;  %v5941_v38 = vmul.f32 %v9834_v3, %v5838_v59  ;;  %v6011_v9 = vmax.f32 %v5979_v46, 0.0 }
 0x23a   : > { %v6014_v16 = vmax.f32 %v5982_v31, 0.0  ;;  %v5980_v48 = vadd.f32 %v9841_v51, %v5941_v38  ;;  %v7776_v27 = vpop.f32.mrf.mxu0 }
 0x23b   : > { %v7728_v8 = vpop.f32.mrf.mxu1 }
 0x23c   : > { %v7097_v52 = vpack.c.bf16 %v6014_v16, %v6013_v23  ;;  %v6012_v7 = vmax.f32 %v5980_v48, 0.0  ;;  %v5249_v41 = vadd.f32 %v7728_v8, %v9803_v22  ;;  %v5786_v62 = vpop.f32.mrf.mxu0 }
 0x23d   : > { %v5192_v14 = vpop.f32.mrf.mxu1 }
 0x23e   : > { %7129 = vst [vmem:[%s9865_s6 + $0x58] sm:$0xff] %v7097_v52   ;;  %v7092_v28 = vpack.c.bf16 %v6012_v7, %v6011_v9  ;;  %v5843_v57 = vadd.f32 %v7776_v27, %v5249_v41  ;;  %v5247_v60 = vadd.f32 %v5192_v14, %v9806_v63  ;;  %v7777_v0 = vpop.f32.mrf.mxu0 }
 0x23f   : > { %v7729_v29 = vpop.f32.mrf.mxu1 }
 0x240   : > { %7128 = vst [vmem:[%s9865_s6 + $0x50] sm:$0xff] %v7092_v28   ;;  %v5946_v42 = vmul.f32 %v9834_v3, %v5843_v57  ;;  %v5841_v15 = vadd.f32 %v5786_v62, %v5247_v60  ;;  %v5250_v56 = vadd.f32 %v7729_v29, %v9809_v24  ;;  %v5789_v45 = vpop.f32.mrf.mxu0 }
 0x241   : > { %v5195_v10 = vpop.f32.mrf.mxu1 }
 0x242   : > { %v5944_v40 = vmul.f32 %v9834_v3, %v5841_v15  ;;  %v5844_v4 = vadd.f32 %v7777_v0, %v5250_v56  ;;  %v5248_v22 = vadd.f32 %v5195_v10, %v9812_v13  ;;  %v5985_v19 = vadd.f32 %v9841_v51, %v5946_v42 }
 0x244   : > { %v5947_v30 = vmul.f32 %v9834_v3, %v5844_v4  ;;  %v5842_v63 = vadd.f32 %v5789_v45, %v5248_v22  ;;  %v5983_v33 = vadd.f32 %v9841_v51, %v5944_v40  ;;  %v6017_v24 = vmax.f32 %v5985_v19, 0.0 }
 0x246   : > { %v5986_v37 = vadd.f32 %v9841_v51, %v5947_v30  ;;  %v5945_v35 = vmul.f32 %v9834_v3, %v5842_v63  ;;  %v6015_v53 = vmax.f32 %v5983_v33, 0.0 }
 0x248   : > { %v6018_v20 = vmax.f32 %v5986_v37, 0.0  ;;  %v5984_v1 = vadd.f32 %v9841_v51, %v5945_v35  ;;  %v7780_v36 = vpop.f32.mrf.mxu0 }
 0x249   : > { %v7732_v13 = vpop.f32.mrf.mxu1 }
 0x24a   : > { %v7107_v55 = vpack.c.bf16 %v6018_v20, %v6017_v24  ;;  %v6016_v47 = vmax.f32 %v5984_v1, 0.0  ;;  %v5253_v21 = vadd.f32 %v7732_v13, %v9815_v26  ;;  %v5802_v25 = vpop.f32.mrf.mxu0 }
 0x24b   : > { %v5208_v39 = vpop.f32.mrf.mxu1 }
 0x24c   : > { %7131 = vst [vmem:[%s9865_s6 + $0x68] sm:$0xff] %v7107_v55   ;;  %v7102_v18 = vpack.c.bf16 %v6016_v47, %v6015_v53  ;;  %v5847_v61 = vadd.f32 %v7780_v36, %v5253_v21  ;;  %v5251_v6 = vadd.f32 %v5208_v39, %v9820_v34  ;;  %v7781_v49 = vpop.f32.mrf.mxu0 }
 0x24d   : > { %v7733_v2 = vpop.f32.mrf.mxu1 }
 0x24e   : > { %7130 = vst [vmem:[%s9865_s6 + $0x60] sm:$0xff] %v7102_v18   ;;  %v5950_v12 = vmul.f32 %v9834_v3, %v5847_v61  ;;  %v5845_v50 = vadd.f32 %v5802_v25, %v5251_v6  ;;  %v5254_v17 = vadd.f32 %v7733_v2, %v9824_v32  ;;  %v5805_v11 = vpop.f32.mrf.mxu0 }
 0x24f   : > { %v5211_v5 = vpop.f32.mrf.mxu1 }
 0x250   : > { %v5948_v26 = vmul.f32 %v9834_v3, %v5845_v50  ;;  %v5848_v54 = vadd.f32 %v7781_v49, %v5254_v17  ;;  %v5252_v58 = vadd.f32 %v5211_v5, %v9828_v43  ;;  %v5989_v44 = vadd.f32 %v9841_v51, %v5950_v12 }
 0x252   : > { %v5951_v34 = vmul.f32 %v9834_v3, %v5848_v54  ;;  %v5846_v59 = vadd.f32 %v5805_v11, %v5252_v58  ;;  %v5987_v46 = vadd.f32 %v9841_v51, %v5948_v26  ;;  %v6021_v38 = vmax.f32 %v5989_v44, 0.0 }
 0x254   : > { %v5990_v32 = vadd.f32 %v9841_v51, %v5951_v34  ;;  %v5949_v31 = vmul.f32 %v9834_v3, %v5846_v59  ;;  %v6019_v16 = vmax.f32 %v5987_v46, 0.0 }
 0x256   : > { %v6022_v23 = vmax.f32 %v5990_v32, 0.0  ;;  %v5988_v43 = vadd.f32 %v9841_v51, %v5949_v31 }
 0x258   : > { %v7117_v48 = vpack.c.bf16 %v6022_v23, %v6021_v38  ;;  %v6020_v27 = vmax.f32 %v5988_v43, 0.0 }
 0x25a   : > { %7133 = vst [vmem:[%s9865_s6 + $0x78] sm:$0xff] %v7117_v48   ;;  %v7112_v3 = vpack.c.bf16 %v6020_v27, %v6019_v16 }
 0x25c   : > { %7132 = vst [vmem:[%s9865_s6 + $0x70] sm:$0xff] %v7112_v3  }
 0x25d   : > { %7989 = shalt.err (!%p7986_p5)
}
 0x25e   : > { %s7990_s13 = scalar_lea.hbm %s9966_s11, 2048  ;;  %s7994_s29 = scalar_lea.hbm %s10023_s4, 4096 }
 0x25f   : > { %p7991_p6 = scmp.ne.s32.totalorder %s9966_s11, %s7990_s13  ;;  %p7995_p10 = scmp.lt.s32.totalorder %s9966_s11, %s10023_s4 }
 0x260   : > { %p7996_p11 = scmp.lt.s32.totalorder %s7994_s29, %s7990_s13 }
 0x261   : > { %p7992_p7 = pnand %p7991_p6, %p8122_p4 }
 0x262   : > { %p7997_p12 = por %p7996_p11, %p7995_p10 }
 0x263   : > { %p7993_p9 = pneg %p7992_p7 }
 0x265   : > { %p7998_p13 = pnand %p7997_p12, %p7993_p9 }
 0x267   : > { %8001 = shalt.err (!%p7998_p13)
}
 0x268   : > { %s8055_s6 = smov 64   ;;  %s8056_s7 = smov 4  }
 0x269   : > { %7799 = dma.vmem_to_hbm [thread:$0]  (%p8122_p4), %s9968_s8, 2048, %s9966_s11, %s9974_s12, %s8055_s6, %s8055_s6, %s8056_s7  }
 0x26a PF: > { %p7805_p0 = scmp.ge.s32.totalorder %s8052_s20, 2  ;;  %s6213_s9 = sand.u32 1, %s8032_s15  }
 0x26b   : > { %s6214_s10 = scalar_lea.sflag [#allocation4], %s6213_s9 }
 0x26c   : > { %p7802_p1 = pnand %p7805_p0, %p8129_p8 }
 0x26e   : > { %p7803_p2 = pneg %p7802_p1 }
 0x270   : > { %8027 = dma.done.wait (%p7803_p2), %s6214_s10, 2048  }
 0x271   : > { %8029 = vsyncadd (%p7803_p2), %s6214_s10, 4294965248  ;;  %s17_s20 = sadd.s32 1, %s8052_s20   ;;  %s10105_s15 = smov %s8036_s16 }
 0x272   : > { %p14_p3 = scmp.ge.s32.totalorder %s17_s20, 4   ;;  %s10106_s16 = smov %s8040_s17 }
 0x273   : > { %s10107_s17 = smov %s8135_s28  ;;  %s10108_s18 = smov %s8048_s19 }
 0x274   : > { %s10109_s19 = smov %s10111_s23  ;;  %16 = sbr.rel (!%p14_p3) target bundleno = 4 (0x4), region = 90 }
 0x279   :  { %6219 = vsyncpa [#allocation4], 1 }
 0x27a   :  { %6221 = vsyncpa [#allocation4 + $0x1], 1 }

</bundles_post_ra>
